<compile_context>
chip_gen: v7x
topology: tpu7x:2x2x1
jax: 0.10.0
libtpu: 0.0.40
codegen_flags: <defaults>
</compile_context>

<pallas_src>
import functools

import jax
import jax.numpy as jnp
from jax.experimental import pallas as pl
from jax.experimental.pallas import tpu as pltpu


def _down_kernel(wa_ref, wb_ref, s0_ref, s1_ref, b_ref, x_ref, o_ref, *,
                 c_out, tho, slope):
    """One (image n, row-band i) tile of conv(2x2, stride 2) + bias + LeakyReLU."""
    wa = wa_ref[...]            # (2*C_out, C_in)  rows = dx*C_out + co, dy = 0
    wb = wb_ref[...]            # (2*C_out, C_in)  rows = dx*C_out + co, dy = 1
    s0 = s0_ref[...]            # (W, Wo)  s0[w, wo] = (w == 2*wo)
    s1 = s1_ref[...]            # (W, Wo)  s1[w, wo] = (w == 2*wo + 1)
    bias = b_ref[...]           # (C_out, 1) f32

    def row(h):
        xa = x_ref[0, :, 2 * h, :]          # (C_in, W)  input row 2h   (dy = 0)
        xb = x_ref[0, :, 2 * h + 1, :]      # (C_in, W)  input row 2h+1 (dy = 1)
        # Stage 1: channel / dy contraction at full W (lane-dense), f32 accum.
        u = (jnp.dot(wa, xa, preferred_element_type=jnp.float32)
             + jnp.dot(wb, xb, preferred_element_type=jnp.float32))     # (2*C_out, W)
        u = u.astype(s0.dtype)
        # Stage 2: stride-2 column pick as a 0/1 selection matmul (MXU).
        y = (jnp.dot(u[:c_out, :], s0, preferred_element_type=jnp.float32)
             + jnp.dot(u[c_out:, :], s1, preferred_element_type=jnp.float32))  # (C_out, Wo)
        y = y + bias
        y = jnp.where(y >= 0.0, y, slope * y)
        o_ref[0, :, h, :] = y.astype(o_ref.dtype)

    if tho <= 16:
        # Small static unroll: every ref index is static.
        for h in range(tho):
            row(h)
    else:
        # Long row tiles: rolled loop with a dynamic (non-minor dim) row index.
        def body(h, carry):
            row(h)
            return carry
        jax.lax.fori_loop(0, tho, body, 0)


def _choose_tho(N, Ho, Wo, W, C_in, C_out, itemsize):
    """Output-row tile height.

    Must divide Ho and satisfy the TPU block rule (tho % 8 == 0, or tho == Ho).
    Prefer the largest tile <= 64 rows whose double-buffered in/out tiles stay
    small in VMEM and that still leaves >= 8 grid steps for DMA pipelining /
    megacore when the image size allows it."""
    cands = [t for t in range(8, min(Ho, 64) + 1, 8) if Ho % t == 0]
    if not cands:
        return Ho                               # tiny images: one band per image

    def tile_bytes(t):
        return 2 * (C_in * 2 * t * W + C_out * t * Wo) * itemsize

    fit = [t for t in cands if tile_bytes(t) <= 8 * 1024 * 1024]
    cands = fit if fit else cands[:1]
    good = [t for t in cands if N * (Ho // t) >= 8]
    return max(good) if good else max(cands)


def downsampling_unet(x, w, b, negative_slope=0.01):
    """x: (N, C_in, H, W), w: (C_out, C_in, 2, 2), b: (C_out,)
       -> (N, C_out, H//2, W//2), matching DownSampling_UNet.forward."""
    N, C_in, H, W = x.shape
    C_out = w.shape[0]
    assert H % 2 == 0 and W % 2 == 0, (H, W)
    Ho, Wo = H // 2, W // 2
    cdtype = x.dtype
    itemsize = x.dtype.itemsize

    tho = _choose_tho(N, Ho, Wo, W, C_in, C_out, itemsize)
    assert Ho % tho == 0, (Ho, tho)
    n_ht = Ho // tho

    # Weight rearrangement (tiny, XLA-side): wa/wb[dx*C_out + co, ci] = w[co, ci, dy, dx].
    wdx = jnp.transpose(w, (3, 2, 0, 1)).astype(cdtype)       # (dx, dy, C_out, C_in)
    wa = wdx[:, 0].reshape(2 * C_out, C_in)                   # dy = 0
    wb = wdx[:, 1].reshape(2 * C_out, C_in)                   # dy = 1

    # 0/1 selection matrices implementing the stride-2 column pick on the MXU.
    w_idx = jnp.arange(W)[:, None]
    wo_idx = 2 * jnp.arange(Wo)[None, :]
    s0 = (w_idx == wo_idx).astype(cdtype)                     # (W, Wo)
    s1 = (w_idx == wo_idx + 1).astype(cdtype)                 # (W, Wo)

    b2 = b.reshape(C_out, 1).astype(jnp.float32)

    # Advisory cost + VMEM budget (keeps v5e's 16 MiB scoped default safe and
    # stays well under v7x's 64 MiB physical VMEM).
    flops = N * Ho * (8 * C_out * C_in * W + 4 * C_out * W * Wo)
    bytes_accessed = (N * C_in * H * W + N * C_out * Ho * Wo
                      + 4 * C_out * C_in + 2 * W * Wo) * itemsize + 4 * C_out
    in_tile = C_in * 2 * tho * W * itemsize
    out_tile = C_out * tho * Wo * itemsize
    weight_bytes = (4 * C_out * C_in + 2 * W * Wo) * itemsize + 4 * C_out
    working_set = 2 * (in_tile + out_tile) + 2 * weight_bytes
    vmem_limit = int(min(48 << 20, max(32 << 20, 2 * working_set)))

    kern = functools.partial(_down_kernel, c_out=C_out, tho=tho,
                             slope=float(negative_slope))
    out = pl.pallas_call(
        kern,
        out_shape=jax.ShapeDtypeStruct((N, C_out, Ho, Wo), cdtype),
        grid=(N, n_ht),
        in_specs=[
            pl.BlockSpec((2 * C_out, C_in), lambda n, i: (0, 0)),      # wa (resident)
            pl.BlockSpec((2 * C_out, C_in), lambda n, i: (0, 0)),      # wb (resident)
            pl.BlockSpec((W, Wo), lambda n, i: (0, 0)),                # S0 (resident)
            pl.BlockSpec((W, Wo), lambda n, i: (0, 0)),                # S1 (resident)
            pl.BlockSpec((C_out, 1), lambda n, i: (0, 0)),             # bias (resident)
            pl.BlockSpec((1, C_in, 2 * tho, W), lambda n, i: (n, 0, i, 0)),  # NCHW row band
        ],
        out_specs=pl.BlockSpec((1, C_out, tho, Wo), lambda n, i: (n, 0, i, 0)),  # NCHW out
        compiler_params=pltpu.CompilerParams(
            dimension_semantics=("parallel", "parallel"),
            vmem_limit_bytes=vmem_limit),
        cost_estimate=pl.CostEstimate(
            flops=int(flops), transcendentals=0,
            bytes_accessed=int(bytes_accessed)),
    )(wa, wb, s0, s1, b2, x)
    return out


def _reference(x, w, b, negative_slope=0.01):
    """Pure-XLA reference: conv(stride 2) + bias + LeakyReLU."""
    y = jax.lax.conv_general_dilated(
        x, w, window_strides=(2, 2), padding="VALID",
        dimension_numbers=("NCHW", "OIHW", "NCHW"))
    y = y + b.reshape(1, -1, 1, 1)
    return jnp.where(y >= 0.0, y, negative_slope * y)


def init_params(key, C_in, C_out):
    """PyTorch nn.Conv2d default init: U(-1/sqrt(fan_in), 1/sqrt(fan_in))."""
    kw_, kb = jax.random.split(key)
    fan_in = C_in * 2 * 2
    bound = 1.0 / jnp.sqrt(jnp.float32(fan_in))
    w = jax.random.uniform(kw_, (C_out, C_in, 2, 2), jnp.float32, -bound, bound)
    b = jax.random.uniform(kb, (C_out,), jnp.float32, -bound, bound)
    return w, b


if __name__ == "__main__":
    key = jax.random.PRNGKey(0)
    kx, kp = jax.random.split(key)

    N, C_in, C_out, Hs, Ws = 2, 4, 32, 16, 16
    x = jax.random.normal(kx, (N, C_in, Hs, Ws), jnp.float32)
    w, b = init_params(kp, C_in, C_out)

    fwd = jax.jit(downsampling_unet)

    # f32 path: check against the XLA conv reference.
    out = fwd(x, w, b)
    jax.block_until_ready(out)
    ref = _reference(x, w, b)
    assert out.shape == (N, C_out, Hs // 2, Ws // 2), out.shape
    assert bool(jnp.all(jnp.isfinite(out)))
    err = float(jnp.max(jnp.abs(out - ref)))
    assert err < 2e-2, err

    # bf16 fast path (halves HBM activation traffic; f32 accumulation inside).
    x_bf = x.astype(jnp.bfloat16)
    w_bf = w.astype(jnp.bfloat16)
    out_bf = fwd(x_bf, w_bf, b)
    jax.block_until_ready(out_bf)
    ref_bf = _reference(x_bf.astype(jnp.float32), w_bf.astype(jnp.float32), b)
    assert out_bf.dtype == jnp.bfloat16
    err_bf = float(jnp.max(jnp.abs(out_bf.astype(jnp.float32) - ref_bf)))
    assert err_bf < 1e-1, err_bf

    print("KERNEL_OK")
</pallas_src>

<mosaic_0001>
module attributes {stable_mosaic.version = 11 : i64} {
  func.func @_down_kernel(%arg0: i32, %arg1: i32, %arg2: memref<64x4xf32, #tpu.memory_space<vmem>>, %arg3: memref<64x4xf32, #tpu.memory_space<vmem>>, %arg4: memref<16x8xf32, #tpu.memory_space<vmem>>, %arg5: memref<16x8xf32, #tpu.memory_space<vmem>>, %arg6: memref<32x1xf32, #tpu.memory_space<vmem>>, %arg7: memref<1x4x16x16xf32, #tpu.memory_space<vmem>>, %arg8: memref<1x32x8x8xf32, #tpu.memory_space<vmem>>) attributes {dimension_semantics = [#tpu.dimension_semantics<parallel>, #tpu.dimension_semantics<parallel>], iteration_bounds = array<i64: 2, 1>, scalar_prefetch = 0 : i64, scratch_operands = 0 : i64, tpu.core_type = #tpu.core_type<tc>, window_params = [{pipeline_mode = #tpu.pipeline_mode<synchronous>, transform_indices = @transform_0, window_bounds = array<i64: 64, 4>}, {pipeline_mode = #tpu.pipeline_mode<synchronous>, transform_indices = @transform_1, window_bounds = array<i64: 64, 4>}, {pipeline_mode = #tpu.pipeline_mode<synchronous>, transform_indices = @transform_2, window_bounds = array<i64: 16, 8>}, {pipeline_mode = #tpu.pipeline_mode<synchronous>, transform_indices = @transform_3, window_bounds = array<i64: 16, 8>}, {pipeline_mode = #tpu.pipeline_mode<synchronous>, transform_indices = @transform_4, window_bounds = array<i64: 32, 1>}, {transform_indices = @transform_5, window_bounds = array<i64: 1, 4, 16, 16>}, {transform_indices = @transform_6, window_bounds = array<i64: 1, 32, 8, 8>}]} {
    %c0 = arith.constant 0 : index
    %c0_0 = arith.constant 0 : index
    %0 = vector.load %arg2[%c0, %c0_0] : memref<64x4xf32, #tpu.memory_space<vmem>>, vector<64x4xf32>
    %c0_1 = arith.constant 0 : index
    %c0_2 = arith.constant 0 : index
    %1 = vector.load %arg3[%c0_1, %c0_2] : memref<64x4xf32, #tpu.memory_space<vmem>>, vector<64x4xf32>
    %c0_3 = arith.constant 0 : index
    %c0_4 = arith.constant 0 : index
    %2 = vector.load %arg4[%c0_3, %c0_4] : memref<16x8xf32, #tpu.memory_space<vmem>>, vector<16x8xf32>
    %c0_5 = arith.constant 0 : index
    %c0_6 = arith.constant 0 : index
    %3 = vector.load %arg5[%c0_5, %c0_6] : memref<16x8xf32, #tpu.memory_space<vmem>>, vector<16x8xf32>
    %c0_7 = arith.constant 0 : index
    %c0_8 = arith.constant 0 : index
    %4 = vector.load %arg6[%c0_7, %c0_8] : memref<32x1xf32, #tpu.memory_space<vmem>>, vector<32x1xf32>
    %c0_9 = arith.constant 0 : index
    %c0_10 = arith.constant 0 : index
    %c0_11 = arith.constant 0 : index
    %c0_12 = arith.constant 0 : index
    %5 = vector.load %arg7[%c0_9, %c0_10, %c0_11, %c0_12] : memref<1x4x16x16xf32, #tpu.memory_space<vmem>>, vector<1x4x1x16xf32>
    %6 = vector.shape_cast %5 : vector<1x4x1x16xf32> to vector<4x16xf32>
    %c0_13 = arith.constant 0 : index
    %c0_14 = arith.constant 0 : index
    %c1 = arith.constant 1 : index
    %c0_15 = arith.constant 0 : index
    %7 = vector.load %arg7[%c0_13, %c0_14, %c1, %c0_15] : memref<1x4x16x16xf32, #tpu.memory_space<vmem>>, vector<1x4x1x16xf32>
    %8 = vector.shape_cast %7 : vector<1x4x1x16xf32> to vector<4x16xf32>
    %cst = arith.constant dense<0.000000e+00> : vector<64x16xf32>
    %9 = tpu.matmul %0, %6, %cst {dimension_numbers = #tpu.dot_dimension_numbers<[1], [0], [0], [1], [0, 0, 1, 1], [], []>} : vector<64x4xf32>, vector<4x16xf32>, vector<64x16xf32> -> vector<64x16xf32>
    %cst_16 = arith.constant dense<0.000000e+00> : vector<64x16xf32>
    %10 = tpu.matmul %1, %8, %cst_16 {dimension_numbers = #tpu.dot_dimension_numbers<[1], [0], [0], [1], [0, 0, 1, 1], [], []>} : vector<64x4xf32>, vector<4x16xf32>, vector<64x16xf32> -> vector<64x16xf32>
    %11 = arith.addf %9, %10 : vector<64x16xf32>
    %12 = vector.extract_strided_slice %11 {offsets = [0, 0], sizes = [32, 16], strides = [1, 1]} : vector<64x16xf32> to vector<32x16xf32>
    %cst_17 = arith.constant dense<0.000000e+00> : vector<32x8xf32>
    %13 = tpu.matmul %12, %2, %cst_17 {dimension_numbers = #tpu.dot_dimension_numbers<[1], [0], [0], [1], [0, 0, 1, 1], [], []>} : vector<32x16xf32>, vector<16x8xf32>, vector<32x8xf32> -> vector<32x8xf32>
    %14 = vector.extract_strided_slice %11 {offsets = [32, 0], sizes = [32, 16], strides = [1, 1]} : vector<64x16xf32> to vector<32x16xf32>
    %cst_18 = arith.constant dense<0.000000e+00> : vector<32x8xf32>
    %15 = tpu.matmul %14, %3, %cst_18 {dimension_numbers = #tpu.dot_dimension_numbers<[1], [0], [0], [1], [0, 0, 1, 1], [], []>} : vector<32x16xf32>, vector<16x8xf32>, vector<32x8xf32> -> vector<32x8xf32>
    %16 = arith.addf %13, %15 : vector<32x8xf32>
    %17 = vector.broadcast %4 : vector<32x1xf32> to vector<32x8xf32>
    %18 = arith.addf %16, %17 : vector<32x8xf32>
    %cst_19 = arith.constant 0.000000e+00 : f32
    %19 = vector.broadcast %cst_19 : f32 to vector<32x8xf32>
    %20 = arith.cmpf oge, %18, %19 : vector<32x8xf32>
    %cst_20 = arith.constant 0.00999999977 : f32
    %21 = vector.broadcast %cst_20 : f32 to vector<32x8xf32>
    %22 = arith.mulf %21, %18 : vector<32x8xf32>
    %23 = arith.select %20, %18, %22 : vector<32x8xi1>, vector<32x8xf32>
    %c0_21 = arith.constant 0 : index
    %c0_22 = arith.constant 0 : index
    %c0_23 = arith.constant 0 : index
    %c0_24 = arith.constant 0 : index
    %24 = vector.load %arg8[%c0_21, %c0_22, %c0_23, %c0_24] : memref<1x32x8x8xf32, #tpu.memory_space<vmem>>, vector<1x32x1x8xf32>
    %25 = vector.shape_cast %24 : vector<1x32x1x8xf32> to vector<32x8xf32>
    %26 = vector.shape_cast %23 : vector<32x8xf32> to vector<1x32x1x8xf32>
    tpu.vector_store %arg8[%c0_21, %c0_22, %c0_23, %c0_24], %26 {strides = array<i32>} : memref<1x32x8x8xf32, #tpu.memory_space<vmem>>, vector<1x32x1x8xf32>,
    %c0_25 = arith.constant 0 : index
    %c0_26 = arith.constant 0 : index
    %c2 = arith.constant 2 : index
    %c0_27 = arith.constant 0 : index
    %27 = vector.load %arg7[%c0_25, %c0_26, %c2, %c0_27] : memref<1x4x16x16xf32, #tpu.memory_space<vmem>>, vector<1x4x1x16xf32>
    %28 = vector.shape_cast %27 : vector<1x4x1x16xf32> to vector<4x16xf32>
    %c0_28 = arith.constant 0 : index
    %c0_29 = arith.constant 0 : index
    %c3 = arith.constant 3 : index
    %c0_30 = arith.constant 0 : index
    %29 = vector.load %arg7[%c0_28, %c0_29, %c3, %c0_30] : memref<1x4x16x16xf32, #tpu.memory_space<vmem>>, vector<1x4x1x16xf32>
    %30 = vector.shape_cast %29 : vector<1x4x1x16xf32> to vector<4x16xf32>
    %cst_31 = arith.constant dense<0.000000e+00> : vector<64x16xf32>
    %31 = tpu.matmul %0, %28, %cst_31 {dimension_numbers = #tpu.dot_dimension_numbers<[1], [0], [0], [1], [0, 0, 1, 1], [], []>} : vector<64x4xf32>, vector<4x16xf32>, vector<64x16xf32> -> vector<64x16xf32>
    %cst_32 = arith.constant dense<0.000000e+00> : vector<64x16xf32>
    %32 = tpu.matmul %1, %30, %cst_32 {dimension_numbers = #tpu.dot_dimension_numbers<[1], [0], [0], [1], [0, 0, 1, 1], [], []>} : vector<64x4xf32>, vector<4x16xf32>, vector<64x16xf32> -> vector<64x16xf32>
    %33 = arith.addf %31, %32 : vector<64x16xf32>
    %34 = vector.extract_strided_slice %33 {offsets = [0, 0], sizes = [32, 16], strides = [1, 1]} : vector<64x16xf32> to vector<32x16xf32>
    %cst_33 = arith.constant dense<0.000000e+00> : vector<32x8xf32>
    %35 = tpu.matmul %34, %2, %cst_33 {dimension_numbers = #tpu.dot_dimension_numbers<[1], [0], [0], [1], [0, 0, 1, 1], [], []>} : vector<32x16xf32>, vector<16x8xf32>, vector<32x8xf32> -> vector<32x8xf32>
    %36 = vector.extract_strided_slice %33 {offsets = [32, 0], sizes = [32, 16], strides = [1, 1]} : vector<64x16xf32> to vector<32x16xf32>
    %cst_34 = arith.constant dense<0.000000e+00> : vector<32x8xf32>
    %37 = tpu.matmul %36, %3, %cst_34 {dimension_numbers = #tpu.dot_dimension_numbers<[1], [0], [0], [1], [0, 0, 1, 1], [], []>} : vector<32x16xf32>, vector<16x8xf32>, vector<32x8xf32> -> vector<32x8xf32>
    %38 = arith.addf %35, %37 : vector<32x8xf32>
    %39 = vector.broadcast %4 : vector<32x1xf32> to vector<32x8xf32>
    %40 = arith.addf %38, %39 : vector<32x8xf32>
    %cst_35 = arith.constant 0.000000e+00 : f32
    %41 = vector.broadcast %cst_35 : f32 to vector<32x8xf32>
    %42 = arith.cmpf oge, %40, %41 : vector<32x8xf32>
    %cst_36 = arith.constant 0.00999999977 : f32
    %43 = vector.broadcast %cst_36 : f32 to vector<32x8xf32>
    %44 = arith.mulf %43, %40 : vector<32x8xf32>
    %45 = arith.select %42, %40, %44 : vector<32x8xi1>, vector<32x8xf32>
    %c0_37 = arith.constant 0 : index
    %c0_38 = arith.constant 0 : index
    %c1_39 = arith.constant 1 : index
    %c0_40 = arith.constant 0 : index
    %46 = vector.load %arg8[%c0_37, %c0_38, %c1_39, %c0_40] : memref<1x32x8x8xf32, #tpu.memory_space<vmem>>, vector<1x32x1x8xf32>
    %47 = vector.shape_cast %46 : vector<1x32x1x8xf32> to vector<32x8xf32>
    %48 = vector.shape_cast %45 : vector<32x8xf32> to vector<1x32x1x8xf32>
    tpu.vector_store %arg8[%c0_37, %c0_38, %c1_39, %c0_40], %48 {strides = array<i32>} : memref<1x32x8x8xf32, #tpu.memory_space<vmem>>, vector<1x32x1x8xf32>,
    %c0_41 = arith.constant 0 : index
    %c0_42 = arith.constant 0 : index
    %c4 = arith.constant 4 : index
    %c0_43 = arith.constant 0 : index
    %49 = vector.load %arg7[%c0_41, %c0_42, %c4, %c0_43] : memref<1x4x16x16xf32, #tpu.memory_space<vmem>>, vector<1x4x1x16xf32>
    %50 = vector.shape_cast %49 : vector<1x4x1x16xf32> to vector<4x16xf32>
    %c0_44 = arith.constant 0 : index
    %c0_45 = arith.constant 0 : index
    %c5 = arith.constant 5 : index
    %c0_46 = arith.constant 0 : index
    %51 = vector.load %arg7[%c0_44, %c0_45, %c5, %c0_46] : memref<1x4x16x16xf32, #tpu.memory_space<vmem>>, vector<1x4x1x16xf32>
    %52 = vector.shape_cast %51 : vector<1x4x1x16xf32> to vector<4x16xf32>
    %cst_47 = arith.constant dense<0.000000e+00> : vector<64x16xf32>
    %53 = tpu.matmul %0, %50, %cst_47 {dimension_numbers = #tpu.dot_dimension_numbers<[1], [0], [0], [1], [0, 0, 1, 1], [], []>} : vector<64x4xf32>, vector<4x16xf32>, vector<64x16xf32> -> vector<64x16xf32>
    %cst_48 = arith.constant dense<0.000000e+00> : vector<64x16xf32>
    %54 = tpu.matmul %1, %52, %cst_48 {dimension_numbers = #tpu.dot_dimension_numbers<[1], [0], [0], [1], [0, 0, 1, 1], [], []>} : vector<64x4xf32>, vector<4x16xf32>, vector<64x16xf32> -> vector<64x16xf32>
    %55 = arith.addf %53, %54 : vector<64x16xf32>
    %56 = vector.extract_strided_slice %55 {offsets = [0, 0], sizes = [32, 16], strides = [1, 1]} : vector<64x16xf32> to vector<32x16xf32>
    %cst_49 = arith.constant dense<0.000000e+00> : vector<32x8xf32>
    %57 = tpu.matmul %56, %2, %cst_49 {dimension_numbers = #tpu.dot_dimension_numbers<[1], [0], [0], [1], [0, 0, 1, 1], [], []>} : vector<32x16xf32>, vector<16x8xf32>, vector<32x8xf32> -> vector<32x8xf32>
    %58 = vector.extract_strided_slice %55 {offsets = [32, 0], sizes = [32, 16], strides = [1, 1]} : vector<64x16xf32> to vector<32x16xf32>
    %cst_50 = arith.constant dense<0.000000e+00> : vector<32x8xf32>
    %59 = tpu.matmul %58, %3, %cst_50 {dimension_numbers = #tpu.dot_dimension_numbers<[1], [0], [0], [1], [0, 0, 1, 1], [], []>} : vector<32x16xf32>, vector<16x8xf32>, vector<32x8xf32> -> vector<32x8xf32>
    %60 = arith.addf %57, %59 : vector<32x8xf32>
    %61 = vector.broadcast %4 : vector<32x1xf32> to vector<32x8xf32>
    %62 = arith.addf %60, %61 : vector<32x8xf32>
    %cst_51 = arith.constant 0.000000e+00 : f32
    %63 = vector.broadcast %cst_51 : f32 to vector<32x8xf32>
    %64 = arith.cmpf oge, %62, %63 : vector<32x8xf32>
    %cst_52 = arith.constant 0.00999999977 : f32
    %65 = vector.broadcast %cst_52 : f32 to vector<32x8xf32>
    %66 = arith.mulf %65, %62 : vector<32x8xf32>
    %67 = arith.select %64, %62, %66 : vector<32x8xi1>, vector<32x8xf32>
    %c0_53 = arith.constant 0 : index
    %c0_54 = arith.constant 0 : index
    %c2_55 = arith.constant 2 : index
    %c0_56 = arith.constant 0 : index
    %68 = vector.load %arg8[%c0_53, %c0_54, %c2_55, %c0_56] : memref<1x32x8x8xf32, #tpu.memory_space<vmem>>, vector<1x32x1x8xf32>
    %69 = vector.shape_cast %68 : vector<1x32x1x8xf32> to vector<32x8xf32>
    %70 = vector.shape_cast %67 : vector<32x8xf32> to vector<1x32x1x8xf32>
    tpu.vector_store %arg8[%c0_53, %c0_54, %c2_55, %c0_56], %70 {strides = array<i32>} : memref<1x32x8x8xf32, #tpu.memory_space<vmem>>, vector<1x32x1x8xf32>,
    %c0_57 = arith.constant 0 : index
    %c0_58 = arith.constant 0 : index
    %c6 = arith.constant 6 : index
    %c0_59 = arith.constant 0 : index
    %71 = vector.load %arg7[%c0_57, %c0_58, %c6, %c0_59] : memref<1x4x16x16xf32, #tpu.memory_space<vmem>>, vector<1x4x1x16xf32>
    %72 = vector.shape_cast %71 : vector<1x4x1x16xf32> to vector<4x16xf32>
    %c0_60 = arith.constant 0 : index
    %c0_61 = arith.constant 0 : index
    %c7 = arith.constant 7 : index
    %c0_62 = arith.constant 0 : index
    %73 = vector.load %arg7[%c0_60, %c0_61, %c7, %c0_62] : memref<1x4x16x16xf32, #tpu.memory_space<vmem>>, vector<1x4x1x16xf32>
    %74 = vector.shape_cast %73 : vector<1x4x1x16xf32> to vector<4x16xf32>
    %cst_63 = arith.constant dense<0.000000e+00> : vector<64x16xf32>
    %75 = tpu.matmul %0, %72, %cst_63 {dimension_numbers = #tpu.dot_dimension_numbers<[1], [0], [0], [1], [0, 0, 1, 1], [], []>} : vector<64x4xf32>, vector<4x16xf32>, vector<64x16xf32> -> vector<64x16xf32>
    %cst_64 = arith.constant dense<0.000000e+00> : vector<64x16xf32>
    %76 = tpu.matmul %1, %74, %cst_64 {dimension_numbers = #tpu.dot_dimension_numbers<[1], [0], [0], [1], [0, 0, 1, 1], [], []>} : vector<64x4xf32>, vector<4x16xf32>, vector<64x16xf32> -> vector<64x16xf32>
    %77 = arith.addf %75, %76 : vector<64x16xf32>
    %78 = vector.extract_strided_slice %77 {offsets = [0, 0], sizes = [32, 16], strides = [1, 1]} : vector<64x16xf32> to vector<32x16xf32>
    %cst_65 = arith.constant dense<0.000000e+00> : vector<32x8xf32>
    %79 = tpu.matmul %78, %2, %cst_65 {dimension_numbers = #tpu.dot_dimension_numbers<[1], [0], [0], [1], [0, 0, 1, 1], [], []>} : vector<32x16xf32>, vector<16x8xf32>, vector<32x8xf32> -> vector<32x8xf32>
    %80 = vector.extract_strided_slice %77 {offsets = [32, 0], sizes = [32, 16], strides = [1, 1]} : vector<64x16xf32> to vector<32x16xf32>
    %cst_66 = arith.constant dense<0.000000e+00> : vector<32x8xf32>
    %81 = tpu.matmul %80, %3, %cst_66 {dimension_numbers = #tpu.dot_dimension_numbers<[1], [0], [0], [1], [0, 0, 1, 1], [], []>} : vector<32x16xf32>, vector<16x8xf32>, vector<32x8xf32> -> vector<32x8xf32>
    %82 = arith.addf %79, %81 : vector<32x8xf32>
    %83 = vector.broadcast %4 : vector<32x1xf32> to vector<32x8xf32>
    %84 = arith.addf %82, %83 : vector<32x8xf32>
    %cst_67 = arith.constant 0.000000e+00 : f32
    %85 = vector.broadcast %cst_67 : f32 to vector<32x8xf32>
    %86 = arith.cmpf oge, %84, %85 : vector<32x8xf32>
    %cst_68 = arith.constant 0.00999999977 : f32
    %87 = vector.broadcast %cst_68 : f32 to vector<32x8xf32>
    %88 = arith.mulf %87, %84 : vector<32x8xf32>
    %89 = arith.select %86, %84, %88 : vector<32x8xi1>, vector<32x8xf32>
    %c0_69 = arith.constant 0 : index
    %c0_70 = arith.constant 0 : index
    %c3_71 = arith.constant 3 : index
    %c0_72 = arith.constant 0 : index
    %90 = vector.load %arg8[%c0_69, %c0_70, %c3_71, %c0_72] : memref<1x32x8x8xf32, #tpu.memory_space<vmem>>, vector<1x32x1x8xf32>
    %91 = vector.shape_cast %90 : vector<1x32x1x8xf32> to vector<32x8xf32>
    %92 = vector.shape_cast %89 : vector<32x8xf32> to vector<1x32x1x8xf32>
    tpu.vector_store %arg8[%c0_69, %c0_70, %c3_71, %c0_72], %92 {strides = array<i32>} : memref<1x32x8x8xf32, #tpu.memory_space<vmem>>, vector<1x32x1x8xf32>,
    %c0_73 = arith.constant 0 : index
    %c0_74 = arith.constant 0 : index
    %c8 = arith.constant 8 : index
    %c0_75 = arith.constant 0 : index
    %93 = vector.load %arg7[%c0_73, %c0_74, %c8, %c0_75] : memref<1x4x16x16xf32, #tpu.memory_space<vmem>>, vector<1x4x1x16xf32>
    %94 = vector.shape_cast %93 : vector<1x4x1x16xf32> to vector<4x16xf32>
    %c0_76 = arith.constant 0 : index
    %c0_77 = arith.constant 0 : index
    %c9 = arith.constant 9 : index
    %c0_78 = arith.constant 0 : index
    %95 = vector.load %arg7[%c0_76, %c0_77, %c9, %c0_78] : memref<1x4x16x16xf32, #tpu.memory_space<vmem>>, vector<1x4x1x16xf32>
    %96 = vector.shape_cast %95 : vector<1x4x1x16xf32> to vector<4x16xf32>
    %cst_79 = arith.constant dense<0.000000e+00> : vector<64x16xf32>
    %97 = tpu.matmul %0, %94, %cst_79 {dimension_numbers = #tpu.dot_dimension_numbers<[1], [0], [0], [1], [0, 0, 1, 1], [], []>} : vector<64x4xf32>, vector<4x16xf32>, vector<64x16xf32> -> vector<64x16xf32>
    %cst_80 = arith.constant dense<0.000000e+00> : vector<64x16xf32>
    %98 = tpu.matmul %1, %96, %cst_80 {dimension_numbers = #tpu.dot_dimension_numbers<[1], [0], [0], [1], [0, 0, 1, 1], [], []>} : vector<64x4xf32>, vector<4x16xf32>, vector<64x16xf32> -> vector<64x16xf32>
    %99 = arith.addf %97, %98 : vector<64x16xf32>
    %100 = vector.extract_strided_slice %99 {offsets = [0, 0], sizes = [32, 16], strides = [1, 1]} : vector<64x16xf32> to vector<32x16xf32>
    %cst_81 = arith.constant dense<0.000000e+00> : vector<32x8xf32>
    %101 = tpu.matmul %100, %2, %cst_81 {dimension_numbers = #tpu.dot_dimension_numbers<[1], [0], [0], [1], [0, 0, 1, 1], [], []>} : vector<32x16xf32>, vector<16x8xf32>, vector<32x8xf32> -> vector<32x8xf32>
    %102 = vector.extract_strided_slice %99 {offsets = [32, 0], sizes = [32, 16], strides = [1, 1]} : vector<64x16xf32> to vector<32x16xf32>
    %cst_82 = arith.constant dense<0.000000e+00> : vector<32x8xf32>
    %103 = tpu.matmul %102, %3, %cst_82 {dimension_numbers = #tpu.dot_dimension_numbers<[1], [0], [0], [1], [0, 0, 1, 1], [], []>} : vector<32x16xf32>, vector<16x8xf32>, vector<32x8xf32> -> vector<32x8xf32>
    %104 = arith.addf %101, %103 : vector<32x8xf32>
    %105 = vector.broadcast %4 : vector<32x1xf32> to vector<32x8xf32>
    %106 = arith.addf %104, %105 : vector<32x8xf32>
    %cst_83 = arith.constant 0.000000e+00 : f32
    %107 = vector.broadcast %cst_83 : f32 to vector<32x8xf32>
    %108 = arith.cmpf oge, %106, %107 : vector<32x8xf32>
    %cst_84 = arith.constant 0.00999999977 : f32
    %109 = vector.broadcast %cst_84 : f32 to vector<32x8xf32>
    %110 = arith.mulf %109, %106 : vector<32x8xf32>
    %111 = arith.select %108, %106, %110 : vector<32x8xi1>, vector<32x8xf32>
    %c0_85 = arith.constant 0 : index
    %c0_86 = arith.constant 0 : index
    %c4_87 = arith.constant 4 : index
    %c0_88 = arith.constant 0 : index
    %112 = vector.load %arg8[%c0_85, %c0_86, %c4_87, %c0_88] : memref<1x32x8x8xf32, #tpu.memory_space<vmem>>, vector<1x32x1x8xf32>
    %113 = vector.shape_cast %112 : vector<1x32x1x8xf32> to vector<32x8xf32>
    %114 = vector.shape_cast %111 : vector<32x8xf32> to vector<1x32x1x8xf32>
    tpu.vector_store %arg8[%c0_85, %c0_86, %c4_87, %c0_88], %114 {strides = array<i32>} : memref<1x32x8x8xf32, #tpu.memory_space<vmem>>, vector<1x32x1x8xf32>,
    %c0_89 = arith.constant 0 : index
    %c0_90 = arith.constant 0 : index
    %c10 = arith.constant 10 : index
    %c0_91 = arith.constant 0 : index
    %115 = vector.load %arg7[%c0_89, %c0_90, %c10, %c0_91] : memref<1x4x16x16xf32, #tpu.memory_space<vmem>>, vector<1x4x1x16xf32>
    %116 = vector.shape_cast %115 : vector<1x4x1x16xf32> to vector<4x16xf32>
    %c0_92 = arith.constant 0 : index
    %c0_93 = arith.constant 0 : index
    %c11 = arith.constant 11 : index
    %c0_94 = arith.constant 0 : index
    %117 = vector.load %arg7[%c0_92, %c0_93, %c11, %c0_94] : memref<1x4x16x16xf32, #tpu.memory_space<vmem>>, vector<1x4x1x16xf32>
    %118 = vector.shape_cast %117 : vector<1x4x1x16xf32> to vector<4x16xf32>
    %cst_95 = arith.constant dense<0.000000e+00> : vector<64x16xf32>
    %119 = tpu.matmul %0, %116, %cst_95 {dimension_numbers = #tpu.dot_dimension_numbers<[1], [0], [0], [1], [0, 0, 1, 1], [], []>} : vector<64x4xf32>, vector<4x16xf32>, vector<64x16xf32> -> vector<64x16xf32>
    %cst_96 = arith.constant dense<0.000000e+00> : vector<64x16xf32>
    %120 = tpu.matmul %1, %118, %cst_96 {dimension_numbers = #tpu.dot_dimension_numbers<[1], [0], [0], [1], [0, 0, 1, 1], [], []>} : vector<64x4xf32>, vector<4x16xf32>, vector<64x16xf32> -> vector<64x16xf32>
    %121 = arith.addf %119, %120 : vector<64x16xf32>
    %122 = vector.extract_strided_slice %121 {offsets = [0, 0], sizes = [32, 16], strides = [1, 1]} : vector<64x16xf32> to vector<32x16xf32>
    %cst_97 = arith.constant dense<0.000000e+00> : vector<32x8xf32>
    %123 = tpu.matmul %122, %2, %cst_97 {dimension_numbers = #tpu.dot_dimension_numbers<[1], [0], [0], [1], [0, 0, 1, 1], [], []>} : vector<32x16xf32>, vector<16x8xf32>, vector<32x8xf32> -> vector<32x8xf32>
    %124 = vector.extract_strided_slice %121 {offsets = [32, 0], sizes = [32, 16], strides = [1, 1]} : vector<64x16xf32> to vector<32x16xf32>
    %cst_98 = arith.constant dense<0.000000e+00> : vector<32x8xf32>
    %125 = tpu.matmul %124, %3, %cst_98 {dimension_numbers = #tpu.dot_dimension_numbers<[1], [0], [0], [1], [0, 0, 1, 1], [], []>} : vector<32x16xf32>, vector<16x8xf32>, vector<32x8xf32> -> vector<32x8xf32>
    %126 = arith.addf %123, %125 : vector<32x8xf32>
    %127 = vector.broadcast %4 : vector<32x1xf32> to vector<32x8xf32>
    %128 = arith.addf %126, %127 : vector<32x8xf32>
    %cst_99 = arith.constant 0.000000e+00 : f32
    %129 = vector.broadcast %cst_99 : f32 to vector<32x8xf32>
    %130 = arith.cmpf oge, %128, %129 : vector<32x8xf32>
    %cst_100 = arith.constant 0.00999999977 : f32
    %131 = vector.broadcast %cst_100 : f32 to vector<32x8xf32>
    %132 = arith.mulf %131, %128 : vector<32x8xf32>
    %133 = arith.select %130, %128, %132 : vector<32x8xi1>, vector<32x8xf32>
    %c0_101 = arith.constant 0 : index
    %c0_102 = arith.constant 0 : index
    %c5_103 = arith.constant 5 : index
    %c0_104 = arith.constant 0 : index
    %134 = vector.load %arg8[%c0_101, %c0_102, %c5_103, %c0_104] : memref<1x32x8x8xf32, #tpu.memory_space<vmem>>, vector<1x32x1x8xf32>
    %135 = vector.shape_cast %134 : vector<1x32x1x8xf32> to vector<32x8xf32>
    %136 = vector.shape_cast %133 : vector<32x8xf32> to vector<1x32x1x8xf32>
    tpu.vector_store %arg8[%c0_101, %c0_102, %c5_103, %c0_104], %136 {strides = array<i32>} : memref<1x32x8x8xf32, #tpu.memory_space<vmem>>, vector<1x32x1x8xf32>,
    %c0_105 = arith.constant 0 : index
    %c0_106 = arith.constant 0 : index
    %c12 = arith.constant 12 : index
    %c0_107 = arith.constant 0 : index
    %137 = vector.load %arg7[%c0_105, %c0_106, %c12, %c0_107] : memref<1x4x16x16xf32, #tpu.memory_space<vmem>>, vector<1x4x1x16xf32>
    %138 = vector.shape_cast %137 : vector<1x4x1x16xf32> to vector<4x16xf32>
    %c0_108 = arith.constant 0 : index
    %c0_109 = arith.constant 0 : index
    %c13 = arith.constant 13 : index
    %c0_110 = arith.constant 0 : index
    %139 = vector.load %arg7[%c0_108, %c0_109, %c13, %c0_110] : memref<1x4x16x16xf32, #tpu.memory_space<vmem>>, vector<1x4x1x16xf32>
    %140 = vector.shape_cast %139 : vector<1x4x1x16xf32> to vector<4x16xf32>
    %cst_111 = arith.constant dense<0.000000e+00> : vector<64x16xf32>
    %141 = tpu.matmul %0, %138, %cst_111 {dimension_numbers = #tpu.dot_dimension_numbers<[1], [0], [0], [1], [0, 0, 1, 1], [], []>} : vector<64x4xf32>, vector<4x16xf32>, vector<64x16xf32> -> vector<64x16xf32>
    %cst_112 = arith.constant dense<0.000000e+00> : vector<64x16xf32>
    %142 = tpu.matmul %1, %140, %cst_112 {dimension_numbers = #tpu.dot_dimension_numbers<[1], [0], [0], [1], [0, 0, 1, 1], [], []>} : vector<64x4xf32>, vector<4x16xf32>, vector<64x16xf32> -> vector<64x16xf32>
    %143 = arith.addf %141, %142 : vector<64x16xf32>
    %144 = vector.extract_strided_slice %143 {offsets = [0, 0], sizes = [32, 16], strides = [1, 1]} : vector<64x16xf32> to vector<32x16xf32>
    %cst_113 = arith.constant dense<0.000000e+00> : vector<32x8xf32>
    %145 = tpu.matmul %144, %2, %cst_113 {dimension_numbers = #tpu.dot_dimension_numbers<[1], [0], [0], [1], [0, 0, 1, 1], [], []>} : vector<32x16xf32>, vector<16x8xf32>, vector<32x8xf32> -> vector<32x8xf32>
    %146 = vector.extract_strided_slice %143 {offsets = [32, 0], sizes = [32, 16], strides = [1, 1]} : vector<64x16xf32> to vector<32x16xf32>
    %cst_114 = arith.constant dense<0.000000e+00> : vector<32x8xf32>
    %147 = tpu.matmul %146, %3, %cst_114 {dimension_numbers = #tpu.dot_dimension_numbers<[1], [0], [0], [1], [0, 0, 1, 1], [], []>} : vector<32x16xf32>, vector<16x8xf32>, vector<32x8xf32> -> vector<32x8xf32>
    %148 = arith.addf %145, %147 : vector<32x8xf32>
    %149 = vector.broadcast %4 : vector<32x1xf32> to vector<32x8xf32>
    %150 = arith.addf %148, %149 : vector<32x8xf32>
    %cst_115 = arith.constant 0.000000e+00 : f32
    %151 = vector.broadcast %cst_115 : f32 to vector<32x8xf32>
    %152 = arith.cmpf oge, %150, %151 : vector<32x8xf32>
    %cst_116 = arith.constant 0.00999999977 : f32
    %153 = vector.broadcast %cst_116 : f32 to vector<32x8xf32>
    %154 = arith.mulf %153, %150 : vector<32x8xf32>
    %155 = arith.select %152, %150, %154 : vector<32x8xi1>, vector<32x8xf32>
    %c0_117 = arith.constant 0 : index
    %c0_118 = arith.constant 0 : index
    %c6_119 = arith.constant 6 : index
    %c0_120 = arith.constant 0 : index
    %156 = vector.load %arg8[%c0_117, %c0_118, %c6_119, %c0_120] : memref<1x32x8x8xf32, #tpu.memory_space<vmem>>, vector<1x32x1x8xf32>
    %157 = vector.shape_cast %156 : vector<1x32x1x8xf32> to vector<32x8xf32>
    %158 = vector.shape_cast %155 : vector<32x8xf32> to vector<1x32x1x8xf32>
    tpu.vector_store %arg8[%c0_117, %c0_118, %c6_119, %c0_120], %158 {strides = array<i32>} : memref<1x32x8x8xf32, #tpu.memory_space<vmem>>, vector<1x32x1x8xf32>,
    %c0_121 = arith.constant 0 : index
    %c0_122 = arith.constant 0 : index
    %c14 = arith.constant 14 : index
    %c0_123 = arith.constant 0 : index
    %159 = vector.load %arg7[%c0_121, %c0_122, %c14, %c0_123] : memref<1x4x16x16xf32, #tpu.memory_space<vmem>>, vector<1x4x1x16xf32>
    %160 = vector.shape_cast %159 : vector<1x4x1x16xf32> to vector<4x16xf32>
    %c0_124 = arith.constant 0 : index
    %c0_125 = arith.constant 0 : index
    %c15 = arith.constant 15 : index
    %c0_126 = arith.constant 0 : index
    %161 = vector.load %arg7[%c0_124, %c0_125, %c15, %c0_126] : memref<1x4x16x16xf32, #tpu.memory_space<vmem>>, vector<1x4x1x16xf32>
    %162 = vector.shape_cast %161 : vector<1x4x1x16xf32> to vector<4x16xf32>
    %cst_127 = arith.constant dense<0.000000e+00> : vector<64x16xf32>
    %163 = tpu.matmul %0, %160, %cst_127 {dimension_numbers = #tpu.dot_dimension_numbers<[1], [0], [0], [1], [0, 0, 1, 1], [], []>} : vector<64x4xf32>, vector<4x16xf32>, vector<64x16xf32> -> vector<64x16xf32>
    %cst_128 = arith.constant dense<0.000000e+00> : vector<64x16xf32>
    %164 = tpu.matmul %1, %162, %cst_128 {dimension_numbers = #tpu.dot_dimension_numbers<[1], [0], [0], [1], [0, 0, 1, 1], [], []>} : vector<64x4xf32>, vector<4x16xf32>, vector<64x16xf32> -> vector<64x16xf32>
    %165 = arith.addf %163, %164 : vector<64x16xf32>
    %166 = vector.extract_strided_slice %165 {offsets = [0, 0], sizes = [32, 16], strides = [1, 1]} : vector<64x16xf32> to vector<32x16xf32>
    %cst_129 = arith.constant dense<0.000000e+00> : vector<32x8xf32>
    %167 = tpu.matmul %166, %2, %cst_129 {dimension_numbers = #tpu.dot_dimension_numbers<[1], [0], [0], [1], [0, 0, 1, 1], [], []>} : vector<32x16xf32>, vector<16x8xf32>, vector<32x8xf32> -> vector<32x8xf32>
    %168 = vector.extract_strided_slice %165 {offsets = [32, 0], sizes = [32, 16], strides = [1, 1]} : vector<64x16xf32> to vector<32x16xf32>
    %cst_130 = arith.constant dense<0.000000e+00> : vector<32x8xf32>
    %169 = tpu.matmul %168, %3, %cst_130 {dimension_numbers = #tpu.dot_dimension_numbers<[1], [0], [0], [1], [0, 0, 1, 1], [], []>} : vector<32x16xf32>, vector<16x8xf32>, vector<32x8xf32> -> vector<32x8xf32>
    %170 = arith.addf %167, %169 : vector<32x8xf32>
    %171 = vector.broadcast %4 : vector<32x1xf32> to vector<32x8xf32>
    %172 = arith.addf %170, %171 : vector<32x8xf32>
    %cst_131 = arith.constant 0.000000e+00 : f32
    %173 = vector.broadcast %cst_131 : f32 to vector<32x8xf32>
    %174 = arith.cmpf oge, %172, %173 : vector<32x8xf32>
    %cst_132 = arith.constant 0.00999999977 : f32
    %175 = vector.broadcast %cst_132 : f32 to vector<32x8xf32>
    %176 = arith.mulf %175, %172 : vector<32x8xf32>
    %177 = arith.select %174, %172, %176 : vector<32x8xi1>, vector<32x8xf32>
    %c0_133 = arith.constant 0 : index
    %c0_134 = arith.constant 0 : index
    %c7_135 = arith.constant 7 : index
    %c0_136 = arith.constant 0 : index
    %178 = vector.load %arg8[%c0_133, %c0_134, %c7_135, %c0_136] : memref<1x32x8x8xf32, #tpu.memory_space<vmem>>, vector<1x32x1x8xf32>
    %179 = vector.shape_cast %178 : vector<1x32x1x8xf32> to vector<32x8xf32>
    %180 = vector.shape_cast %177 : vector<32x8xf32> to vector<1x32x1x8xf32>
    tpu.vector_store %arg8[%c0_133, %c0_134, %c7_135, %c0_136], %180 {strides = array<i32>} : memref<1x32x8x8xf32, #tpu.memory_space<vmem>>, vector<1x32x1x8xf32>,
    return
  }
  func.func @transform_0(%arg0: i32, %arg1: i32) -> (i32, i32) {
    %c0_i32 = arith.constant 0 : i32
    %c0_i32_0 = arith.constant 0 : i32
    %c0_i32_1 = arith.constant 0 : i32
    return %c0_i32, %c0_i32_0 : i32, i32
  }
  func.func @transform_1(%arg0: i32, %arg1: i32) -> (i32, i32) {
    %c0_i32 = arith.constant 0 : i32
    %c0_i32_0 = arith.constant 0 : i32
    %c0_i32_1 = arith.constant 0 : i32
    return %c0_i32, %c0_i32_0 : i32, i32
  }
  func.func @transform_2(%arg0: i32, %arg1: i32) -> (i32, i32) {
    %c0_i32 = arith.constant 0 : i32
    %c0_i32_0 = arith.constant 0 : i32
    %c0_i32_1 = arith.constant 0 : i32
    return %c0_i32, %c0_i32_0 : i32, i32
  }
  func.func @transform_3(%arg0: i32, %arg1: i32) -> (i32, i32) {
    %c0_i32 = arith.constant 0 : i32
    %c0_i32_0 = arith.constant 0 : i32
    %c0_i32_1 = arith.constant 0 : i32
    return %c0_i32, %c0_i32_0 : i32, i32
  }
  func.func @transform_4(%arg0: i32, %arg1: i32) -> (i32, i32) {
    %c0_i32 = arith.constant 0 : i32
    %c0_i32_0 = arith.constant 0 : i32
    %c0_i32_1 = arith.constant 0 : i32
    return %c0_i32, %c0_i32_0 : i32, i32
  }
  func.func @transform_5(%arg0: i32, %arg1: i32) -> (i32, i32, i32, i32) {
    %c0_i32 = arith.constant 0 : i32
    %c0_i32_0 = arith.constant 0 : i32
    %c0_i32_1 = arith.constant 0 : i32
    return %arg0, %c0_i32, %arg1, %c0_i32_0 : i32, i32, i32, i32
  }
  func.func @transform_6(%arg0: i32, %arg1: i32) -> (i32, i32, i32, i32) {
    %c0_i32 = arith.constant 0 : i32
    %c0_i32_0 = arith.constant 0 : i32
    %c0_i32_1 = arith.constant 0 : i32
    return %arg0, %c0_i32, %arg1, %c0_i32_0 : i32, i32, i32, i32
  }
}

</mosaic_0001>

<bundles_post_ra>
// kernel: downsampling_unet.1
= control target key start
LH: loop header
LB: loop body
LE: loop exit
PB: predicated region body
PF: predicated region fallthrough
CT: control target
= control target key end

     0   :  { %s7308_s21 = smov 0   ;;  %s7310_s22 = smov 0   ;;  %s8787_s0 = inlined_call_operand.vmem [shape: f32[64,4], index: 0, kind: input, shape index: {}]   ;;  %s8788_s1 = inlined_call_operand.vmem [shape: f32[64,4], index: 1, kind: input, shape index: {}]   ;;  %s8789_s2 = inlined_call_operand.vmem [shape: f32[16,8], index: 2, kind: input, shape index: {}]   ;;  %s8790_s3 = inlined_call_operand.vmem [shape: f32[16,8], index: 3, kind: input, shape index: {}]   ;;  %s8791_s4 = inlined_call_operand.vmem [shape: f32[32,1], index: 4, kind: input, shape index: {}]   ;;  %s8792_s5 = inlined_call_operand.vmem [shape: f32[2,4,16,16], index: 5, kind: input, shape index: {}]   ;;  %s8793_s6 = inlined_call_operand.vmem [shape: f32[2,32,8,8], index: 6, kind: output, shape index: {}]  }
   0x1   :  { %s7312_s23 = smov 0  }
   0x2 LB: > { %s28_s24 = sadd.s32 1, %s7265_s22  ;;  %p6202_p0 = scmp.ge.s32.totalorder %s7269_s23, 1  ;;  %s7269_s23 = sphi %s7312_s23, %s16_s23   ;;  %s7265_s22 = sphi %s7310_s22, %s8795_s22   ;;  %s7261_s21 = sphi %s7308_s21, %s8794_s21  }
   0x3   : > { %p30_p1 = scmp.ge.s32.totalorder %s28_s24, 2  ;;  %p233_p2 = scmp.lt.s32.totalorder %s7269_s23, 3 }
   0x5   : > { %s8797_s24 = smov (%p30_p1, %s28_s24), 0  ;;  %p234_p3 = pnand %p6202_p0, %p233_p2 }
   0x6   : > { %p271_p4 = scmp.lt.s32.totalorder (!%p234_p3), %s7261_s21, 1  ;;  %v7329_v0 = vld [vmem:[%s8788_s1] sm:$0xff] (!%p234_p3)  ;;  %vm333_vm0 = vcmask (!%p234_p3), 31744   ;;  %vm325_vm1 = vcmask (!%p234_p3), 1041409   ;;  %vm328_vm2 = vcmask (!%p234_p3), 1042434   ;;  %vm331_vm3 = vcmask (!%p234_p3), 1043459  }
   0x7   : > { %237 = sbr.rel (%p234_p3) target bundleno = 2288 (0x8f0), region = 44  ;;  %6661 = vmatprep.mubr.msk.f32.mxu0 (!%p234_p3), %vm333_vm0, %v7329_v0  ;;  %vm358_vm4 = vcmask (!%p234_p3), 1043456   ;;  %v7355_v18 = vld [vmem:[%s8788_s1 + $0x8] sm:$0xff] (!%p234_p3)  ;;  %v7363_v21 = vld [vmem:[%s8788_s1 + $0x10] sm:$0xff] (!%p234_p3)  ;;  %v7376_v23 = vld [vmem:[%s8788_s1 + $0x18] sm:$0xff] (!%p234_p3)  ;;  %v7271_v44 = vmov (!%p234_p3), 0  }
   0x8   : > { %v7381_v24 = vld [vmem:[%s8788_s1 + $0x20] sm:$0xff] (!%p234_p3)  ;;  %v7390_v25 = vld [vmem:[%s8788_s1 + $0x28] sm:$0xff] (!%p234_p3)  ;;  %v7395_v26 = vld [vmem:[%s8788_s1 + $0x30] sm:$0xff] (!%p234_p3)  ;;  %7229 = vset.pattern.permute.xlu0 (!%p234_p3), %v7271_v44  ;;  %7230 = vset.pattern.permute.xlu1 (!%p234_p3), %v7271_v44  ;;  %vm607_vm5 = vcmask (!%p234_p3), 130048   ;;  %vm1070_vm8 = vcmask (!%p234_p3), 57344  }
   0x9   : > { %v7404_v27 = vld [vmem:[%s8788_s1 + $0x38] sm:$0xff] (!%p234_p3)  ;;  %v7409_v28 = vld [vmem:[%s8787_s0] sm:$0xff] (!%p234_p3)  ;;  %v7418_v29 = vld [vmem:[%s8787_s0 + $0x8] sm:$0xff] (!%p234_p3) }
   0xa   : > { %v7423_v30 = vld [vmem:[%s8787_s0 + $0x10] sm:$0xff] (!%p234_p3)  ;;  %v7432_v31 = vld [vmem:[%s8787_s0 + $0x18] sm:$0xff] (!%p234_p3)  ;;  %v7437_v32 = vld [vmem:[%s8787_s0 + $0x20] sm:$0xff] (!%p234_p3) }
   0xb   : > { %v7446_v33 = vld [vmem:[%s8787_s0 + $0x28] sm:$0xff] (!%p234_p3)  ;;  %v7451_v34 = vld [vmem:[%s8787_s0 + $0x30] sm:$0xff] (!%p234_p3)  ;;  %v7460_v35 = vld [vmem:[%s8787_s0 + $0x38] sm:$0xff] (!%p234_p3) }
   0xc   : > { %v306_v36 = vld [vmem:[%s8790_s3] sm:$0xff] (!%p234_p3)  ;;  %v307_v37 = vld [vmem:[%s8790_s3 + $0x8] sm:$0xff] (!%p234_p3)  ;;  %v310_v43 = vld [vmem:[%s8791_s4 + $0x10] sm:$0xff] (!%p234_p3) }
   0xd   : > { %v7470_v38 = vpack.c.bf16 (!%p234_p3), %v307_v37, %v306_v36  ;;  %v304_v39 = vld [vmem:[%s8789_s2] sm:$0xff] (!%p234_p3)  ;;  %v305_v40 = vld [vmem:[%s8789_s2 + $0x8] sm:$0xff] (!%p234_p3)  ;;  %814 = vperm.xlu1 (!%p234_p3), %7230, %v310_v43   ;;  %v311_v46 = vld [vmem:[%s8791_s4 + $0x18] sm:$0xff] (!%p234_p3) }
   0xe   : > { %s8799_s21 = smov (!%p271_p4, %s7261_s21), 1  ;;  %v7482_v41 = vpack.c.bf16 %v305_v40, %v304_v39  ;;  %v308_v42 = vld [vmem:[%s8791_s4] sm:$0xff]  ;;  %v309_v45 = vld [vmem:[%s8791_s4 + $0x8] sm:$0xff] }
   0xf   : > { %s6417_s27 = sshll.u32 %s8799_s21, 6  ;;  %7044 = vmatprep.subr.bf16.mxu1 %v7470_v38  ;;  %804 = vperm.xlu0 %7229, %v308_v42   ;;  %s6418_s15 = sshll.u32 %s8799_s21, 8 }
  0x10   : > { %s7339_s30 = scalar_lea.vmem %s8792_s5, %s6417_s27  ;;  %7046 = vmatpush3.bf16.msra.mxu1 %v7470_v38  ;;  %s7579_s18 = scalar_lea.vmem %s8793_s6, %s6418_s15 }
  0x11   : > { %v316_v1 = vld [vmem:[%s7339_s30 + $0x1] sm:$0x1]  ;;  %v317_v2 = vld [vmem:[%s7339_s30 + $0x11] sm:$0x1]  ;;  %v312_v7 = vld [vmem:[%s7339_s30] sm:$0x1]  ;;  %7048 = vmatprep.subr.bf16.mxu1 %v7482_v41  ;;  %819 = vperm.xlu1 %7230, %v311_v46  }
  0x12   : > { %v318_v3 = vld [vmem:[%s7339_s30 + $0x21] sm:$0x1]  ;;  %v319_v4 = vld [vmem:[%s7339_s30 + $0x31] sm:$0x1]  ;;  %v324_v5 = vrot.slane %v317_v2, 7 }
  0x13   : > { %v327_v6 = vrot.slane %v318_v3, 6  ;;  %v330_v8 = vrot.slane %v319_v4, 5  ;;  %v313_v9 = vld [vmem:[%s7339_s30 + $0x10] sm:$0x1]  ;;  %v314_v10 = vld [vmem:[%s7339_s30 + $0x20] sm:$0x1]  ;;  %809 = vperm.xlu0 %7229, %v309_v45  }
  0x14   : > { %v326_v11 = vsel %vm325_vm1, %v324_v5, %v316_v1  ;;  %v315_v12 = vld [vmem:[%s7339_s30 + $0x30] sm:$0x1]  ;;  %v470_v13 = vrot.slane %v313_v9, 7  ;;  %v472_v14 = vrot.slane %v314_v10, 6  ;;  %v1108_v47 = vld [vmem:[%s7339_s30 + $0x13] sm:$0x1] }
  0x15   : > { %v329_v15 = vsel %vm328_vm2, %v327_v6, %v326_v11  ;;  %v474_v16 = vrot.slane %v315_v12, 5  ;;  %v1109_v49 = vld [vmem:[%s7339_s30 + $0x23] sm:$0x1]  ;;  %v1115_v50 = vrot.slane %v1108_v47, 7  ;;  %v1110_v53 = vld [vmem:[%s7339_s30 + $0x33] sm:$0x1] }
  0x16   : > { %v332_v17 = vsel %vm331_vm3, %v330_v8, %v329_v15  ;;  %v471_v19 = vsel %vm325_vm1, %v470_v13, %v312_v7  ;;  %v1107_v52 = vld [vmem:[%s7339_s30 + $0x3] sm:$0x1]  ;;  %v1117_v54 = vrot.slane %v1109_v49, 6  ;;  %v1104_v58 = vld [vmem:[%s7339_s30 + $0x12] sm:$0x1]  ;;  %v1119_v59 = vrot.slane %v1110_v53, 5 }
  0x17   : > { %6659 = vmatprep.subr.msk.mxu0 %vm358_vm4, %v332_v17  ;;  %v473_v20 = vsel %vm328_vm2, %v472_v14, %v471_v19  ;;  %v1116_v56 = vsel %vm325_vm1, %v1115_v50, %v1107_v52  ;;  %v1105_v62 = vld [vmem:[%s7339_s30 + $0x22] sm:$0x1]  ;;  %v1232_v63 = vrot.slane %v1104_v58, 7  ;;  %v1106_v4 = vld [vmem:[%s7339_s30 + $0x32] sm:$0x1]  ;;  %v846_v15 = vlaneseq }
  0x18   : > { %6660 = vmatpush3.msk.msra.mxu0 %vm358_vm4, %v332_v17  ;;  %v475_v22 = vsel %vm331_vm3, %v474_v16, %v473_v20  ;;  %v1118_v60 = vsel %vm328_vm2, %v1117_v54, %v1116_v56  ;;  %v1103_v2 = vld [vmem:[%s7339_s30 + $0x2] sm:$0x1]  ;;  %v1234_v5 = vrot.slane %v1105_v62, 6  ;;  %v1236_v9 = vrot.slane %v1106_v4, 5 }
  0x19   : > { %6662 = vmatmul.mubr.msk.f32.vlgmr.msra.gmra.mrb[0].mxu0 %vm333_vm0, %v7355_v18  ;;  %6673 = vmatprep.subr.msk.mxu0 %vm358_vm4, %v475_v22  ;;  %v1120_v3 = vsel %vm331_vm3, %v1119_v59, %v1118_v60  ;;  %v1233_v7 = vsel %vm325_vm1, %v1232_v63, %v1103_v2  ;;  %v7272_v13 = vmov 1966171168   ;;  %v847_v20 = vshrl.u32 %v846_v15, 7 }
  0x1a   : > { %6674 = vmatpush3.msk.msra.mxu0 %vm358_vm4, %v475_v22  ;;  %6664 = vmatprep.mubr.msk.f32.mxu0 %vm333_vm0, %v7363_v21  ;;  %v1235_v10 = vsel %vm328_vm2, %v1234_v5, %v1233_v7  ;;  %v844_v14 = vunpack.c.l.s4 %v7272_v13 }
  0x1b   : > { %7052 = vmatprep.subr.bf16.mxu0 %v7470_v38  ;;  %v1237_v11 = vsel %vm331_vm3, %v1236_v9, %v1235_v10 }
  0x1c   : > { %v845_v19 = vunpack.c.0.s8 %v844_v14 }
  0x1d   : > { %6665 = vmatmul.mubr.msk.f32.gmra.mrb[2].mxu0 %vm333_vm0, %v7376_v23 }
  0x1e   : > { %6667 = vmatprep.mubr.msk.f32.mxu0 %vm333_vm0, %v7381_v24  ;;  %v7567_v39 = vsub.s32 %v845_v19, %v847_v20 }
  0x21   : > { %6668 = vmatmul.mubr.msk.f32.gmra.mrb[4].mxu0 %vm333_vm0, %v7390_v25 }
  0x22   : > { %6670 = vmatprep.mubr.msk.f32.mxu0 %vm333_vm0, %v7395_v26 }
  0x25   : > { %6671 = vmatmul.mubr.msk.f32.gmra.mrb[6].mxu0 %vm333_vm0, %v7404_v27 }
  0x26   : > { %6675 = vmatprep.mubr.msk.f32.mxu0 %vm333_vm0, %v7409_v28 }
  0x29   : > { %6676 = vmatmul.mubr.msk.f32.vlgmr.msra.gmra.mrb[0].mxu0 %vm333_vm0, %v7418_v29 }
  0x2a   : > { %6678 = vmatprep.mubr.msk.f32.mxu0 %vm333_vm0, %v7423_v30  ;;  %7054 = vmatpush3.bf16.msra.mxu0 %v7470_v38 }
  0x2b   : > { %7056 = vmatprep.subr.bf16.mxu0 %v7482_v41 }
  0x2d   : > { %6679 = vmatmul.mubr.msk.f32.gmra.mrb[2].mxu0 %vm333_vm0, %v7432_v31 }
  0x2e   : > { %6681 = vmatprep.mubr.msk.f32.mxu0 %vm333_vm0, %v7437_v32 }
  0x31   : > { %6682 = vmatmul.mubr.msk.f32.gmra.mrb[4].mxu0 %vm333_vm0, %v7446_v33 }
  0x32   : > { %6684 = vmatprep.mubr.msk.f32.mxu0 %vm333_vm0, %v7451_v34 }
  0x35   : > { %6685 = vmatmul.mubr.msk.f32.gmra.mrb[6].mxu0 %vm333_vm0, %v7460_v35 }
  0x8c   : > { %v7562_v16 = vpop.permute.xlu1 %814 }
  0x8e   : > { %v7560_v12 = vpop.permute.xlu0 %804 }
  0x90   : > { %v7570_v42 = vpop.permute.xlu1 %819 }
  0x92   : > { %v7564_v17 = vpop.permute.xlu0 %809 }
  0xfc   : > { %v6677_v48 = vpop.f32.mrb[0].mxu0 }
  0xfd   : > { %v568_v51 = vpop.f32.mrb[1].mxu0 }
 0x100   : > { %v6680_v55 = vpop.f32.mrb[2].mxu0 }
 0x101   : > { %v578_v57 = vpop.f32.mrb[3].mxu0 }
 0x104   : > { %v6683_v61 = vpop.f32.mrb[4].mxu0 }
 0x105   : > { %v588_v1 = vpop.f32.mrb[5].mxu0 }
 0x106   : > { %6691 = vmatprep.mubr.msk.f32.mxu1 %vm607_vm5, %v588_v1 }
 0x107   : > { %6692 = vmatmul.mubr.msk.f32.vlgmr.msra.gmra.mrb[0].mxu1 %vm607_vm5, %v6683_v61 }
 0x108   : > { %v6686_v6 = vpop.f32.mrb[6].mxu0  ;;  %7050 = vmatpush3.bf16.msra.mxu1 %v7482_v41 }
 0x109   : > { %v598_v8 = vpop.f32.mrb[7].mxu0  ;;  %6707 = vmatprep.subr.msk.mxu1 %vm358_vm4, %v1120_v3 }
 0x10a   : > { %6694 = vmatprep.mubr.msk.f32.mxu1 %vm607_vm5, %v598_v8 }
 0x10b   : > { %6695 = vmatmul.mubr.msk.f32.gmra.mrb[2].mxu1 %vm607_vm5, %v6686_v6 }
 0x10c   : > { %6701 = vmatprep.mubr.msk.f32.mxu1 %vm607_vm5, %v568_v51 }
 0x10f   : > { %6702 = vmatmul.mubr.msk.f32.vlgmr.msra.gmra.mrb[0].mxu1 %vm607_vm5, %v6677_v48 }
 0x110   : > { %6704 = vmatprep.mubr.msk.f32.mxu1 %vm607_vm5, %v578_v57  ;;  %6708 = vmatpush3.msk.msra.mxu1 %vm358_vm4, %v1120_v3 }
 0x111   : > { %6721 = vmatprep.subr.msk.mxu1 %vm358_vm4, %v1237_v11 }
 0x113   : > { %6705 = vmatmul.mubr.msk.f32.gmra.mrb[2].mxu1 %vm607_vm5, %v6680_v55 }
 0x114   : > { %6709 = vmatprep.mubr.msk.f32.mxu1 %vm333_vm0, %v7329_v0 }
 0x117   : > { %6710 = vmatmul.mubr.msk.f32.vlgmr.msra.gmra.mrb[4].mxu1 %vm333_vm0, %v7355_v18 }
 0x118   : > { %6722 = vmatpush3.msk.msra.mxu1 %vm358_vm4, %v1237_v11  ;;  %6712 = vmatprep.mubr.msk.f32.mxu1 %vm333_vm0, %v7363_v21 }
 0x119   : > { %7060 = vmatprep.subr.bf16.mxu1 %v7470_v38 }
 0x11b   : > { %6713 = vmatmul.mubr.msk.f32.gmra.mrb[6].mxu1 %vm333_vm0, %v7376_v23 }
 0x11c   : > { %6715 = vmatprep.mubr.msk.f32.mxu1 %vm333_vm0, %v7381_v24 }
 0x11f   : > { %6716 = vmatmul.mubr.msk.f32.gmra.mrb[8].mxu1 %vm333_vm0, %v7390_v25 }
 0x120   : > { %6718 = vmatprep.mubr.msk.f32.mxu1 %vm333_vm0, %v7395_v26 }
 0x123   : > { %6719 = vmatmul.mubr.msk.f32.gmra.mrb[10].mxu1 %vm333_vm0, %v7404_v27 }
 0x124   : > { %6723 = vmatprep.mubr.msk.f32.mxu1 %vm333_vm0, %v7409_v28 }
 0x127   : > { %6724 = vmatmul.mubr.msk.f32.vlgmr.msra.gmra.mrb[4].mxu1 %vm333_vm0, %v7418_v29 }
 0x128   : > { %6726 = vmatprep.mubr.msk.f32.mxu1 %vm333_vm0, %v7423_v30  ;;  %7062 = vmatpush3.bf16.msra.mxu1 %v7470_v38 }
 0x129   : > { %7064 = vmatprep.subr.bf16.mxu1 %v7482_v41 }
 0x12b   : > { %6727 = vmatmul.mubr.msk.f32.gmra.mrb[6].mxu1 %vm333_vm0, %v7432_v31 }
 0x12c   : > { %6729 = vmatprep.mubr.msk.f32.mxu1 %vm333_vm0, %v7437_v32 }
 0x12f   : > { %6730 = vmatmul.mubr.msk.f32.gmra.mrb[8].mxu1 %vm333_vm0, %v7446_v33 }
 0x130   : > { %6732 = vmatprep.mubr.msk.f32.mxu1 %vm333_vm0, %v7451_v34 }
 0x133   : > { %6733 = vmatmul.mubr.msk.f32.gmra.mrb[10].mxu1 %vm333_vm0, %v7460_v35 }
 0x1e2   : > { %v6703_v22 = vpop.f32.mrb[0].mxu1 }
 0x1e3   : > { %v823_v36 = vadd.f32 %v6703_v22, %v7564_v17  ;;  %v783_v37 = vpop.f32.mrb[1].mxu1 }
 0x1e4   : > { %v822_v40 = vadd.f32 %v7560_v12, %v783_v37 }
 0x1e5   : > { %vm827_vm6 = vcmp.ge.f32.partialorder %v823_v36, 0.0  ;;  %v831_v43 = vmul.f32 0.01, %v823_v36 }
 0x1e6   : > { %vm826_vm7 = vcmp.ge.f32.partialorder %v822_v40, 0.0  ;;  %v830_v44 = vmul.f32 0.01, %v822_v40  ;;  %v6706_v45 = vpop.f32.mrb[2].mxu1 }
 0x1e7   : > { %v835_v46 = vsel %vm827_vm6, %v823_v36, %v831_v43  ;;  %v825_v47 = vadd.f32 %v6706_v45, %v7570_v42  ;;  %v793_v48 = vpop.f32.mrb[3].mxu1 }
 0x1e8   : > { %v891_v49 = vcombine.high %v835_v46, %v835_v46  ;;  %v898_v50 = vrot.slane %v835_v46, %v7567_v39  ;;  %v834_v51 = vsel %vm826_vm7, %v822_v40, %v830_v44  ;;  %v824_v52 = vadd.f32 %v7562_v16, %v793_v48 }
 0x1e9   : > { %v842_v53 = vcombine.high %v834_v51, %v834_v51  ;;  %v849_v54 = vrot.slane %v834_v51, %v7567_v39  ;;  %vm829_vm9 = vcmp.ge.f32.partialorder %v825_v47, 0.0  ;;  %v833_v55 = vmul.f32 0.01, %v825_v47 }
 0x1ea   : > { %v905_v56 = vrot.slane %v891_v49, %v7567_v39  ;;  %v906_v57 = vcombine.high %v898_v50, %v898_v50  ;;  %v914_v58 = vrot.slane %v898_v50, %v7567_v39  ;;  %vm828_vm10 = vcmp.ge.f32.partialorder %v824_v52, 0.0 }
 0x1eb   : > { %v856_v59 = vrot.slane %v842_v53, %v7567_v39  ;;  %v857_v60 = vcombine.high %v849_v54, %v849_v54  ;;  %v865_v61 = vrot.slane %v849_v54, %v7567_v39  ;;  %v837_v62 = vsel %vm829_vm9, %v825_v47, %v833_v55 }
 0x1ec   : > { %v907_v63 = vcombine.high %v905_v56, %v905_v56  ;;  %v921_v1 = vrot.slane %v905_v56, %v7567_v39  ;;  %v928_v2 = vrot.slane %v906_v57, %v7567_v39  ;;  %v936_v3 = vcombine.high %v914_v58, %v914_v58  ;;  %1079 = vst.msk [vmem:[%s7579_s18 + $0x40] sm:$0x1] %vm1070_vm8, %v914_v58 }
 0x1ed   : > { %v858_v4 = vcombine.high %v856_v59, %v856_v59  ;;  %v872_v5 = vrot.slane %v856_v59, %v7567_v39  ;;  %v879_v6 = vrot.slane %v857_v60, %v7567_v39  ;;  %v887_v7 = vcombine.high %v865_v61, %v865_v61  ;;  %1071 = vst.msk [vmem:[%s7579_s18] sm:$0x1] %vm1070_vm8, %v865_v61 }
 0x1ee   : > { %v935_v8 = vrot.slane %v907_v63, %v7567_v39  ;;  %v937_v9 = vcombine.high %v921_v1, %v921_v1  ;;  %v938_v10 = vcombine.high %v928_v2, %v928_v2  ;;  %1080 = vst.msk [vmem:[%s7579_s18 + $0x48] sm:$0x1] %vm1070_vm8, %v928_v2  ;;  %1081 = vst.msk [vmem:[%s7579_s18 + $0x50] sm:$0x1] %vm1070_vm8, %v936_v3  ;;  %v832_v36 = vmul.f32 0.01, %v824_v52 }
 0x1ef   : > { %1083 = vst.msk [vmem:[%s7579_s18 + $0x60] sm:$0x1] %vm1070_vm8, %v921_v1  ;;  %v989_v11 = vcombine.high %v837_v62, %v837_v62  ;;  %v886_v13 = vrot.slane %v858_v4, %v7567_v39  ;;  %v888_v14 = vcombine.high %v872_v5, %v872_v5  ;;  %v889_v15 = vcombine.high %v879_v6, %v879_v6  ;;  %v1825_v4 = vld [vmem:[%s7339_s30 + $0x25] sm:$0x1] }
 0x1f0   : > { %1072 = vst.msk [vmem:[%s7579_s18 + $0x8] sm:$0x1] %vm1070_vm8, %v879_v6  ;;  %1073 = vst.msk [vmem:[%s7579_s18 + $0x10] sm:$0x1] %vm1070_vm8, %v887_v7  ;;  %v996_v19 = vrot.slane %v837_v62, %v7567_v39  ;;  %v939_v20 = vcombine.high %v935_v8, %v935_v8  ;;  %v836_v46 = vsel %vm828_vm10, %v824_v52, %v832_v36  ;;  %v1824_v62 = vld [vmem:[%s7339_s30 + $0x15] sm:$0x1] }
 0x1f1   : > { %1075 = vst.msk [vmem:[%s7579_s18 + $0x20] sm:$0x1] %vm1070_vm8, %v872_v5  ;;  %1082 = vst.msk [vmem:[%s7579_s18 + $0x58] sm:$0x1] %vm1070_vm8, %v938_v10  ;;  %v1003_v22 = vrot.slane %v989_v11, %v7567_v39  ;;  %v890_v37 = vcombine.high %v886_v13, %v886_v13  ;;  %v940_v49 = vcombine.high %v836_v46, %v836_v46  ;;  %v1831_v5 = vrot.slane %v1824_v62, 7 }
 0x1f2   : > { %1084 = vst.msk [vmem:[%s7579_s18 + $0x68] sm:$0x1] %vm1070_vm8, %v935_v8  ;;  %1085 = vst.msk [vmem:[%s7579_s18 + $0x70] sm:$0x1] %vm1070_vm8, %v937_v9  ;;  %v1004_v40 = vcombine.high %v996_v19, %v996_v19  ;;  %v1012_v43 = vrot.slane %v996_v19, %v7567_v39  ;;  %v947_v50 = vrot.slane %v836_v46, %v7567_v39  ;;  %v1823_v8 = vld [vmem:[%s7339_s30 + $0x5] sm:$0x1] }
 0x1f3   : > { %1074 = vst.msk [vmem:[%s7579_s18 + $0x18] sm:$0x1] %vm1070_vm8, %v889_v15  ;;  %1076 = vst.msk [vmem:[%s7579_s18 + $0x28] sm:$0x1] %vm1070_vm8, %v886_v13  ;;  %v1005_v44 = vcombine.high %v1003_v22, %v1003_v22  ;;  %v1019_v45 = vrot.slane %v1003_v22, %v7567_v39  ;;  %v954_v54 = vrot.slane %v940_v49, %v7567_v39  ;;  %v1826_v9 = vld [vmem:[%s7339_s30 + $0x35] sm:$0x1] }
 0x1f4   : > { %1077 = vst.msk [vmem:[%s7579_s18 + $0x30] sm:$0x1] %vm1070_vm8, %v888_v14  ;;  %1086 = vst.msk [vmem:[%s7579_s18 + $0x78] sm:$0x1] %vm1070_vm8, %v939_v20  ;;  %v1026_v47 = vrot.slane %v1004_v40, %v7567_v39  ;;  %v1034_v48 = vcombine.high %v1012_v43, %v1012_v43  ;;  %v955_v55 = vcombine.high %v947_v50, %v947_v50  ;;  %v1833_v10 = vrot.slane %v1825_v4, 6 }
 0x1f5   : > { %1078 = vst.msk [vmem:[%s7579_s18 + $0x38] sm:$0x1] %vm1070_vm8, %v890_v37  ;;  %1095 = vst.msk [vmem:[%s7579_s18 + $0xc0] sm:$0x1] %vm1070_vm8, %v1012_v43  ;;  %v1033_v51 = vrot.slane %v1005_v44, %v7567_v39  ;;  %v1035_v53 = vcombine.high %v1019_v45, %v1019_v45  ;;  %v963_v56 = vrot.slane %v947_v50, %v7567_v39  ;;  %v1820_v15 = vld [vmem:[%s7339_s30 + $0x14] sm:$0x1] }
 0x1f6   : > { %1099 = vst.msk [vmem:[%s7579_s18 + $0xe0] sm:$0x1] %vm1070_vm8, %v1019_v45  ;;  %v1036_v52 = vcombine.high %v1026_v47, %v1026_v47  ;;  %1096 = vst.msk [vmem:[%s7579_s18 + $0xc8] sm:$0x1] %vm1070_vm8, %v1026_v47  ;;  %v956_v58 = vcombine.high %v954_v54, %v954_v54  ;;  %v970_v59 = vrot.slane %v954_v54, %v7567_v39  ;;  %v1835_v19 = vrot.slane %v1826_v9, 5 }
 0x1f7   : > { %1097 = vst.msk [vmem:[%s7579_s18 + $0xd0] sm:$0x1] %vm1070_vm8, %v1034_v48  ;;  %v1037_v57 = vcombine.high %v1033_v51, %v1033_v51  ;;  %1100 = vst.msk [vmem:[%s7579_s18 + $0xe8] sm:$0x1] %vm1070_vm8, %v1033_v51  ;;  %v977_v60 = vrot.slane %v955_v55, %v7567_v39  ;;  %v985_v61 = vcombine.high %v963_v56, %v963_v56  ;;  %v1821_v36 = vld [vmem:[%s7339_s30 + $0x24] sm:$0x1] }
 0x1f8   : > { %1101 = vst.msk [vmem:[%s7579_s18 + $0xf0] sm:$0x1] %vm1070_vm8, %v1035_v53  ;;  %1098 = vst.msk [vmem:[%s7579_s18 + $0xd8] sm:$0x1] %vm1070_vm8, %v1036_v52  ;;  %v984_v63 = vrot.slane %v956_v58, %v7567_v39  ;;  %v986_v1 = vcombine.high %v970_v59, %v970_v59  ;;  %v1832_v13 = vsel %vm325_vm1, %v1831_v5, %v1823_v8  ;;  %v1948_v37 = vrot.slane %v1820_v15, 7 }
 0x1f9   : > { %1087 = vst.msk [vmem:[%s7579_s18 + $0x80] sm:$0x1] %vm1070_vm8, %v963_v56  ;;  %1102 = vst.msk [vmem:[%s7579_s18 + $0xf8] sm:$0x1] %vm1070_vm8, %v1037_v57  ;;  %v987_v2 = vcombine.high %v977_v60, %v977_v60  ;;  %v1834_v20 = vsel %vm328_vm2, %v1833_v10, %v1832_v13  ;;  %v1819_v43 = vld [vmem:[%s7339_s30 + $0x4] sm:$0x1] }
 0x1fa   : > { %1088 = vst.msk [vmem:[%s7579_s18 + $0x88] sm:$0x1] %vm1070_vm8, %v977_v60  ;;  %1089 = vst.msk [vmem:[%s7579_s18 + $0x90] sm:$0x1] %vm1070_vm8, %v985_v61  ;;  %v6725_v3 = vpop.f32.mrb[4].mxu1  ;;  %v988_v6 = vcombine.high %v984_v63, %v984_v63  ;;  %v1836_v44 = vsel %vm331_vm3, %v1835_v19, %v1834_v20  ;;  %v1950_v46 = vrot.slane %v1821_v36, 6  ;;  %v1949_v48 = vsel %vm325_vm1, %v1948_v37, %v1819_v43 }
 0x1fb   : > { %1091 = vst.msk [vmem:[%s7579_s18 + $0xa0] sm:$0x1] %vm1070_vm8, %v970_v59  ;;  %1090 = vst.msk [vmem:[%s7579_s18 + $0x98] sm:$0x1] %vm1070_vm8, %v987_v2  ;;  %v1306_v7 = vpop.f32.mrb[5].mxu1 }
 0x1fc   : > { %1092 = vst.msk [vmem:[%s7579_s18 + $0xa8] sm:$0x1] %vm1070_vm8, %v984_v63  ;;  %1093 = vst.msk [vmem:[%s7579_s18 + $0xb0] sm:$0x1] %vm1070_vm8, %v986_v1  ;;  %v1822_v45 = vld [vmem:[%s7339_s30 + $0x34] sm:$0x1]  ;;  %v1951_v51 = vsel %vm328_vm2, %v1950_v46, %v1949_v48 }
 0x1fd   : > { %1094 = vst.msk [vmem:[%s7579_s18 + $0xb8] sm:$0x1] %vm1070_vm8, %v988_v6  ;;  %v1952_v50 = vrot.slane %v1822_v45, 5 }
 0x1fe   : > { %v6728_v11 = vpop.f32.mrb[6].mxu1 }
 0x1ff   : > { %v1316_v14 = vpop.f32.mrb[7].mxu1  ;;  %v1953_v53 = vsel %vm331_vm3, %v1952_v50, %v1951_v51 }
 0x202   : > { %v6731_v22 = vpop.f32.mrb[8].mxu1 }
 0x203   : > { %v1326_v40 = vpop.f32.mrb[9].mxu1 }
 0x204   : > { %6739 = vmatprep.mubr.msk.f32.mxu0 %vm607_vm5, %v1326_v40 }
 0x205   : > { %6740 = vmatmul.mubr.msk.f32.vlgmr.msra.gmra.mrb[8].mxu0 %vm607_vm5, %v6731_v22 }
 0x206   : > { %v6734_v47 = vpop.f32.mrb[10].mxu1  ;;  %7058 = vmatpush3.bf16.msra.mxu0 %v7482_v41 }
 0x207   : > { %v1336_v49 = vpop.f32.mrb[11].mxu1  ;;  %6755 = vmatprep.subr.msk.mxu0 %vm358_vm4, %v1836_v44 }
 0x208   : > { %6742 = vmatprep.mubr.msk.f32.mxu0 %vm607_vm5, %v1336_v49 }
 0x209   : > { %6743 = vmatmul.mubr.msk.f32.gmra.mrb[10].mxu0 %vm607_vm5, %v6734_v47 }
 0x20a   : > { %6749 = vmatprep.mubr.msk.f32.mxu0 %vm607_vm5, %v1306_v7 }
 0x20d   : > { %6750 = vmatmul.mubr.msk.f32.vlgmr.msra.gmra.mrb[8].mxu0 %vm607_vm5, %v6725_v3 }
 0x20e   : > { %6752 = vmatprep.mubr.msk.f32.mxu0 %vm607_vm5, %v1316_v14  ;;  %6756 = vmatpush3.msk.msra.mxu0 %vm358_vm4, %v1836_v44 }
 0x20f   : > { %6769 = vmatprep.subr.msk.mxu0 %vm358_vm4, %v1953_v53 }
 0x211   : > { %6753 = vmatmul.mubr.msk.f32.gmra.mrb[10].mxu0 %vm607_vm5, %v6728_v11 }
 0x212   : > { %6757 = vmatprep.mubr.msk.f32.mxu0 %vm333_vm0, %v7329_v0 }
 0x215   : > { %6758 = vmatmul.mubr.msk.f32.vlgmr.msra.gmra.mrb[12].mxu0 %vm333_vm0, %v7355_v18 }
 0x216   : > { %6770 = vmatpush3.msk.msra.mxu0 %vm358_vm4, %v1953_v53  ;;  %6760 = vmatprep.mubr.msk.f32.mxu0 %vm333_vm0, %v7363_v21 }
 0x217   : > { %7068 = vmatprep.subr.bf16.mxu0 %v7470_v38 }
 0x219   : > { %6761 = vmatmul.mubr.msk.f32.gmra.mrb[14].mxu0 %vm333_vm0, %v7376_v23 }
 0x21a   : > { %6763 = vmatprep.mubr.msk.f32.mxu0 %vm333_vm0, %v7381_v24 }
 0x21d   : > { %6764 = vmatmul.mubr.msk.f32.gmra.mrb[16].mxu0 %vm333_vm0, %v7390_v25 }
 0x21e   : > { %6766 = vmatprep.mubr.msk.f32.mxu0 %vm333_vm0, %v7395_v26 }
 0x221   : > { %6767 = vmatmul.mubr.msk.f32.gmra.mrb[18].mxu0 %vm333_vm0, %v7404_v27 }
 0x222   : > { %6771 = vmatprep.mubr.msk.f32.mxu0 %vm333_vm0, %v7409_v28 }
 0x225   : > { %6772 = vmatmul.mubr.msk.f32.vlgmr.msra.gmra.mrb[12].mxu0 %vm333_vm0, %v7418_v29 }
 0x226   : > { %6774 = vmatprep.mubr.msk.f32.mxu0 %vm333_vm0, %v7423_v30  ;;  %7070 = vmatpush3.bf16.msra.mxu0 %v7470_v38 }
 0x227   : > { %7072 = vmatprep.subr.bf16.mxu0 %v7482_v41 }
 0x229   : > { %6775 = vmatmul.mubr.msk.f32.gmra.mrb[14].mxu0 %vm333_vm0, %v7432_v31 }
 0x22a   : > { %6777 = vmatprep.mubr.msk.f32.mxu0 %vm333_vm0, %v7437_v32 }
 0x22d   : > { %6778 = vmatmul.mubr.msk.f32.gmra.mrb[16].mxu0 %vm333_vm0, %v7446_v33 }
 0x22e   : > { %6780 = vmatprep.mubr.msk.f32.mxu0 %vm333_vm0, %v7451_v34 }
 0x231   : > { %6781 = vmatmul.mubr.msk.f32.gmra.mrb[18].mxu0 %vm333_vm0, %v7460_v35 }
 0x2e0   : > { %v6751_v52 = vpop.f32.mrb[8].mxu0 }
 0x2e1   : > { %v1540_v54 = vadd.f32 %v6751_v52, %v7564_v17  ;;  %v1520_v55 = vpop.f32.mrb[9].mxu0 }
 0x2e2   : > { %v1539_v56 = vadd.f32 %v1520_v55, %v7560_v12 }
 0x2e3   : > { %vm1544_vm11 = vcmp.ge.f32.partialorder %v1540_v54, 0.0  ;;  %v1548_v57 = vmul.f32 0.01, %v1540_v54 }
 0x2e4   : > { %vm1543_vm12 = vcmp.ge.f32.partialorder %v1539_v56, 0.0  ;;  %v1547_v58 = vmul.f32 0.01, %v1539_v56  ;;  %v6754_v59 = vpop.f32.mrb[10].mxu0 }
 0x2e5   : > { %v1552_v60 = vsel %vm1544_vm11, %v1540_v54, %v1548_v57  ;;  %v1542_v61 = vadd.f32 %v6754_v59, %v7570_v42  ;;  %v1530_v62 = vpop.f32.mrb[11].mxu0 }
 0x2e6   : > { %v1608_v63 = vcombine.high %v1552_v60, %v1552_v60  ;;  %v1615_v1 = vrot.slane %v1552_v60, %v7567_v39  ;;  %v1551_v2 = vsel %vm1543_vm12, %v1539_v56, %v1547_v58  ;;  %v1541_v3 = vadd.f32 %v1530_v62, %v7562_v16 }
 0x2e7   : > { %v1559_v4 = vcombine.high %v1551_v2, %v1551_v2  ;;  %v1566_v5 = vrot.slane %v1551_v2, %v7567_v39  ;;  %vm1546_vm13 = vcmp.ge.f32.partialorder %v1542_v61, 0.0  ;;  %v1550_v6 = vmul.f32 0.01, %v1542_v61 }
 0x2e8   : > { %v1622_v7 = vrot.slane %v1608_v63, %v7567_v39  ;;  %v1623_v8 = vcombine.high %v1615_v1, %v1615_v1  ;;  %v1631_v9 = vrot.slane %v1615_v1, %v7567_v39  ;;  %vm1545_vm14 = vcmp.ge.f32.partialorder %v1541_v3, 0.0 }
 0x2e9   : > { %v1573_v10 = vrot.slane %v1559_v4, %v7567_v39  ;;  %v1574_v11 = vcombine.high %v1566_v5, %v1566_v5  ;;  %v1582_v13 = vrot.slane %v1566_v5, %v7567_v39  ;;  %v1554_v14 = vsel %vm1546_vm13, %v1542_v61, %v1550_v6 }
 0x2ea   : > { %v1624_v15 = vcombine.high %v1622_v7, %v1622_v7  ;;  %v1638_v19 = vrot.slane %v1622_v7, %v7567_v39  ;;  %v1645_v20 = vrot.slane %v1623_v8, %v7567_v39  ;;  %v1653_v22 = vcombine.high %v1631_v9, %v1631_v9  ;;  %1795 = vst.msk [vmem:[%s7579_s18 + $0x41] sm:$0x1] %vm1070_vm8, %v1631_v9 }
 0x2eb   : > { %v1575_v36 = vcombine.high %v1573_v10, %v1573_v10  ;;  %v1589_v37 = vrot.slane %v1573_v10, %v7567_v39  ;;  %v1596_v40 = vrot.slane %v1574_v11, %v7567_v39  ;;  %v1604_v43 = vcombine.high %v1582_v13, %v1582_v13  ;;  %1787 = vst.msk [vmem:[%s7579_s18 + $0x1] sm:$0x1] %vm1070_vm8, %v1582_v13 }
 0x2ec   : > { %v1652_v44 = vrot.slane %v1624_v15, %v7567_v39  ;;  %v1654_v45 = vcombine.high %v1638_v19, %v1638_v19  ;;  %v1655_v46 = vcombine.high %v1645_v20, %v1645_v20  ;;  %1796 = vst.msk [vmem:[%s7579_s18 + $0x49] sm:$0x1] %vm1070_vm8, %v1645_v20  ;;  %1797 = vst.msk [vmem:[%s7579_s18 + $0x51] sm:$0x1] %vm1070_vm8, %v1653_v22  ;;  %v1549_v54 = vmul.f32 0.01, %v1541_v3 }
 0x2ed   : > { %1799 = vst.msk [vmem:[%s7579_s18 + $0x61] sm:$0x1] %vm1070_vm8, %v1638_v19  ;;  %v1706_v47 = vcombine.high %v1554_v14, %v1554_v14  ;;  %v1603_v48 = vrot.slane %v1575_v36, %v7567_v39  ;;  %v1605_v49 = vcombine.high %v1589_v37, %v1589_v37  ;;  %v1606_v50 = vcombine.high %v1596_v40, %v1596_v40  ;;  %v2541_v36 = vld [vmem:[%s7339_s30 + $0x27] sm:$0x1] }
 0x2ee   : > { %1788 = vst.msk [vmem:[%s7579_s18 + $0x9] sm:$0x1] %vm1070_vm8, %v1596_v40  ;;  %1789 = vst.msk [vmem:[%s7579_s18 + $0x11] sm:$0x1] %vm1070_vm8, %v1604_v43  ;;  %v1713_v51 = vrot.slane %v1554_v14, %v7567_v39  ;;  %v1656_v53 = vcombine.high %v1652_v44, %v1652_v44  ;;  %v1553_v60 = vsel %vm1545_vm14, %v1541_v3, %v1549_v54  ;;  %v2540_v14 = vld [vmem:[%s7339_s30 + $0x17] sm:$0x1] }
 0x2ef   : > { %1791 = vst.msk [vmem:[%s7579_s18 + $0x21] sm:$0x1] %vm1070_vm8, %v1589_v37  ;;  %1798 = vst.msk [vmem:[%s7579_s18 + $0x59] sm:$0x1] %vm1070_vm8, %v1655_v46  ;;  %v1720_v52 = vrot.slane %v1706_v47, %v7567_v39  ;;  %v1607_v55 = vcombine.high %v1603_v48, %v1603_v48  ;;  %v1657_v63 = vcombine.high %v1553_v60, %v1553_v60  ;;  %v2547_v37 = vrot.slane %v2540_v14, 7 }
 0x2f0   : > { %1800 = vst.msk [vmem:[%s7579_s18 + $0x69] sm:$0x1] %vm1070_vm8, %v1652_v44  ;;  %1801 = vst.msk [vmem:[%s7579_s18 + $0x71] sm:$0x1] %vm1070_vm8, %v1654_v45  ;;  %v1721_v56 = vcombine.high %v1713_v51, %v1713_v51  ;;  %v1729_v57 = vrot.slane %v1713_v51, %v7567_v39  ;;  %v1664_v1 = vrot.slane %v1553_v60, %v7567_v39  ;;  %v2539_v44 = vld [vmem:[%s7339_s30 + $0x7] sm:$0x1] }
 0x2f1   : > { %1790 = vst.msk [vmem:[%s7579_s18 + $0x19] sm:$0x1] %vm1070_vm8, %v1606_v50  ;;  %1792 = vst.msk [vmem:[%s7579_s18 + $0x29] sm:$0x1] %vm1070_vm8, %v1603_v48  ;;  %v1722_v58 = vcombine.high %v1720_v52, %v1720_v52  ;;  %v1736_v59 = vrot.slane %v1720_v52, %v7567_v39  ;;  %v1671_v5 = vrot.slane %v1657_v63, %v7567_v39  ;;  %v2542_v45 = vld [vmem:[%s7339_s30 + $0x37] sm:$0x1] }
 0x2f2   : > { %1793 = vst.msk [vmem:[%s7579_s18 + $0x31] sm:$0x1] %vm1070_vm8, %v1605_v49  ;;  %1802 = vst.msk [vmem:[%s7579_s18 + $0x79] sm:$0x1] %vm1070_vm8, %v1656_v53  ;;  %v1743_v61 = vrot.slane %v1721_v56, %v7567_v39  ;;  %v1751_v62 = vcombine.high %v1729_v57, %v1729_v57  ;;  %v1672_v6 = vcombine.high %v1664_v1, %v1664_v1  ;;  %v2549_v46 = vrot.slane %v2541_v36, 6 }
 0x2f3   : > { %1794 = vst.msk [vmem:[%s7579_s18 + $0x39] sm:$0x1] %vm1070_vm8, %v1607_v55  ;;  %1811 = vst.msk [vmem:[%s7579_s18 + $0xc1] sm:$0x1] %vm1070_vm8, %v1729_v57  ;;  %v1750_v2 = vrot.slane %v1722_v58, %v7567_v39  ;;  %v1752_v4 = vcombine.high %v1736_v59, %v1736_v59  ;;  %v1680_v7 = vrot.slane %v1664_v1, %v7567_v39  ;;  %v2536_v50 = vld [vmem:[%s7339_s30 + $0x16] sm:$0x1] }
 0x2f4   : > { %1815 = vst.msk [vmem:[%s7579_s18 + $0xe1] sm:$0x1] %vm1070_vm8, %v1736_v59  ;;  %v1753_v3 = vcombine.high %v1743_v61, %v1743_v61  ;;  %1812 = vst.msk [vmem:[%s7579_s18 + $0xc9] sm:$0x1] %vm1070_vm8, %v1743_v61  ;;  %v1673_v9 = vcombine.high %v1671_v5, %v1671_v5  ;;  %v1687_v10 = vrot.slane %v1671_v5, %v7567_v39  ;;  %v2551_v51 = vrot.slane %v2542_v45, 5 }
 0x2f5   : > { %1813 = vst.msk [vmem:[%s7579_s18 + $0xd1] sm:$0x1] %vm1070_vm8, %v1751_v62  ;;  %v1754_v8 = vcombine.high %v1750_v2, %v1750_v2  ;;  %1816 = vst.msk [vmem:[%s7579_s18 + $0xe9] sm:$0x1] %vm1070_vm8, %v1750_v2  ;;  %v1694_v11 = vrot.slane %v1672_v6, %v7567_v39  ;;  %v1702_v13 = vcombine.high %v1680_v7, %v1680_v7  ;;  %v2537_v54 = vld [vmem:[%s7339_s30 + $0x26] sm:$0x1] }
 0x2f6   : > { %1817 = vst.msk [vmem:[%s7579_s18 + $0xf1] sm:$0x1] %vm1070_vm8, %v1752_v4  ;;  %1814 = vst.msk [vmem:[%s7579_s18 + $0xd9] sm:$0x1] %vm1070_vm8, %v1753_v3  ;;  %v1701_v15 = vrot.slane %v1673_v9, %v7567_v39  ;;  %v1703_v19 = vcombine.high %v1687_v10, %v1687_v10  ;;  %v2548_v48 = vsel %vm325_vm1, %v2547_v37, %v2539_v44  ;;  %v2664_v55 = vrot.slane %v2536_v50, 7 }
 0x2f7   : > { %1803 = vst.msk [vmem:[%s7579_s18 + $0x81] sm:$0x1] %vm1070_vm8, %v1680_v7  ;;  %1818 = vst.msk [vmem:[%s7579_s18 + $0xf9] sm:$0x1] %vm1070_vm8, %v1754_v8  ;;  %v1704_v20 = vcombine.high %v1694_v11, %v1694_v11  ;;  %v2550_v53 = vsel %vm328_vm2, %v2549_v46, %v2548_v48  ;;  %v2535_v57 = vld [vmem:[%s7339_s30 + $0x6] sm:$0x1] }
 0x2f8   : > { %1804 = vst.msk [vmem:[%s7579_s18 + $0x89] sm:$0x1] %vm1070_vm8, %v1694_v11  ;;  %1805 = vst.msk [vmem:[%s7579_s18 + $0x91] sm:$0x1] %vm1070_vm8, %v1702_v13  ;;  %v6773_v22 = vpop.f32.mrb[12].mxu0  ;;  %v1705_v40 = vcombine.high %v1701_v15, %v1701_v15  ;;  %v2552_v58 = vsel %vm331_vm3, %v2551_v51, %v2550_v53  ;;  %v2666_v60 = vrot.slane %v2537_v54, 6  ;;  %v2665_v62 = vsel %vm325_vm1, %v2664_v55, %v2535_v57 }
 0x2f9   : > { %1807 = vst.msk [vmem:[%s7579_s18 + $0xa1] sm:$0x1] %vm1070_vm8, %v1687_v10  ;;  %1806 = vst.msk [vmem:[%s7579_s18 + $0x99] sm:$0x1] %vm1070_vm8, %v1704_v20  ;;  %v2022_v43 = vpop.f32.mrb[13].mxu0 }
 0x2fa   : > { %1808 = vst.msk [vmem:[%s7579_s18 + $0xa9] sm:$0x1] %vm1070_vm8, %v1701_v15  ;;  %1809 = vst.msk [vmem:[%s7579_s18 + $0xb1] sm:$0x1] %vm1070_vm8, %v1703_v19  ;;  %v2538_v59 = vld [vmem:[%s7339_s30 + $0x36] sm:$0x1]  ;;  %v2667_v2 = vsel %vm328_vm2, %v2666_v60, %v2665_v62 }
 0x2fb   : > { %1810 = vst.msk [vmem:[%s7579_s18 + $0xb9] sm:$0x1] %vm1070_vm8, %v1705_v40  ;;  %v2668_v1 = vrot.slane %v2538_v59, 5 }
 0x2fc   : > { %v6776_v47 = vpop.f32.mrb[14].mxu0 }
 0x2fd   : > { %v2032_v49 = vpop.f32.mrb[15].mxu0  ;;  %v2669_v4 = vsel %vm331_vm3, %v2668_v1, %v2667_v2 }
 0x300   : > { %v6779_v52 = vpop.f32.mrb[16].mxu0 }
 0x301   : > { %v2042_v56 = vpop.f32.mrb[17].mxu0 }
 0x302   : > { %6787 = vmatprep.mubr.msk.f32.mxu1 %vm607_vm5, %v2042_v56 }
 0x303   : > { %6788 = vmatmul.mubr.msk.f32.vlgmr.msra.gmra.mrb[12].mxu1 %vm607_vm5, %v6779_v52 }
 0x304   : > { %v6782_v61 = vpop.f32.mrb[18].mxu0  ;;  %7066 = vmatpush3.bf16.msra.mxu1 %v7482_v41 }
 0x305   : > { %v2052_v63 = vpop.f32.mrb[19].mxu0  ;;  %6803 = vmatprep.subr.msk.mxu1 %vm358_vm4, %v2552_v58 }
 0x306   : > { %6790 = vmatprep.mubr.msk.f32.mxu1 %vm607_vm5, %v2052_v63 }
 0x307   : > { %6791 = vmatmul.mubr.msk.f32.gmra.mrb[14].mxu1 %vm607_vm5, %v6782_v61 }
 0x308   : > { %6797 = vmatprep.mubr.msk.f32.mxu1 %vm607_vm5, %v2022_v43 }
 0x30b   : > { %6798 = vmatmul.mubr.msk.f32.vlgmr.msra.gmra.mrb[12].mxu1 %vm607_vm5, %v6773_v22 }
 0x30c   : > { %6800 = vmatprep.mubr.msk.f32.mxu1 %vm607_vm5, %v2032_v49  ;;  %6804 = vmatpush3.msk.msra.mxu1 %vm358_vm4, %v2552_v58 }
 0x30d   : > { %6817 = vmatprep.subr.msk.mxu1 %vm358_vm4, %v2669_v4 }
 0x30f   : > { %6801 = vmatmul.mubr.msk.f32.gmra.mrb[14].mxu1 %vm607_vm5, %v6776_v47 }
 0x310   : > { %6805 = vmatprep.mubr.msk.f32.mxu1 %vm333_vm0, %v7329_v0 }
 0x313   : > { %6806 = vmatmul.mubr.msk.f32.vlgmr.msra.gmra.mrb[16].mxu1 %vm333_vm0, %v7355_v18 }
 0x314   : > { %6818 = vmatpush3.msk.msra.mxu1 %vm358_vm4, %v2669_v4  ;;  %6808 = vmatprep.mubr.msk.f32.mxu1 %vm333_vm0, %v7363_v21 }
 0x315   : > { %7076 = vmatprep.subr.bf16.mxu1 %v7470_v38 }
 0x317   : > { %6809 = vmatmul.mubr.msk.f32.gmra.mrb[18].mxu1 %vm333_vm0, %v7376_v23 }
 0x318   : > { %6811 = vmatprep.mubr.msk.f32.mxu1 %vm333_vm0, %v7381_v24 }
 0x31b   : > { %6812 = vmatmul.mubr.msk.f32.gmra.mrb[20].mxu1 %vm333_vm0, %v7390_v25 }
 0x31c   : > { %6814 = vmatprep.mubr.msk.f32.mxu1 %vm333_vm0, %v7395_v26 }
 0x31f   : > { %6815 = vmatmul.mubr.msk.f32.gmra.mrb[22].mxu1 %vm333_vm0, %v7404_v27 }
 0x320   : > { %6819 = vmatprep.mubr.msk.f32.mxu1 %vm333_vm0, %v7409_v28 }
 0x323   : > { %6820 = vmatmul.mubr.msk.f32.vlgmr.msra.gmra.mrb[16].mxu1 %vm333_vm0, %v7418_v29 }
 0x324   : > { %6822 = vmatprep.mubr.msk.f32.mxu1 %vm333_vm0, %v7423_v30  ;;  %7078 = vmatpush3.bf16.msra.mxu1 %v7470_v38 }
 0x325   : > { %7080 = vmatprep.subr.bf16.mxu1 %v7482_v41 }
 0x327   : > { %6823 = vmatmul.mubr.msk.f32.gmra.mrb[18].mxu1 %vm333_vm0, %v7432_v31 }
 0x328   : > { %6825 = vmatprep.mubr.msk.f32.mxu1 %vm333_vm0, %v7437_v32 }
 0x32b   : > { %6826 = vmatmul.mubr.msk.f32.gmra.mrb[20].mxu1 %vm333_vm0, %v7446_v33 }
 0x32c   : > { %6828 = vmatprep.mubr.msk.f32.mxu1 %vm333_vm0, %v7451_v34 }
 0x32f   : > { %6829 = vmatmul.mubr.msk.f32.gmra.mrb[22].mxu1 %vm333_vm0, %v7460_v35 }
 0x3de   : > { %v6799_v0 = vpop.f32.mrb[12].mxu1 }
 0x3df   : > { %v2256_v18 = vadd.f32 %v6799_v0, %v7564_v17  ;;  %v2236_v21 = vpop.f32.mrb[13].mxu1 }
 0x3e0   : > { %v2255_v23 = vadd.f32 %v2236_v21, %v7560_v12 }
 0x3e1   : > { %vm2260_vm15 = vcmp.ge.f32.partialorder %v2256_v18, 0.0  ;;  %v2264_v24 = vmul.f32 0.01, %v2256_v18 }
 0x3e2   : > { %vm2259_vm6 = vcmp.ge.f32.partialorder %v2255_v23, 0.0  ;;  %v2263_v25 = vmul.f32 0.01, %v2255_v23  ;;  %v6802_v26 = vpop.f32.mrb[14].mxu1 }
 0x3e3   : > { %v2268_v27 = vsel %vm2260_vm15, %v2256_v18, %v2264_v24  ;;  %v2258_v28 = vadd.f32 %v6802_v26, %v7570_v42  ;;  %v2246_v29 = vpop.f32.mrb[15].mxu1 }
 0x3e4   : > { %v2324_v30 = vcombine.high %v2268_v27, %v2268_v27  ;;  %v2331_v31 = vrot.slane %v2268_v27, %v7567_v39  ;;  %v2267_v32 = vsel %vm2259_vm6, %v2255_v23, %v2263_v25  ;;  %v2257_v33 = vadd.f32 %v2246_v29, %v7562_v16  ;;  %v3256_v27 = vld [vmem:[%s7339_s30 + $0x19] sm:$0x1] }
 0x3e5   : > { %v2275_v34 = vcombine.high %v2267_v32, %v2267_v32  ;;  %v2282_v35 = vrot.slane %v2267_v32, %v7567_v39  ;;  %vm2262_vm7 = vcmp.ge.f32.partialorder %v2258_v28, 0.0  ;;  %v2266_v3 = vmul.f32 0.01, %v2258_v28  ;;  %v3257_v32 = vld [vmem:[%s7339_s30 + $0x29] sm:$0x1] }
 0x3e6   : > { %v2338_v5 = vrot.slane %v2324_v30, %v7567_v39  ;;  %v2339_v6 = vcombine.high %v2331_v31, %v2331_v31  ;;  %v2347_v7 = vrot.slane %v2331_v31, %v7567_v39  ;;  %vm2261_vm9 = vcmp.ge.f32.partialorder %v2257_v33, 0.0 }
 0x3e7   : > { %v2289_v8 = vrot.slane %v2275_v34, %v7567_v39  ;;  %v2290_v9 = vcombine.high %v2282_v35, %v2282_v35  ;;  %v2298_v10 = vrot.slane %v2282_v35, %v7567_v39  ;;  %v2270_v11 = vsel %vm2262_vm7, %v2258_v28, %v2266_v3  ;;  %v3255_v3 = vld [vmem:[%s7339_s30 + $0x9] sm:$0x1] }
 0x3e8   : > { %v2340_v13 = vcombine.high %v2338_v5, %v2338_v5  ;;  %v2354_v14 = vrot.slane %v2338_v5, %v7567_v39  ;;  %v2361_v15 = vrot.slane %v2339_v6, %v7567_v39  ;;  %v2369_v19 = vcombine.high %v2347_v7, %v2347_v7  ;;  %2511 = vst.msk [vmem:[%s7579_s18 + $0x42] sm:$0x1] %vm1070_vm8, %v2347_v7  ;;  %v3258_v5 = vld [vmem:[%s7339_s30 + $0x39] sm:$0x1] }
 0x3e9   : > { %v2291_v20 = vcombine.high %v2289_v8, %v2289_v8  ;;  %v2305_v22 = vrot.slane %v2289_v8, %v7567_v39  ;;  %v2312_v36 = vrot.slane %v2290_v9, %v7567_v39  ;;  %v2320_v37 = vcombine.high %v2298_v10, %v2298_v10  ;;  %2503 = vst.msk [vmem:[%s7579_s18 + $0x2] sm:$0x1] %vm1070_vm8, %v2298_v10  ;;  %v3252_v10 = vld [vmem:[%s7339_s30 + $0x18] sm:$0x1] }
 0x3ea   : > { %v2368_v40 = vrot.slane %v2340_v13, %v7567_v39  ;;  %v2370_v43 = vcombine.high %v2354_v14, %v2354_v14  ;;  %v2371_v44 = vcombine.high %v2361_v15, %v2361_v15  ;;  %2512 = vst.msk [vmem:[%s7579_s18 + $0x4a] sm:$0x1] %vm1070_vm8, %v2361_v15  ;;  %2513 = vst.msk [vmem:[%s7579_s18 + $0x52] sm:$0x1] %vm1070_vm8, %v2369_v19  ;;  %v2265_v53 = vmul.f32 0.01, %v2257_v33 }
 0x3eb   : > { %2515 = vst.msk [vmem:[%s7579_s18 + $0x62] sm:$0x1] %vm1070_vm8, %v2354_v14  ;;  %v2422_v45 = vcombine.high %v2270_v11, %v2270_v11  ;;  %v2319_v46 = vrot.slane %v2291_v20, %v7567_v39  ;;  %v2321_v47 = vcombine.high %v2305_v22, %v2305_v22  ;;  %v2322_v48 = vcombine.high %v2312_v36, %v2312_v36  ;;  %v3253_v15 = vld [vmem:[%s7339_s30 + $0x28] sm:$0x1] }
 0x3ec   : > { %2504 = vst.msk [vmem:[%s7579_s18 + $0xa] sm:$0x1] %vm1070_vm8, %v2312_v36  ;;  %2505 = vst.msk [vmem:[%s7579_s18 + $0x12] sm:$0x1] %vm1070_vm8, %v2320_v37  ;;  %v2429_v49 = vrot.slane %v2270_v11, %v7567_v39  ;;  %v2372_v50 = vcombine.high %v2368_v40, %v2368_v40  ;;  %v2269_v58 = vsel %vm2261_vm9, %v2257_v33, %v2265_v53  ;;  %v3263_v33 = vrot.slane %v3256_v27, 7  ;;  %v8031_v53 = vld [vmem:[%s8788_s1 + $0x18] sm:$0xff] }
 0x3ed   : > { %2507 = vst.msk [vmem:[%s7579_s18 + $0x22] sm:$0x1] %vm1070_vm8, %v2305_v22  ;;  %2514 = vst.msk [vmem:[%s7579_s18 + $0x5a] sm:$0x1] %vm1070_vm8, %v2371_v44  ;;  %v2436_v51 = vrot.slane %v2422_v45, %v7567_v39  ;;  %v2323_v52 = vcombine.high %v2319_v46, %v2319_v46  ;;  %v2373_v61 = vcombine.high %v2269_v58, %v2269_v58  ;;  %v3265_v6 = vrot.slane %v3257_v32, 6 }
 0x3ee   : > { %2516 = vst.msk [vmem:[%s7579_s18 + $0x6a] sm:$0x1] %vm1070_vm8, %v2368_v40  ;;  %2517 = vst.msk [vmem:[%s7579_s18 + $0x72] sm:$0x1] %vm1070_vm8, %v2370_v43  ;;  %v2437_v54 = vcombine.high %v2429_v49, %v2429_v49  ;;  %v2445_v55 = vrot.slane %v2429_v49, %v7567_v39  ;;  %v2380_v62 = vrot.slane %v2269_v58, %v7567_v39  ;;  %v3267_v11 = vrot.slane %v3258_v5, 5  ;;  %v8008_v49 = vld [vmem:[%s8788_s1] sm:$0xff] }
 0x3ef   : > { %2506 = vst.msk [vmem:[%s7579_s18 + $0x1a] sm:$0x1] %vm1070_vm8, %v2322_v48  ;;  %2508 = vst.msk [vmem:[%s7579_s18 + $0x2a] sm:$0x1] %vm1070_vm8, %v2319_v46  ;;  %v2438_v56 = vcombine.high %v2436_v51, %v2436_v51  ;;  %v2452_v57 = vrot.slane %v2436_v51, %v7567_v39  ;;  %v2387_v4 = vrot.slane %v2373_v61, %v7567_v39  ;;  %v3380_v19 = vrot.slane %v3252_v10, 7  ;;  %v8023_v51 = vld [vmem:[%s8788_s1 + $0x10] sm:$0xff] }
 0x3f0   : > { %2509 = vst.msk [vmem:[%s7579_s18 + $0x32] sm:$0x1] %vm1070_vm8, %v2321_v47  ;;  %2518 = vst.msk [vmem:[%s7579_s18 + $0x7a] sm:$0x1] %vm1070_vm8, %v2372_v50  ;;  %v2459_v59 = vrot.slane %v2437_v54, %v7567_v39  ;;  %v2467_v60 = vcombine.high %v2445_v55, %v2445_v55  ;;  %v2388_v0 = vcombine.high %v2380_v62, %v2380_v62  ;;  %v3251_v22 = vld [vmem:[%s7339_s30 + $0x8] sm:$0x1] }
 0x3f1   : > { %2510 = vst.msk [vmem:[%s7579_s18 + $0x3a] sm:$0x1] %vm1070_vm8, %v2323_v52  ;;  %2527 = vst.msk [vmem:[%s7579_s18 + $0xc2] sm:$0x1] %vm1070_vm8, %v2445_v55  ;;  %v2466_v63 = vrot.slane %v2438_v56, %v7567_v39  ;;  %v2468_v1 = vcombine.high %v2452_v57, %v2452_v57  ;;  %v2396_v18 = vrot.slane %v2380_v62, %v7567_v39  ;;  %v3254_v37 = vld [vmem:[%s7339_s30 + $0x38] sm:$0x1] }
 0x3f2   : > { %2531 = vst.msk [vmem:[%s7579_s18 + $0xe2] sm:$0x1] %vm1070_vm8, %v2452_v57  ;;  %v2469_v2 = vcombine.high %v2459_v59, %v2459_v59  ;;  %2528 = vst.msk [vmem:[%s7579_s18 + $0xca] sm:$0x1] %vm1070_vm8, %v2459_v59  ;;  %v2389_v23 = vcombine.high %v2387_v4, %v2387_v4  ;;  %v2403_v24 = vrot.slane %v2387_v4, %v7567_v39  ;;  %v3382_v40 = vrot.slane %v3253_v15, 6  ;;  %v8015_v50 = vld [vmem:[%s8788_s1 + $0x8] sm:$0xff] }
 0x3f3   : > { %2529 = vst.msk [vmem:[%s7579_s18 + $0xd2] sm:$0x1] %vm1070_vm8, %v2467_v60  ;;  %v2470_v21 = vcombine.high %v2466_v63, %v2466_v63  ;;  %2532 = vst.msk [vmem:[%s7579_s18 + $0xea] sm:$0x1] %vm1070_vm8, %v2466_v63  ;;  %v2410_v25 = vrot.slane %v2388_v0, %v7567_v39  ;;  %v2418_v26 = vcombine.high %v2396_v18, %v2396_v18  ;;  %v3384_v46 = vrot.slane %v3254_v37, 5  ;;  %v8038_v52 = vld [vmem:[%s8788_s1 + $0x20] sm:$0xff] }
 0x3f4   : > { %2533 = vst.msk [vmem:[%s7579_s18 + $0xf2] sm:$0x1] %vm1070_vm8, %v2468_v1  ;;  %2530 = vst.msk [vmem:[%s7579_s18 + $0xda] sm:$0x1] %vm1070_vm8, %v2469_v2  ;;  %v2417_v28 = vrot.slane %v2389_v23, %v7567_v39  ;;  %v2419_v29 = vcombine.high %v2403_v24, %v2403_v24  ;;  %v3264_v8 = vsel %vm325_vm1, %v3263_v33, %v3255_v3  ;;  %v8045_v54 = vld [vmem:[%s8788_s1 + $0x28] sm:$0xff]  ;;  %v8052_v55 = vld [vmem:[%s8788_s1 + $0x30] sm:$0xff] }
 0x3f5   : > { %2519 = vst.msk [vmem:[%s7579_s18 + $0x82] sm:$0x1] %vm1070_vm8, %v2396_v18  ;;  %2534 = vst.msk [vmem:[%s7579_s18 + $0xfa] sm:$0x1] %vm1070_vm8, %v2470_v21  ;;  %v2420_v30 = vcombine.high %v2410_v25, %v2410_v25  ;;  %v3266_v13 = vsel %vm328_vm2, %v3265_v6, %v3264_v8  ;;  %v3381_v44 = vsel %vm325_vm1, %v3380_v19, %v3251_v22  ;;  %v8059_v56 = vld [vmem:[%s8788_s1 + $0x38] sm:$0xff]  ;;  %v8066_v57 = vld [vmem:[%s8787_s0] sm:$0xff] }
 0x3f6   : > { %2520 = vst.msk [vmem:[%s7579_s18 + $0x8a] sm:$0x1] %vm1070_vm8, %v2410_v25  ;;  %2521 = vst.msk [vmem:[%s7579_s18 + $0x92] sm:$0x1] %vm1070_vm8, %v2418_v26  ;;  %v6821_v31 = vpop.f32.mrb[16].mxu1  ;;  %v2421_v34 = vcombine.high %v2417_v28, %v2417_v28  ;;  %v3268_v36 = vsel %vm331_vm3, %v3267_v11, %v3266_v13  ;;  %v3383_v47 = vsel %vm328_vm2, %v3382_v40, %v3381_v44  ;;  %v8073_v58 = vld [vmem:[%s8787_s0 + $0x8] sm:$0xff] }
 0x3f7   : > { %2523 = vst.msk [vmem:[%s7579_s18 + $0xa2] sm:$0x1] %vm1070_vm8, %v2403_v24  ;;  %2522 = vst.msk [vmem:[%s7579_s18 + $0x9a] sm:$0x1] %vm1070_vm8, %v2420_v30  ;;  %v2738_v35 = vpop.f32.mrb[17].mxu1  ;;  %v3385_v48 = vsel %vm331_vm3, %v3384_v46, %v3383_v47  ;;  %v8080_v59 = vld [vmem:[%s8787_s0 + $0x10] sm:$0xff] }
 0x3f8   : > { %2524 = vst.msk [vmem:[%s7579_s18 + $0xaa] sm:$0x1] %vm1070_vm8, %v2417_v28  ;;  %2525 = vst.msk [vmem:[%s7579_s18 + $0xb2] sm:$0x1] %vm1070_vm8, %v2419_v29  ;;  %v8089_v60 = vld [vmem:[%s8787_s0 + $0x18] sm:$0xff]  ;;  %v8096_v61 = vld [vmem:[%s8787_s0 + $0x20] sm:$0xff] }
 0x3f9   : > { %2526 = vst.msk [vmem:[%s7579_s18 + $0xba] sm:$0x1] %vm1070_vm8, %v2421_v34  ;;  %v8103_v62 = vld [vmem:[%s8787_s0 + $0x28] sm:$0xff]  ;;  %v8110_v63 = vld [vmem:[%s8787_s0 + $0x30] sm:$0xff]  ;;  %v8117_v1 = vld [vmem:[%s8787_s0 + $0x38] sm:$0xff] }
 0x3fa   : > { %v6824_v7 = vpop.f32.mrb[18].mxu1 }
 0x3fb   : > { %v2748_v9 = vpop.f32.mrb[19].mxu1 }
 0x3fe   : > { %v6827_v14 = vpop.f32.mrb[20].mxu1 }
 0x3ff   : > { %v2758_v20 = vpop.f32.mrb[21].mxu1 }
 0x400   : > { %6835 = vmatprep.mubr.msk.f32.mxu0 %vm607_vm5, %v2758_v20 }
 0x401   : > { %6836 = vmatmul.mubr.msk.f32.vlgmr.msra.gmra.mrb[20].mxu0 %vm607_vm5, %v6827_v14 }
 0x402   : > { %v6830_v43 = vpop.f32.mrb[22].mxu1  ;;  %7074 = vmatpush3.bf16.msra.mxu0 %v7482_v41 }
 0x403   : > { %v2768_v45 = vpop.f32.mrb[23].mxu1  ;;  %6851 = vmatprep.subr.msk.mxu0 %vm358_vm4, %v3268_v36 }
 0x404   : > { %6838 = vmatprep.mubr.msk.f32.mxu0 %vm607_vm5, %v2768_v45 }
 0x405   : > { %6839 = vmatmul.mubr.msk.f32.gmra.mrb[22].mxu0 %vm607_vm5, %v6830_v43 }
 0x406   : > { %6845 = vmatprep.mubr.msk.f32.mxu0 %vm607_vm5, %v2738_v35 }
 0x409   : > { %6846 = vmatmul.mubr.msk.f32.vlgmr.msra.gmra.mrb[20].mxu0 %vm607_vm5, %v6821_v31 }
 0x40a   : > { %6848 = vmatprep.mubr.msk.f32.mxu0 %vm607_vm5, %v2748_v9  ;;  %6852 = vmatpush3.msk.msra.mxu0 %vm358_vm4, %v3268_v36 }
 0x40b   : > { %6865 = vmatprep.subr.msk.mxu0 %vm358_vm4, %v3385_v48 }
 0x40d   : > { %6849 = vmatmul.mubr.msk.f32.gmra.mrb[22].mxu0 %vm607_vm5, %v6824_v7 }
 0x40e   : > { %6853 = vmatprep.mubr.msk.f32.mxu0 %vm333_vm0, %v8008_v49 }
 0x411   : > { %6854 = vmatmul.mubr.msk.f32.vlgmr.msra.gmra.mrb[24].mxu0 %vm333_vm0, %v8015_v50 }
 0x412   : > { %6866 = vmatpush3.msk.msra.mxu0 %vm358_vm4, %v3385_v48  ;;  %6856 = vmatprep.mubr.msk.f32.mxu0 %vm333_vm0, %v8023_v51 }
 0x413   : > { %7084 = vmatprep.subr.bf16.mxu0 %v7470_v38 }
 0x415   : > { %6857 = vmatmul.mubr.msk.f32.gmra.mrb[26].mxu0 %vm333_vm0, %v8031_v53 }
 0x416   : > { %6859 = vmatprep.mubr.msk.f32.mxu0 %vm333_vm0, %v8038_v52 }
 0x419   : > { %6860 = vmatmul.mubr.msk.f32.gmra.mrb[28].mxu0 %vm333_vm0, %v8045_v54 }
 0x41a   : > { %6862 = vmatprep.mubr.msk.f32.mxu0 %vm333_vm0, %v8052_v55 }
 0x41d   : > { %6863 = vmatmul.mubr.msk.f32.gmra.mrb[30].mxu0 %vm333_vm0, %v8059_v56 }
 0x41e   : > { %6867 = vmatprep.mubr.msk.f32.mxu0 %vm333_vm0, %v8066_v57 }
 0x421   : > { %6868 = vmatmul.mubr.msk.f32.vlgmr.msra.gmra.mrb[24].mxu0 %vm333_vm0, %v8073_v58 }
 0x422   : > { %6870 = vmatprep.mubr.msk.f32.mxu0 %vm333_vm0, %v8080_v59  ;;  %7086 = vmatpush3.bf16.msra.mxu0 %v7470_v38 }
 0x423   : > { %7088 = vmatprep.subr.bf16.mxu0 %v7482_v41 }
 0x425   : > { %6871 = vmatmul.mubr.msk.f32.gmra.mrb[26].mxu0 %vm333_vm0, %v8089_v60 }
 0x426   : > { %6873 = vmatprep.mubr.msk.f32.mxu0 %vm333_vm0, %v8096_v61 }
 0x429   : > { %6874 = vmatmul.mubr.msk.f32.gmra.mrb[28].mxu0 %vm333_vm0, %v8103_v62 }
 0x42a   : > { %6876 = vmatprep.mubr.msk.f32.mxu0 %vm333_vm0, %v8110_v63 }
 0x42d   : > { %6877 = vmatmul.mubr.msk.f32.gmra.mrb[30].mxu0 %vm333_vm0, %v8117_v1 }
 0x4dc   : > { %v6847_v2 = vpop.f32.mrb[20].mxu0 }
 0x4dd   : > { %v2972_v4 = vadd.f32 %v6847_v2, %v7564_v17  ;;  %v2952_v0 = vpop.f32.mrb[21].mxu0 }
 0x4de   : > { %v2971_v18 = vadd.f32 %v2952_v0, %v7560_v12 }
 0x4df   : > { %vm2976_vm10 = vcmp.ge.f32.partialorder %v2972_v4, 0.0  ;;  %v2980_v21 = vmul.f32 0.01, %v2972_v4 }
 0x4e0   : > { %vm2975_vm11 = vcmp.ge.f32.partialorder %v2971_v18, 0.0  ;;  %v2979_v23 = vmul.f32 0.01, %v2971_v18  ;;  %v6850_v24 = vpop.f32.mrb[22].mxu0 }
 0x4e1   : > { %v2984_v25 = vsel %vm2976_vm10, %v2972_v4, %v2980_v21  ;;  %v2974_v26 = vadd.f32 %v6850_v24, %v7570_v42  ;;  %v2962_v27 = vpop.f32.mrb[23].mxu0 }
 0x4e2   : > { %v3040_v28 = vcombine.high %v2984_v25, %v2984_v25  ;;  %v3047_v29 = vrot.slane %v2984_v25, %v7567_v39  ;;  %v2983_v30 = vsel %vm2975_vm11, %v2971_v18, %v2979_v23  ;;  %v2973_v31 = vadd.f32 %v2962_v27, %v7562_v16 }
 0x4e3   : > { %v2991_v32 = vcombine.high %v2983_v30, %v2983_v30  ;;  %v2998_v33 = vrot.slane %v2983_v30, %v7567_v39  ;;  %vm2978_vm12 = vcmp.ge.f32.partialorder %v2974_v26, 0.0  ;;  %v2982_v34 = vmul.f32 0.01, %v2974_v26 }
 0x4e4   : > { %v3054_v35 = vrot.slane %v3040_v28, %v7567_v39  ;;  %v3055_v3 = vcombine.high %v3047_v29, %v3047_v29  ;;  %v3063_v5 = vrot.slane %v3047_v29, %v7567_v39  ;;  %vm2977_vm13 = vcmp.ge.f32.partialorder %v2973_v31, 0.0 }
 0x4e5   : > { %v3005_v6 = vrot.slane %v2991_v32, %v7567_v39  ;;  %v3006_v7 = vcombine.high %v2998_v33, %v2998_v33  ;;  %v3014_v8 = vrot.slane %v2998_v33, %v7567_v39  ;;  %v2986_v9 = vsel %vm2978_vm12, %v2974_v26, %v2982_v34 }
 0x4e6   : > { %v3056_v10 = vcombine.high %v3054_v35, %v3054_v35  ;;  %v3070_v11 = vrot.slane %v3054_v35, %v7567_v39  ;;  %v3077_v13 = vrot.slane %v3055_v3, %v7567_v39  ;;  %v3085_v14 = vcombine.high %v3063_v5, %v3063_v5  ;;  %3227 = vst.msk [vmem:[%s7579_s18 + $0x43] sm:$0x1] %vm1070_vm8, %v3063_v5 }
 0x4e7   : > { %v3007_v15 = vcombine.high %v3005_v6, %v3005_v6  ;;  %v3021_v19 = vrot.slane %v3005_v6, %v7567_v39  ;;  %v3028_v20 = vrot.slane %v3006_v7, %v7567_v39  ;;  %v3036_v22 = vcombine.high %v3014_v8, %v3014_v8  ;;  %3219 = vst.msk [vmem:[%s7579_s18 + $0x3] sm:$0x1] %vm1070_vm8, %v3014_v8 }
 0x4e8   : > { %v3084_v36 = vrot.slane %v3056_v10, %v7567_v39  ;;  %v3086_v37 = vcombine.high %v3070_v11, %v3070_v11  ;;  %v3087_v40 = vcombine.high %v3077_v13, %v3077_v13  ;;  %3228 = vst.msk [vmem:[%s7579_s18 + $0x4b] sm:$0x1] %vm1070_vm8, %v3077_v13  ;;  %3229 = vst.msk [vmem:[%s7579_s18 + $0x53] sm:$0x1] %vm1070_vm8, %v3085_v14  ;;  %v2981_v4 = vmul.f32 0.01, %v2973_v31 }
 0x4e9   : > { %3231 = vst.msk [vmem:[%s7579_s18 + $0x63] sm:$0x1] %vm1070_vm8, %v3070_v11  ;;  %v3138_v43 = vcombine.high %v2986_v9, %v2986_v9  ;;  %v3035_v44 = vrot.slane %v3007_v15, %v7567_v39  ;;  %v3037_v45 = vcombine.high %v3021_v19, %v3021_v19  ;;  %v3038_v46 = vcombine.high %v3028_v20, %v3028_v20  ;;  %v3973_v15 = vld [vmem:[%s7339_s30 + $0x2b] sm:$0x1] }
 0x4ea   : > { %3220 = vst.msk [vmem:[%s7579_s18 + $0xb] sm:$0x1] %vm1070_vm8, %v3028_v20  ;;  %3221 = vst.msk [vmem:[%s7579_s18 + $0x13] sm:$0x1] %vm1070_vm8, %v3036_v22  ;;  %v3145_v47 = vrot.slane %v2986_v9, %v7567_v39  ;;  %v3088_v48 = vcombine.high %v3084_v36, %v3084_v36  ;;  %v2985_v25 = vsel %vm2977_vm13, %v2973_v31, %v2981_v4  ;;  %v3972_v9 = vld [vmem:[%s7339_s30 + $0x1b] sm:$0x1] }
 0x4eb   : > { %3223 = vst.msk [vmem:[%s7579_s18 + $0x23] sm:$0x1] %vm1070_vm8, %v3021_v19  ;;  %3230 = vst.msk [vmem:[%s7579_s18 + $0x5b] sm:$0x1] %vm1070_vm8, %v3087_v40  ;;  %v3152_v2 = vrot.slane %v3138_v43, %v7567_v39  ;;  %v3039_v0 = vcombine.high %v3035_v44, %v3035_v44  ;;  %v3089_v28 = vcombine.high %v2985_v25, %v2985_v25  ;;  %v3979_v19 = vrot.slane %v3972_v9, 7 }
 0x4ec   : > { %3232 = vst.msk [vmem:[%s7579_s18 + $0x6b] sm:$0x1] %vm1070_vm8, %v3084_v36  ;;  %3233 = vst.msk [vmem:[%s7579_s18 + $0x73] sm:$0x1] %vm1070_vm8, %v3086_v37  ;;  %v3153_v18 = vcombine.high %v3145_v47, %v3145_v47  ;;  %v3161_v21 = vrot.slane %v3145_v47, %v7567_v39  ;;  %v3096_v29 = vrot.slane %v2985_v25, %v7567_v39  ;;  %v3971_v36 = vld [vmem:[%s7339_s30 + $0xb] sm:$0x1] }
 0x4ed   : > { %3222 = vst.msk [vmem:[%s7579_s18 + $0x1b] sm:$0x1] %vm1070_vm8, %v3038_v46  ;;  %3224 = vst.msk [vmem:[%s7579_s18 + $0x2b] sm:$0x1] %vm1070_vm8, %v3035_v44  ;;  %v3154_v23 = vcombine.high %v3152_v2, %v3152_v2  ;;  %v3168_v24 = vrot.slane %v3152_v2, %v7567_v39  ;;  %v3103_v33 = vrot.slane %v3089_v28, %v7567_v39  ;;  %v3974_v37 = vld [vmem:[%s7339_s30 + $0x3b] sm:$0x1] }
 0x4ee   : > { %3225 = vst.msk [vmem:[%s7579_s18 + $0x33] sm:$0x1] %vm1070_vm8, %v3037_v45  ;;  %3234 = vst.msk [vmem:[%s7579_s18 + $0x7b] sm:$0x1] %vm1070_vm8, %v3088_v48  ;;  %v3175_v26 = vrot.slane %v3153_v18, %v7567_v39  ;;  %v3183_v27 = vcombine.high %v3161_v21, %v3161_v21  ;;  %v3104_v34 = vcombine.high %v3096_v29, %v3096_v29  ;;  %v3981_v40 = vrot.slane %v3973_v15, 6 }
 0x4ef   : > { %3226 = vst.msk [vmem:[%s7579_s18 + $0x3b] sm:$0x1] %vm1070_vm8, %v3039_v0  ;;  %3243 = vst.msk [vmem:[%s7579_s18 + $0xc3] sm:$0x1] %vm1070_vm8, %v3161_v21  ;;  %v3182_v30 = vrot.slane %v3154_v23, %v7567_v39  ;;  %v3184_v32 = vcombine.high %v3168_v24, %v3168_v24  ;;  %v3112_v35 = vrot.slane %v3096_v29, %v7567_v39  ;;  %v3968_v46 = vld [vmem:[%s7339_s30 + $0x1a] sm:$0x1] }
 0x4f0   : > { %3247 = vst.msk [vmem:[%s7579_s18 + $0xe3] sm:$0x1] %vm1070_vm8, %v3168_v24  ;;  %v3185_v31 = vcombine.high %v3175_v26, %v3175_v26  ;;  %3244 = vst.msk [vmem:[%s7579_s18 + $0xcb] sm:$0x1] %vm1070_vm8, %v3175_v26  ;;  %v3105_v5 = vcombine.high %v3103_v33, %v3103_v33  ;;  %v3119_v6 = vrot.slane %v3103_v33, %v7567_v39  ;;  %v3983_v47 = vrot.slane %v3974_v37, 5 }
 0x4f1   : > { %3245 = vst.msk [vmem:[%s7579_s18 + $0xd3] sm:$0x1] %vm1070_vm8, %v3183_v27  ;;  %v3186_v3 = vcombine.high %v3182_v30, %v3182_v30  ;;  %3248 = vst.msk [vmem:[%s7579_s18 + $0xeb] sm:$0x1] %vm1070_vm8, %v3182_v30  ;;  %v3126_v7 = vrot.slane %v3104_v34, %v7567_v39  ;;  %v3134_v8 = vcombine.high %v3112_v35, %v3112_v35  ;;  %v3969_v4 = vld [vmem:[%s7339_s30 + $0x2a] sm:$0x1] }
 0x4f2   : > { %3249 = vst.msk [vmem:[%s7579_s18 + $0xf3] sm:$0x1] %vm1070_vm8, %v3184_v32  ;;  %3246 = vst.msk [vmem:[%s7579_s18 + $0xdb] sm:$0x1] %vm1070_vm8, %v3185_v31  ;;  %v3133_v10 = vrot.slane %v3105_v5, %v7567_v39  ;;  %v3135_v11 = vcombine.high %v3119_v6, %v3119_v6  ;;  %v3980_v44 = vsel %vm325_vm1, %v3979_v19, %v3971_v36  ;;  %v4096_v0 = vrot.slane %v3968_v46, 7 }
 0x4f3   : > { %3235 = vst.msk [vmem:[%s7579_s18 + $0x83] sm:$0x1] %vm1070_vm8, %v3112_v35  ;;  %3250 = vst.msk [vmem:[%s7579_s18 + $0xfb] sm:$0x1] %vm1070_vm8, %v3186_v3  ;;  %v3136_v13 = vcombine.high %v3126_v7, %v3126_v7  ;;  %v3982_v48 = vsel %vm328_vm2, %v3981_v40, %v3980_v44  ;;  %v3967_v21 = vld [vmem:[%s7339_s30 + $0xa] sm:$0x1] }
 0x4f4   : > { %3236 = vst.msk [vmem:[%s7579_s18 + $0x8b] sm:$0x1] %vm1070_vm8, %v3126_v7  ;;  %3237 = vst.msk [vmem:[%s7579_s18 + $0x93] sm:$0x1] %vm1070_vm8, %v3134_v8  ;;  %v6869_v14 = vpop.f32.mrb[24].mxu0  ;;  %v3137_v20 = vcombine.high %v3133_v10, %v3133_v10  ;;  %v3984_v23 = vsel %vm331_vm3, %v3983_v47, %v3982_v48  ;;  %v4098_v25 = vrot.slane %v3969_v4, 6  ;;  %v4097_v27 = vsel %vm325_vm1, %v4096_v0, %v3967_v21 }
 0x4f5   : > { %3239 = vst.msk [vmem:[%s7579_s18 + $0xa3] sm:$0x1] %vm1070_vm8, %v3119_v6  ;;  %3238 = vst.msk [vmem:[%s7579_s18 + $0x9b] sm:$0x1] %vm1070_vm8, %v3136_v13  ;;  %v3454_v22 = vpop.f32.mrb[25].mxu0 }
 0x4f6   : > { %3240 = vst.msk [vmem:[%s7579_s18 + $0xab] sm:$0x1] %vm1070_vm8, %v3133_v10  ;;  %3241 = vst.msk [vmem:[%s7579_s18 + $0xb3] sm:$0x1] %vm1070_vm8, %v3135_v11  ;;  %v3970_v24 = vld [vmem:[%s7339_s30 + $0x3a] sm:$0x1]  ;;  %v4099_v30 = vsel %vm328_vm2, %v4098_v25, %v4097_v27 }
 0x4f7   : > { %3242 = vst.msk [vmem:[%s7579_s18 + $0xbb] sm:$0x1] %vm1070_vm8, %v3137_v20  ;;  %v4100_v29 = vrot.slane %v3970_v24, 5 }
 0x4f8   : > { %v6872_v43 = vpop.f32.mrb[26].mxu0 }
 0x4f9   : > { %v3464_v45 = vpop.f32.mrb[27].mxu0  ;;  %v4101_v32 = vsel %vm331_vm3, %v4100_v29, %v4099_v30 }
 0x4fc   : > { %v6875_v2 = vpop.f32.mrb[28].mxu0 }
 0x4fd   : > { %v3474_v18 = vpop.f32.mrb[29].mxu0 }
 0x4fe   : > { %6883 = vmatprep.mubr.msk.f32.mxu1 %vm607_vm5, %v3474_v18 }
 0x4ff   : > { %6884 = vmatmul.mubr.msk.f32.vlgmr.msra.gmra.mrb[24].mxu1 %vm607_vm5, %v6875_v2 }
 0x500   : > { %v6878_v26 = vpop.f32.mrb[30].mxu0  ;;  %7082 = vmatpush3.bf16.msra.mxu1 %v7482_v41 }
 0x501   : > { %v3484_v28 = vpop.f32.mrb[31].mxu0  ;;  %6899 = vmatprep.subr.msk.mxu1 %vm358_vm4, %v3984_v23 }
 0x502   : > { %6886 = vmatprep.mubr.msk.f32.mxu1 %vm607_vm5, %v3484_v28 }
 0x503   : > { %6887 = vmatmul.mubr.msk.f32.gmra.mrb[26].mxu1 %vm607_vm5, %v6878_v26 }
 0x504   : > { %6893 = vmatprep.mubr.msk.f32.mxu1 %vm607_vm5, %v3454_v22 }
 0x507   : > { %6894 = vmatmul.mubr.msk.f32.vlgmr.msra.gmra.mrb[24].mxu1 %vm607_vm5, %v6869_v14 }
 0x508   : > { %6896 = vmatprep.mubr.msk.f32.mxu1 %vm607_vm5, %v3464_v45  ;;  %6900 = vmatpush3.msk.msra.mxu1 %vm358_vm4, %v3984_v23 }
 0x509   : > { %6913 = vmatprep.subr.msk.mxu1 %vm358_vm4, %v4101_v32 }
 0x50b   : > { %6897 = vmatmul.mubr.msk.f32.gmra.mrb[26].mxu1 %vm607_vm5, %v6872_v43 }
 0x50c   : > { %6901 = vmatprep.mubr.msk.f32.mxu1 %vm333_vm0, %v8008_v49 }
 0x50f   : > { %6902 = vmatmul.mubr.msk.f32.vlgmr.msra.gmra.mrb[28].mxu1 %vm333_vm0, %v8015_v50 }
 0x510   : > { %6914 = vmatpush3.msk.msra.mxu1 %vm358_vm4, %v4101_v32  ;;  %6904 = vmatprep.mubr.msk.f32.mxu1 %vm333_vm0, %v8023_v51 }
 0x511   : > { %7092 = vmatprep.subr.bf16.mxu1 %v7470_v38 }
 0x513   : > { %6905 = vmatmul.mubr.msk.f32.gmra.mrb[30].mxu1 %vm333_vm0, %v8031_v53 }
 0x514   : > { %6907 = vmatprep.mubr.msk.f32.mxu1 %vm333_vm0, %v8038_v52 }
 0x517   : > { %6908 = vmatmul.mubr.msk.f32.gmra.mrb[32].mxu1 %vm333_vm0, %v8045_v54 }
 0x518   : > { %6910 = vmatprep.mubr.msk.f32.mxu1 %vm333_vm0, %v8052_v55 }
 0x51b   : > { %6911 = vmatmul.mubr.msk.f32.gmra.mrb[34].mxu1 %vm333_vm0, %v8059_v56 }
 0x51c   : > { %6915 = vmatprep.mubr.msk.f32.mxu1 %vm333_vm0, %v8066_v57 }
 0x51f   : > { %6916 = vmatmul.mubr.msk.f32.vlgmr.msra.gmra.mrb[28].mxu1 %vm333_vm0, %v8073_v58 }
 0x520   : > { %6918 = vmatprep.mubr.msk.f32.mxu1 %vm333_vm0, %v8080_v59  ;;  %7094 = vmatpush3.bf16.msra.mxu1 %v7470_v38 }
 0x521   : > { %7096 = vmatprep.subr.bf16.mxu1 %v7482_v41 }
 0x523   : > { %6919 = vmatmul.mubr.msk.f32.gmra.mrb[30].mxu1 %vm333_vm0, %v8089_v60 }
 0x524   : > { %6921 = vmatprep.mubr.msk.f32.mxu1 %vm333_vm0, %v8096_v61 }
 0x527   : > { %6922 = vmatmul.mubr.msk.f32.gmra.mrb[32].mxu1 %vm333_vm0, %v8103_v62 }
 0x528   : > { %6924 = vmatprep.mubr.msk.f32.mxu1 %vm333_vm0, %v8110_v63 }
 0x52b   : > { %6925 = vmatmul.mubr.msk.f32.gmra.mrb[34].mxu1 %vm333_vm0, %v8117_v1 }
 0x5da   : > { %v6895_v31 = vpop.f32.mrb[24].mxu1 }
 0x5db   : > { %v3688_v33 = vadd.f32 %v6895_v31, %v7564_v17  ;;  %v3668_v34 = vpop.f32.mrb[25].mxu1 }
 0x5dc   : > { %v3687_v35 = vadd.f32 %v3668_v34, %v7560_v12 }
 0x5dd   : > { %vm3692_vm14 = vcmp.ge.f32.partialorder %v3688_v33, 0.0  ;;  %v3696_v3 = vmul.f32 0.01, %v3688_v33 }
 0x5de   : > { %vm3691_vm15 = vcmp.ge.f32.partialorder %v3687_v35, 0.0  ;;  %v3695_v5 = vmul.f32 0.01, %v3687_v35  ;;  %v6898_v6 = vpop.f32.mrb[26].mxu1 }
 0x5df   : > { %v3700_v7 = vsel %vm3692_vm14, %v3688_v33, %v3696_v3  ;;  %v3690_v8 = vadd.f32 %v6898_v6, %v7570_v42  ;;  %v3678_v9 = vpop.f32.mrb[27].mxu1 }
 0x5e0   : > { %v3756_v10 = vcombine.high %v3700_v7, %v3700_v7  ;;  %v3763_v11 = vrot.slane %v3700_v7, %v7567_v39  ;;  %v3699_v13 = vsel %vm3691_vm15, %v3687_v35, %v3695_v5  ;;  %v3689_v14 = vadd.f32 %v3678_v9, %v7562_v16 }
 0x5e1   : > { %v3707_v15 = vcombine.high %v3699_v13, %v3699_v13  ;;  %v3714_v19 = vrot.slane %v3699_v13, %v7567_v39  ;;  %vm3694_vm6 = vcmp.ge.f32.partialorder %v3690_v8, 0.0  ;;  %v3698_v20 = vmul.f32 0.01, %v3690_v8 }
 0x5e2   : > { %v3770_v22 = vrot.slane %v3756_v10, %v7567_v39  ;;  %v3771_v36 = vcombine.high %v3763_v11, %v3763_v11  ;;  %v3779_v37 = vrot.slane %v3763_v11, %v7567_v39  ;;  %vm3693_vm7 = vcmp.ge.f32.partialorder %v3689_v14, 0.0 }
 0x5e3   : > { %v3721_v40 = vrot.slane %v3707_v15, %v7567_v39  ;;  %v3722_v43 = vcombine.high %v3714_v19, %v3714_v19  ;;  %v3730_v44 = vrot.slane %v3714_v19, %v7567_v39  ;;  %v3702_v45 = vsel %vm3694_vm6, %v3690_v8, %v3698_v20 }
 0x5e4   : > { %v3772_v46 = vcombine.high %v3770_v22, %v3770_v22  ;;  %v3786_v47 = vrot.slane %v3770_v22, %v7567_v39  ;;  %v3793_v48 = vrot.slane %v3771_v36, %v7567_v39  ;;  %v3801_v2 = vcombine.high %v3779_v37, %v3779_v37  ;;  %3943 = vst.msk [vmem:[%s7579_s18 + $0x44] sm:$0x1] %vm1070_vm8, %v3779_v37 }
 0x5e5   : > { %v3723_v4 = vcombine.high %v3721_v40, %v3721_v40  ;;  %v3737_v0 = vrot.slane %v3721_v40, %v7567_v39  ;;  %v3744_v18 = vrot.slane %v3722_v43, %v7567_v39  ;;  %v3752_v21 = vcombine.high %v3730_v44, %v3730_v44  ;;  %3935 = vst.msk [vmem:[%s7579_s18 + $0x4] sm:$0x1] %vm1070_vm8, %v3730_v44 }
 0x5e6   : > { %v3800_v23 = vrot.slane %v3772_v46, %v7567_v39  ;;  %v3802_v24 = vcombine.high %v3786_v47, %v3786_v47  ;;  %v3803_v25 = vcombine.high %v3793_v48, %v3793_v48  ;;  %3944 = vst.msk [vmem:[%s7579_s18 + $0x4c] sm:$0x1] %vm1070_vm8, %v3793_v48  ;;  %3945 = vst.msk [vmem:[%s7579_s18 + $0x54] sm:$0x1] %vm1070_vm8, %v3801_v2  ;;  %v3697_v33 = vmul.f32 0.01, %v3689_v14 }
 0x5e7   : > { %3947 = vst.msk [vmem:[%s7579_s18 + $0x64] sm:$0x1] %vm1070_vm8, %v3786_v47  ;;  %v3854_v26 = vcombine.high %v3702_v45, %v3702_v45  ;;  %v3751_v27 = vrot.slane %v3723_v4, %v7567_v39  ;;  %v3753_v28 = vcombine.high %v3737_v0, %v3737_v0  ;;  %v3754_v29 = vcombine.high %v3744_v18, %v3744_v18  ;;  %v4689_v4 = vld [vmem:[%s7339_s30 + $0x2d] sm:$0x1] }
 0x5e8   : > { %3936 = vst.msk [vmem:[%s7579_s18 + $0xc] sm:$0x1] %vm1070_vm8, %v3744_v18  ;;  %3937 = vst.msk [vmem:[%s7579_s18 + $0x14] sm:$0x1] %vm1070_vm8, %v3752_v21  ;;  %v3861_v30 = vrot.slane %v3702_v45, %v7567_v39  ;;  %v3804_v32 = vcombine.high %v3800_v23, %v3800_v23  ;;  %v3701_v7 = vsel %vm3693_vm7, %v3689_v14, %v3697_v33  ;;  %v4688_v45 = vld [vmem:[%s7339_s30 + $0x1d] sm:$0x1] }
 0x5e9   : > { %3939 = vst.msk [vmem:[%s7579_s18 + $0x24] sm:$0x1] %vm1070_vm8, %v3737_v0  ;;  %3946 = vst.msk [vmem:[%s7579_s18 + $0x5c] sm:$0x1] %vm1070_vm8, %v3803_v25  ;;  %v3868_v31 = vrot.slane %v3854_v26, %v7567_v39  ;;  %v3755_v34 = vcombine.high %v3751_v27, %v3751_v27  ;;  %v3805_v10 = vcombine.high %v3701_v7, %v3701_v7  ;;  %v4695_v0 = vrot.slane %v4688_v45, 7 }
 0x5ea   : > { %3948 = vst.msk [vmem:[%s7579_s18 + $0x6c] sm:$0x1] %vm1070_vm8, %v3800_v23  ;;  %3949 = vst.msk [vmem:[%s7579_s18 + $0x74] sm:$0x1] %vm1070_vm8, %v3802_v24  ;;  %v3869_v35 = vcombine.high %v3861_v30, %v3861_v30  ;;  %v3877_v3 = vrot.slane %v3861_v30, %v7567_v39  ;;  %v3812_v11 = vrot.slane %v3701_v7, %v7567_v39  ;;  %v4687_v23 = vld [vmem:[%s7339_s30 + $0xd] sm:$0x1] }
 0x5eb   : > { %3938 = vst.msk [vmem:[%s7579_s18 + $0x1c] sm:$0x1] %vm1070_vm8, %v3754_v29  ;;  %3940 = vst.msk [vmem:[%s7579_s18 + $0x2c] sm:$0x1] %vm1070_vm8, %v3751_v27  ;;  %v3870_v5 = vcombine.high %v3868_v31, %v3868_v31  ;;  %v3884_v6 = vrot.slane %v3868_v31, %v7567_v39  ;;  %v3819_v19 = vrot.slane %v3805_v10, %v7567_v39  ;;  %v4690_v24 = vld [vmem:[%s7339_s30 + $0x3d] sm:$0x1] }
 0x5ec   : > { %3941 = vst.msk [vmem:[%s7579_s18 + $0x34] sm:$0x1] %vm1070_vm8, %v3753_v28  ;;  %3950 = vst.msk [vmem:[%s7579_s18 + $0x7c] sm:$0x1] %vm1070_vm8, %v3804_v32  ;;  %v3891_v8 = vrot.slane %v3869_v35, %v7567_v39  ;;  %v3899_v9 = vcombine.high %v3877_v3, %v3877_v3  ;;  %v3820_v20 = vcombine.high %v3812_v11, %v3812_v11  ;;  %v4697_v25 = vrot.slane %v4689_v4, 6 }
 0x5ed   : > { %3942 = vst.msk [vmem:[%s7579_s18 + $0x3c] sm:$0x1] %vm1070_vm8, %v3755_v34  ;;  %3959 = vst.msk [vmem:[%s7579_s18 + $0xc4] sm:$0x1] %vm1070_vm8, %v3877_v3  ;;  %v3898_v13 = vrot.slane %v3870_v5, %v7567_v39  ;;  %v3900_v15 = vcombine.high %v3884_v6, %v3884_v6  ;;  %v3828_v22 = vrot.slane %v3812_v11, %v7567_v39  ;;  %v4684_v29 = vld [vmem:[%s7339_s30 + $0x1c] sm:$0x1] }
 0x5ee   : > { %3963 = vst.msk [vmem:[%s7579_s18 + $0xe4] sm:$0x1] %vm1070_vm8, %v3884_v6  ;;  %v3901_v14 = vcombine.high %v3891_v8, %v3891_v8  ;;  %3960 = vst.msk [vmem:[%s7579_s18 + $0xcc] sm:$0x1] %vm1070_vm8, %v3891_v8  ;;  %v3821_v37 = vcombine.high %v3819_v19, %v3819_v19  ;;  %v3835_v40 = vrot.slane %v3819_v19, %v7567_v39  ;;  %v4699_v30 = vrot.slane %v4690_v24, 5 }
 0x5ef   : > { %3961 = vst.msk [vmem:[%s7579_s18 + $0xd4] sm:$0x1] %vm1070_vm8, %v3899_v9  ;;  %v3902_v36 = vcombine.high %v3898_v13, %v3898_v13  ;;  %3964 = vst.msk [vmem:[%s7579_s18 + $0xec] sm:$0x1] %vm1070_vm8, %v3898_v13  ;;  %v3842_v43 = vrot.slane %v3820_v20, %v7567_v39  ;;  %v3850_v44 = vcombine.high %v3828_v22, %v3828_v22  ;;  %v4685_v33 = vld [vmem:[%s7339_s30 + $0x2c] sm:$0x1] }
 0x5f0   : > { %3965 = vst.msk [vmem:[%s7579_s18 + $0xf4] sm:$0x1] %vm1070_vm8, %v3900_v15  ;;  %3962 = vst.msk [vmem:[%s7579_s18 + $0xdc] sm:$0x1] %vm1070_vm8, %v3901_v14  ;;  %v3849_v46 = vrot.slane %v3821_v37, %v7567_v39  ;;  %v3851_v47 = vcombine.high %v3835_v40, %v3835_v40  ;;  %v4696_v27 = vsel %vm325_vm1, %v4695_v0, %v4687_v23  ;;  %v4812_v34 = vrot.slane %v4684_v29, 7 }
 0x5f1   : > { %3951 = vst.msk [vmem:[%s7579_s18 + $0x84] sm:$0x1] %vm1070_vm8, %v3828_v22  ;;  %3966 = vst.msk [vmem:[%s7579_s18 + $0xfc] sm:$0x1] %vm1070_vm8, %v3902_v36  ;;  %v3852_v48 = vcombine.high %v3842_v43, %v3842_v43  ;;  %v4698_v32 = vsel %vm328_vm2, %v4697_v25, %v4696_v27  ;;  %v4683_v3 = vld [vmem:[%s7339_s30 + $0xc] sm:$0x1] }
 0x5f2   : > { %3952 = vst.msk [vmem:[%s7579_s18 + $0x8c] sm:$0x1] %vm1070_vm8, %v3842_v43  ;;  %3953 = vst.msk [vmem:[%s7579_s18 + $0x94] sm:$0x1] %vm1070_vm8, %v3850_v44  ;;  %v6917_v2 = vpop.f32.mrb[28].mxu1  ;;  %v3853_v18 = vcombine.high %v3849_v46, %v3849_v46  ;;  %v4700_v5 = vsel %vm331_vm3, %v4699_v30, %v4698_v32  ;;  %v4814_v7 = vrot.slane %v4685_v33, 6  ;;  %v4813_v9 = vsel %vm325_vm1, %v4812_v34, %v4683_v3 }
 0x5f3   : > { %3955 = vst.msk [vmem:[%s7579_s18 + $0xa4] sm:$0x1] %vm1070_vm8, %v3835_v40  ;;  %3954 = vst.msk [vmem:[%s7579_s18 + $0x9c] sm:$0x1] %vm1070_vm8, %v3852_v48  ;;  %v4170_v21 = vpop.f32.mrb[29].mxu1 }
 0x5f4   : > { %3956 = vst.msk [vmem:[%s7579_s18 + $0xac] sm:$0x1] %vm1070_vm8, %v3849_v46  ;;  %3957 = vst.msk [vmem:[%s7579_s18 + $0xb4] sm:$0x1] %vm1070_vm8, %v3851_v47  ;;  %v4686_v6 = vld [vmem:[%s7339_s30 + $0x3c] sm:$0x1]  ;;  %v4815_v13 = vsel %vm328_vm2, %v4814_v7, %v4813_v9 }
 0x5f5   : > { %3958 = vst.msk [vmem:[%s7579_s18 + $0xbc] sm:$0x1] %vm1070_vm8, %v3853_v18  ;;  %v4816_v11 = vrot.slane %v4686_v6, 5 }
 0x5f6   : > { %v6920_v26 = vpop.f32.mrb[30].mxu1 }
 0x5f7   : > { %v4180_v28 = vpop.f32.mrb[31].mxu1  ;;  %v4817_v15 = vsel %vm331_vm3, %v4816_v11, %v4815_v13 }
 0x5fa   : > { %v6923_v31 = vpop.f32.mrb[32].mxu1 }
 0x5fb   : > { %v4190_v35 = vpop.f32.mrb[33].mxu1 }
 0x5fc   : > { %6931 = vmatprep.mubr.msk.f32.mxu0 %vm607_vm5, %v4190_v35 }
 0x5fd   : > { %6932 = vmatmul.mubr.msk.f32.vlgmr.msra.gmra.mrb[32].mxu0 %vm607_vm5, %v6923_v31 }
 0x5fe   : > { %v6926_v8 = vpop.f32.mrb[34].mxu1  ;;  %7090 = vmatpush3.bf16.msra.mxu0 %v7482_v41 }
 0x5ff   : > { %v4200_v10 = vpop.f32.mrb[35].mxu1  ;;  %6947 = vmatprep.subr.msk.mxu0 %vm358_vm4, %v4700_v5 }
 0x600   : > { %6934 = vmatprep.mubr.msk.f32.mxu0 %vm607_vm5, %v4200_v10 }
 0x601   : > { %6935 = vmatmul.mubr.msk.f32.gmra.mrb[34].mxu0 %vm607_vm5, %v6926_v8 }
 0x602   : > { %6941 = vmatprep.mubr.msk.f32.mxu0 %vm607_vm5, %v4170_v21 }
 0x605   : > { %6942 = vmatmul.mubr.msk.f32.vlgmr.msra.gmra.mrb[32].mxu0 %vm607_vm5, %v6917_v2 }
 0x606   : > { %6944 = vmatprep.mubr.msk.f32.mxu0 %vm607_vm5, %v4180_v28  ;;  %6948 = vmatpush3.msk.msra.mxu0 %vm358_vm4, %v4700_v5 }
 0x607   : > { %6961 = vmatprep.subr.msk.mxu0 %vm358_vm4, %v4817_v15 }
 0x609   : > { %6945 = vmatmul.mubr.msk.f32.gmra.mrb[34].mxu0 %vm607_vm5, %v6920_v26 }
 0x60a   : > { %6949 = vmatprep.mubr.msk.f32.mxu0 %vm333_vm0, %v8008_v49 }
 0x60d   : > { %6950 = vmatmul.mubr.msk.f32.vlgmr.msra.gmra.mrb[36].mxu0 %vm333_vm0, %v8015_v50 }
 0x60e   : > { %6962 = vmatpush3.msk.msra.mxu0 %vm358_vm4, %v4817_v15  ;;  %6952 = vmatprep.mubr.msk.f32.mxu0 %vm333_vm0, %v8023_v51 }
 0x60f   : > { %7100 = vmatprep.subr.bf16.mxu0 %v7470_v38 }
 0x611   : > { %6953 = vmatmul.mubr.msk.f32.gmra.mrb[38].mxu0 %vm333_vm0, %v8031_v53 }
 0x612   : > { %6955 = vmatprep.mubr.msk.f32.mxu0 %vm333_vm0, %v8038_v52 }
 0x615   : > { %6956 = vmatmul.mubr.msk.f32.gmra.mrb[40].mxu0 %vm333_vm0, %v8045_v54 }
 0x616   : > { %6958 = vmatprep.mubr.msk.f32.mxu0 %vm333_vm0, %v8052_v55 }
 0x619   : > { %6959 = vmatmul.mubr.msk.f32.gmra.mrb[42].mxu0 %vm333_vm0, %v8059_v56 }
 0x61a   : > { %6963 = vmatprep.mubr.msk.f32.mxu0 %vm333_vm0, %v8066_v57 }
 0x61d   : > { %6964 = vmatmul.mubr.msk.f32.vlgmr.msra.gmra.mrb[36].mxu0 %vm333_vm0, %v8073_v58 }
 0x61e   : > { %6966 = vmatprep.mubr.msk.f32.mxu0 %vm333_vm0, %v8080_v59  ;;  %7102 = vmatpush3.bf16.msra.mxu0 %v7470_v38 }
 0x61f   : > { %7104 = vmatprep.subr.bf16.mxu0 %v7482_v41 }
 0x621   : > { %6967 = vmatmul.mubr.msk.f32.gmra.mrb[38].mxu0 %vm333_vm0, %v8089_v60 }
 0x622   : > { %6969 = vmatprep.mubr.msk.f32.mxu0 %vm333_vm0, %v8096_v61 }
 0x625   : > { %6970 = vmatmul.mubr.msk.f32.gmra.mrb[40].mxu0 %vm333_vm0, %v8103_v62 }
 0x626   : > { %6972 = vmatprep.mubr.msk.f32.mxu0 %vm333_vm0, %v8110_v63 }
 0x629   : > { %6973 = vmatmul.mubr.msk.f32.gmra.mrb[42].mxu0 %vm333_vm0, %v8117_v1 }
 0x6d8   : > { %v6943_v14 = vpop.f32.mrb[32].mxu0 }
 0x6d9   : > { %v4404_v38 = vadd.f32 %v6943_v14, %v7564_v17  ;;  %v4384_v19 = vpop.f32.mrb[33].mxu0 }
 0x6da   : > { %v4403_v20 = vadd.f32 %v4384_v19, %v7560_v12 }
 0x6db   : > { %vm4408_vm9 = vcmp.ge.f32.partialorder %v4404_v38, 0.0  ;;  %v4412_v22 = vmul.f32 0.01, %v4404_v38 }
 0x6dc   : > { %vm4407_vm10 = vcmp.ge.f32.partialorder %v4403_v20, 0.0  ;;  %v4411_v36 = vmul.f32 0.01, %v4403_v20  ;;  %v6946_v37 = vpop.f32.mrb[34].mxu0 }
 0x6dd   : > { %v4416_v40 = vsel %vm4408_vm9, %v4404_v38, %v4412_v22  ;;  %v4406_v43 = vadd.f32 %v6946_v37, %v7570_v42  ;;  %v4394_v44 = vpop.f32.mrb[35].mxu0 }
 0x6de   : > { %v4472_v45 = vcombine.high %v4416_v40, %v4416_v40  ;;  %v4479_v46 = vrot.slane %v4416_v40, %v7567_v39  ;;  %v4415_v47 = vsel %vm4407_vm10, %v4403_v20, %v4411_v36  ;;  %v4405_v48 = vadd.f32 %v4394_v44, %v7562_v16 }
 0x6df   : > { %v4423_v2 = vcombine.high %v4415_v47, %v4415_v47  ;;  %v4430_v4 = vrot.slane %v4415_v47, %v7567_v39  ;;  %vm4410_vm11 = vcmp.ge.f32.partialorder %v4406_v43, 0.0  ;;  %v4414_v0 = vmul.f32 0.01, %v4406_v43 }
 0x6e0   : > { %v4486_v18 = vrot.slane %v4472_v45, %v7567_v39  ;;  %v4487_v21 = vcombine.high %v4479_v46, %v4479_v46  ;;  %v4495_v23 = vrot.slane %v4479_v46, %v7567_v39  ;;  %vm4409_vm12 = vcmp.ge.f32.partialorder %v4405_v48, 0.0 }
 0x6e1   : > { %v4437_v24 = vrot.slane %v4423_v2, %v7567_v39  ;;  %v4438_v25 = vcombine.high %v4430_v4, %v4430_v4  ;;  %v4446_v26 = vrot.slane %v4430_v4, %v7567_v39  ;;  %v4418_v27 = vsel %vm4410_vm11, %v4406_v43, %v4414_v0 }
 0x6e2   : > { %v4488_v28 = vcombine.high %v4486_v18, %v4486_v18  ;;  %v4502_v29 = vrot.slane %v4486_v18, %v7567_v39  ;;  %v4509_v30 = vrot.slane %v4487_v21, %v7567_v39  ;;  %v4517_v32 = vcombine.high %v4495_v23, %v4495_v23  ;;  %4659 = vst.msk [vmem:[%s7579_s18 + $0x45] sm:$0x1] %vm1070_vm8, %v4495_v23 }
 0x6e3   : > { %v4439_v31 = vcombine.high %v4437_v24, %v4437_v24  ;;  %v4453_v33 = vrot.slane %v4437_v24, %v7567_v39  ;;  %v4460_v34 = vrot.slane %v4438_v25, %v7567_v39  ;;  %v4468_v35 = vcombine.high %v4446_v26, %v4446_v26  ;;  %4651 = vst.msk [vmem:[%s7579_s18 + $0x5] sm:$0x1] %vm1070_vm8, %v4446_v26  ;;  %v5404_v26 = vld [vmem:[%s7339_s30 + $0x1f] sm:$0x1] }
 0x6e4   : > { %v4516_v3 = vrot.slane %v4488_v28, %v7567_v39  ;;  %v4518_v5 = vcombine.high %v4502_v29, %v4502_v29  ;;  %v4519_v6 = vcombine.high %v4509_v30, %v4509_v30  ;;  %4660 = vst.msk [vmem:[%s7579_s18 + $0x4d] sm:$0x1] %vm1070_vm8, %v4509_v30  ;;  %4661 = vst.msk [vmem:[%s7579_s18 + $0x55] sm:$0x1] %vm1070_vm8, %v4517_v32  ;;  %v4413_v14 = vmul.f32 0.01, %v4405_v48 }
 0x6e5   : > { %4663 = vst.msk [vmem:[%s7579_s18 + $0x65] sm:$0x1] %vm1070_vm8, %v4502_v29  ;;  %v4570_v7 = vcombine.high %v4418_v27, %v4418_v27  ;;  %v4467_v8 = vrot.slane %v4439_v31, %v7567_v39  ;;  %v4469_v9 = vcombine.high %v4453_v33, %v4453_v33  ;;  %v4470_v10 = vcombine.high %v4460_v34, %v4460_v34  ;;  %v5405_v32 = vld [vmem:[%s7339_s30 + $0x2f] sm:$0x1] }
 0x6e6   : > { %4652 = vst.msk [vmem:[%s7579_s18 + $0xd] sm:$0x1] %vm1070_vm8, %v4460_v34  ;;  %4653 = vst.msk [vmem:[%s7579_s18 + $0x15] sm:$0x1] %vm1070_vm8, %v4468_v35  ;;  %v4577_v11 = vrot.slane %v4418_v27, %v7567_v39  ;;  %v4520_v13 = vcombine.high %v4516_v3, %v4516_v3  ;;  %v4417_v37 = vsel %vm4409_vm12, %v4405_v48, %v4413_v14  ;;  %v5411_v31 = vrot.slane %v5404_v26, 7 }
 0x6e7   : > { %4655 = vst.msk [vmem:[%s7579_s18 + $0x25] sm:$0x1] %vm1070_vm8, %v4453_v33  ;;  %4662 = vst.msk [vmem:[%s7579_s18 + $0x5d] sm:$0x1] %vm1070_vm8, %v4519_v6  ;;  %v4584_v15 = vrot.slane %v4570_v7, %v7567_v39  ;;  %v4471_v38 = vcombine.high %v4467_v8, %v4467_v8  ;;  %v4521_v44 = vcombine.high %v4417_v37, %v4417_v37  ;;  %v5403_v35 = vld [vmem:[%s7339_s30 + $0xf] sm:$0x1] }
 0x6e8   : > { %4664 = vst.msk [vmem:[%s7579_s18 + $0x6d] sm:$0x1] %vm1070_vm8, %v4516_v3  ;;  %4665 = vst.msk [vmem:[%s7579_s18 + $0x75] sm:$0x1] %vm1070_vm8, %v4518_v5  ;;  %v4585_v19 = vcombine.high %v4577_v11, %v4577_v11  ;;  %v4593_v20 = vrot.slane %v4577_v11, %v7567_v39  ;;  %v4528_v45 = vrot.slane %v4417_v37, %v7567_v39  ;;  %v5406_v3 = vld [vmem:[%s7339_s30 + $0x3f] sm:$0x1] }
 0x6e9   : > { %4654 = vst.msk [vmem:[%s7579_s18 + $0x1d] sm:$0x1] %vm1070_vm8, %v4470_v10  ;;  %4656 = vst.msk [vmem:[%s7579_s18 + $0x2d] sm:$0x1] %vm1070_vm8, %v4467_v8  ;;  %v4586_v22 = vcombine.high %v4584_v15, %v4584_v15  ;;  %v4600_v36 = vrot.slane %v4584_v15, %v7567_v39  ;;  %v4535_v2 = vrot.slane %v4521_v44, %v7567_v39  ;;  %v5413_v5 = vrot.slane %v5405_v32, 6 }
 0x6ea   : > { %4657 = vst.msk [vmem:[%s7579_s18 + $0x35] sm:$0x1] %vm1070_vm8, %v4469_v9  ;;  %4666 = vst.msk [vmem:[%s7579_s18 + $0x7d] sm:$0x1] %vm1070_vm8, %v4520_v13  ;;  %v4607_v40 = vrot.slane %v4585_v19, %v7567_v39  ;;  %v4615_v43 = vcombine.high %v4593_v20, %v4593_v20  ;;  %v4536_v4 = vcombine.high %v4528_v45, %v4528_v45  ;;  %v5400_v9 = vld [vmem:[%s7339_s30 + $0x1e] sm:$0x1] }
 0x6eb   : > { %4658 = vst.msk [vmem:[%s7579_s18 + $0x3d] sm:$0x1] %vm1070_vm8, %v4471_v38  ;;  %4675 = vst.msk [vmem:[%s7579_s18 + $0xc5] sm:$0x1] %vm1070_vm8, %v4593_v20  ;;  %v4614_v46 = vrot.slane %v4586_v22, %v7567_v39  ;;  %v4616_v47 = vcombine.high %v4600_v36, %v4600_v36  ;;  %v4544_v0 = vrot.slane %v4528_v45, %v7567_v39  ;;  %v5415_v10 = vrot.slane %v5406_v3, 5 }
 0x6ec   : > { %4679 = vst.msk [vmem:[%s7579_s18 + $0xe5] sm:$0x1] %vm1070_vm8, %v4600_v36  ;;  %v4617_v48 = vcombine.high %v4607_v40, %v4607_v40  ;;  %4676 = vst.msk [vmem:[%s7579_s18 + $0xcd] sm:$0x1] %vm1070_vm8, %v4607_v40  ;;  %v4537_v21 = vcombine.high %v4535_v2, %v4535_v2  ;;  %v4551_v23 = vrot.slane %v4535_v2, %v7567_v39  ;;  %v5401_v15 = vld [vmem:[%s7339_s30 + $0x2e] sm:$0x1] }
 0x6ed   : > { %4677 = vst.msk [vmem:[%s7579_s18 + $0xd5] sm:$0x1] %vm1070_vm8, %v4615_v43  ;;  %v4618_v18 = vcombine.high %v4614_v46, %v4614_v46  ;;  %4680 = vst.msk [vmem:[%s7579_s18 + $0xed] sm:$0x1] %vm1070_vm8, %v4614_v46  ;;  %v4558_v24 = vrot.slane %v4536_v4, %v7567_v39  ;;  %v4566_v25 = vcombine.high %v4544_v0, %v4544_v0  ;;  %v5528_v14 = vrot.slane %v5400_v9, 7 }
 0x6ee   : > { %4681 = vst.msk [vmem:[%s7579_s18 + $0xf5] sm:$0x1] %vm1070_vm8, %v4616_v47  ;;  %4678 = vst.msk [vmem:[%s7579_s18 + $0xdd] sm:$0x1] %vm1070_vm8, %v4617_v48  ;;  %v4565_v27 = vrot.slane %v4537_v21, %v7567_v39  ;;  %v4567_v28 = vcombine.high %v4551_v23, %v4551_v23  ;;  %v5412_v7 = vsel %vm325_vm1, %v5411_v31, %v5403_v35  ;;  %v5399_v19 = vld [vmem:[%s7339_s30 + $0xe] sm:$0x1] }
 0x6ef   : > { %4667 = vst.msk [vmem:[%s7579_s18 + $0x85] sm:$0x1] %vm1070_vm8, %v4544_v0  ;;  %4682 = vst.msk [vmem:[%s7579_s18 + $0xfd] sm:$0x1] %vm1070_vm8, %v4618_v18  ;;  %v4568_v29 = vcombine.high %v4558_v24, %v4558_v24  ;;  %v5414_v11 = vsel %vm328_vm2, %v5413_v5, %v5412_v7  ;;  %v5402_v22 = vld [vmem:[%s7339_s30 + $0x3e] sm:$0x1]  ;;  %v5529_v40 = vsel %vm325_vm1, %v5528_v14, %v5399_v19 }
 0x6f0   : > { %4668 = vst.msk [vmem:[%s7579_s18 + $0x8d] sm:$0x1] %vm1070_vm8, %v4558_v24  ;;  %4669 = vst.msk [vmem:[%s7579_s18 + $0x95] sm:$0x1] %vm1070_vm8, %v4566_v25  ;;  %v6965_v30 = vpop.f32.mrb[36].mxu0  ;;  %v4569_v33 = vcombine.high %v4565_v27, %v4565_v27  ;;  %v5416_v20 = vsel %vm331_vm3, %v5415_v10, %v5414_v11  ;;  %v5530_v36 = vrot.slane %v5401_v15, 6 }
 0x6f1   : > { %4671 = vst.msk [vmem:[%s7579_s18 + $0xa5] sm:$0x1] %vm1070_vm8, %v4551_v23  ;;  %4670 = vst.msk [vmem:[%s7579_s18 + $0x9d] sm:$0x1] %vm1070_vm8, %v4568_v29  ;;  %v4886_v34 = vpop.f32.mrb[37].mxu0  ;;  %v5532_v44 = vrot.slane %v5402_v22, 5 }
 0x6f2   : > { %4672 = vst.msk [vmem:[%s7579_s18 + $0xad] sm:$0x1] %vm1070_vm8, %v4565_v27  ;;  %4673 = vst.msk [vmem:[%s7579_s18 + $0xb5] sm:$0x1] %vm1070_vm8, %v4567_v28  ;;  %v5531_v45 = vsel %vm328_vm2, %v5530_v36, %v5529_v40 }
 0x6f3   : > { %4674 = vst.msk [vmem:[%s7579_s18 + $0xbd] sm:$0x1] %vm1070_vm8, %v4569_v33  ;;  %v5533_v46 = vsel %vm331_vm3, %v5532_v44, %v5531_v45 }
 0x6f4   : > { %v6968_v6 = vpop.f32.mrb[38].mxu0 }
 0x6f5   : > { %v4896_v8 = vpop.f32.mrb[39].mxu0 }
 0x6f8   : > { %v6971_v13 = vpop.f32.mrb[40].mxu0 }
 0x6f9   : > { %v4906_v38 = vpop.f32.mrb[41].mxu0 }
 0x6fa   : > { %6979 = vmatprep.mubr.msk.f32.mxu1 %vm607_vm5, %v4906_v38 }
 0x6fb   : > { %6980 = vmatmul.mubr.msk.f32.vlgmr.msra.gmra.mrb[36].mxu1 %vm607_vm5, %v6971_v13 }
 0x6fc   : > { %v6974_v37 = vpop.f32.mrb[42].mxu0  ;;  %7098 = vmatpush3.bf16.msra.mxu1 %v7482_v41 }
 0x6fd   : > { %v4916_v43 = vpop.f32.mrb[43].mxu0  ;;  %6995 = vmatprep.subr.msk.mxu1 %vm358_vm4, %v5416_v20 }
 0x6fe   : > { %6982 = vmatprep.mubr.msk.f32.mxu1 %vm607_vm5, %v4916_v43 }
 0x6ff   : > { %6983 = vmatmul.mubr.msk.f32.gmra.mrb[38].mxu1 %vm607_vm5, %v6974_v37 }
 0x700   : > { %6989 = vmatprep.mubr.msk.f32.mxu1 %vm607_vm5, %v4886_v34 }
 0x703   : > { %6990 = vmatmul.mubr.msk.f32.vlgmr.msra.gmra.mrb[36].mxu1 %vm607_vm5, %v6965_v30 }
 0x704   : > { %6992 = vmatprep.mubr.msk.f32.mxu1 %vm607_vm5, %v4896_v8  ;;  %6996 = vmatpush3.msk.msra.mxu1 %vm358_vm4, %v5416_v20 }
 0x705   : > { %7009 = vmatprep.subr.msk.mxu1 %vm358_vm4, %v5533_v46 }
 0x707   : > { %6993 = vmatmul.mubr.msk.f32.gmra.mrb[38].mxu1 %vm607_vm5, %v6968_v6 }
 0x708   : > { %6997 = vmatprep.mubr.msk.f32.mxu1 %vm333_vm0, %v8008_v49 }
 0x70b   : > { %6998 = vmatmul.mubr.msk.f32.vlgmr.msra.gmra.mrb[40].mxu1 %vm333_vm0, %v8015_v50 }
 0x70c   : > { %7010 = vmatpush3.msk.msra.mxu1 %vm358_vm4, %v5533_v46  ;;  %7000 = vmatprep.mubr.msk.f32.mxu1 %vm333_vm0, %v8023_v51 }
 0x70f   : > { %7001 = vmatmul.mubr.msk.f32.gmra.mrb[42].mxu1 %vm333_vm0, %v8031_v53 }
 0x710   : > { %7003 = vmatprep.mubr.msk.f32.mxu1 %vm333_vm0, %v8038_v52 }
 0x713   : > { %7004 = vmatmul.mubr.msk.f32.gmra.mrb[44].mxu1 %vm333_vm0, %v8045_v54 }
 0x714   : > { %7006 = vmatprep.mubr.msk.f32.mxu1 %vm333_vm0, %v8052_v55 }
 0x717   : > { %7007 = vmatmul.mubr.msk.f32.gmra.mrb[46].mxu1 %vm333_vm0, %v8059_v56 }
 0x718   : > { %7011 = vmatprep.mubr.msk.f32.mxu1 %vm333_vm0, %v8066_v57 }
 0x71b   : > { %7012 = vmatmul.mubr.msk.f32.vlgmr.msra.gmra.mrb[40].mxu1 %vm333_vm0, %v8073_v58 }
 0x71c   : > { %7014 = vmatprep.mubr.msk.f32.mxu1 %vm333_vm0, %v8080_v59 }
 0x71f   : > { %7015 = vmatmul.mubr.msk.f32.gmra.mrb[42].mxu1 %vm333_vm0, %v8089_v60 }
 0x720   : > { %7017 = vmatprep.mubr.msk.f32.mxu1 %vm333_vm0, %v8096_v61 }
 0x723   : > { %7018 = vmatmul.mubr.msk.f32.gmra.mrb[44].mxu1 %vm333_vm0, %v8103_v62 }
 0x724   : > { %7020 = vmatprep.mubr.msk.f32.mxu1 %vm333_vm0, %v8110_v63 }
 0x727   : > { %7021 = vmatmul.mubr.msk.f32.gmra.mrb[46].mxu1 %vm333_vm0, %v8117_v1 }
 0x7d6   : > { %v6991_v49 = vpop.f32.mrb[36].mxu1 }
 0x7d7   : > { %v5120_v50 = vadd.f32 %v6991_v49, %v7564_v17  ;;  %v5100_v51 = vpop.f32.mrb[37].mxu1 }
 0x7d8   : > { %v5119_v53 = vadd.f32 %v5100_v51, %v7560_v12 }
 0x7d9   : > { %vm5124_vm1 = vcmp.ge.f32.partialorder %v5120_v50, 0.0  ;;  %v5128_v52 = vmul.f32 0.01, %v5120_v50 }
 0x7da   : > { %vm5123_vm2 = vcmp.ge.f32.partialorder %v5119_v53, 0.0  ;;  %v5127_v54 = vmul.f32 0.01, %v5119_v53  ;;  %v6994_v55 = vpop.f32.mrb[38].mxu1 }
 0x7db   : > { %v5132_v56 = vsel %vm5124_vm1, %v5120_v50, %v5128_v52  ;;  %v5122_v57 = vadd.f32 %v6994_v55, %v7570_v42  ;;  %v5110_v58 = vpop.f32.mrb[39].mxu1 }
 0x7dc   : > { %v5188_v59 = vcombine.high %v5132_v56, %v5132_v56  ;;  %v5195_v60 = vrot.slane %v5132_v56, %v7567_v39  ;;  %v5131_v61 = vsel %vm5123_vm2, %v5119_v53, %v5127_v54  ;;  %v5121_v62 = vadd.f32 %v5110_v58, %v7562_v16 }
 0x7dd   : > { %v5139_v63 = vcombine.high %v5131_v61, %v5131_v61  ;;  %v5146_v1 = vrot.slane %v5131_v61, %v7567_v39  ;;  %vm5126_vm0 = vcmp.ge.f32.partialorder %v5122_v57, 0.0  ;;  %v5130_v47 = vmul.f32 0.01, %v5122_v57 }
 0x7de   : > { %v5202_v48 = vrot.slane %v5188_v59, %v7567_v39  ;;  %v5203_v2 = vcombine.high %v5195_v60, %v5195_v60  ;;  %v5211_v4 = vrot.slane %v5195_v60, %v7567_v39  ;;  %vm5125_vm3 = vcmp.ge.f32.partialorder %v5121_v62, 0.0 }
 0x7df   : > { %v5153_v0 = vrot.slane %v5139_v63, %v7567_v39  ;;  %v5154_v18 = vcombine.high %v5146_v1, %v5146_v1  ;;  %v5162_v21 = vrot.slane %v5146_v1, %v7567_v39  ;;  %v5134_v23 = vsel %vm5126_vm0, %v5122_v57, %v5130_v47 }
 0x7e0   : > { %v5204_v24 = vcombine.high %v5202_v48, %v5202_v48  ;;  %v5218_v25 = vrot.slane %v5202_v48, %v7567_v39  ;;  %v5225_v26 = vrot.slane %v5203_v2, %v7567_v39  ;;  %v5233_v27 = vcombine.high %v5211_v4, %v5211_v4  ;;  %5375 = vst.msk [vmem:[%s7579_s18 + $0x46] sm:$0x1] %vm1070_vm8, %v5211_v4 }
 0x7e1   : > { %v5155_v28 = vcombine.high %v5153_v0, %v5153_v0  ;;  %v5169_v29 = vrot.slane %v5153_v0, %v7567_v39  ;;  %v5176_v30 = vrot.slane %v5154_v18, %v7567_v39  ;;  %v5184_v32 = vcombine.high %v5162_v21, %v5162_v21  ;;  %5367 = vst.msk [vmem:[%s7579_s18 + $0x6] sm:$0x1] %vm1070_vm8, %v5162_v21 }
 0x7e2   : > { %v5232_v31 = vrot.slane %v5204_v24, %v7567_v39  ;;  %v5234_v33 = vcombine.high %v5218_v25, %v5218_v25  ;;  %v5235_v34 = vcombine.high %v5225_v26, %v5225_v26  ;;  %5376 = vst.msk [vmem:[%s7579_s18 + $0x4e] sm:$0x1] %vm1070_vm8, %v5225_v26  ;;  %5377 = vst.msk [vmem:[%s7579_s18 + $0x56] sm:$0x1] %vm1070_vm8, %v5233_v27  ;;  %v5129_v10 = vmul.f32 0.01, %v5121_v62 }
 0x7e3   : > { %5379 = vst.msk [vmem:[%s7579_s18 + $0x66] sm:$0x1] %vm1070_vm8, %v5218_v25  ;;  %v5286_v35 = vcombine.high %v5134_v23, %v5134_v23  ;;  %v5183_v3 = vrot.slane %v5155_v28, %v7567_v39  ;;  %v5185_v5 = vcombine.high %v5169_v29, %v5169_v29  ;;  %v5186_v6 = vcombine.high %v5176_v30, %v5176_v30 }
 0x7e4   : > { %5368 = vst.msk [vmem:[%s7579_s18 + $0xe] sm:$0x1] %vm1070_vm8, %v5176_v30  ;;  %5369 = vst.msk [vmem:[%s7579_s18 + $0x16] sm:$0x1] %vm1070_vm8, %v5184_v32  ;;  %v5293_v7 = vrot.slane %v5134_v23, %v7567_v39  ;;  %v5236_v8 = vcombine.high %v5232_v31, %v5232_v31  ;;  %v5133_v19 = vsel %vm5125_vm3, %v5121_v62, %v5129_v10 }
 0x7e5   : > { %5371 = vst.msk [vmem:[%s7579_s18 + $0x26] sm:$0x1] %vm1070_vm8, %v5169_v29  ;;  %5378 = vst.msk [vmem:[%s7579_s18 + $0x5e] sm:$0x1] %vm1070_vm8, %v5235_v34  ;;  %v5300_v9 = vrot.slane %v5286_v35, %v7567_v39  ;;  %v5187_v11 = vcombine.high %v5183_v3, %v5183_v3  ;;  %v5237_v36 = vcombine.high %v5133_v19, %v5133_v19 }
 0x7e6   : > { %5380 = vst.msk [vmem:[%s7579_s18 + $0x6e] sm:$0x1] %vm1070_vm8, %v5232_v31  ;;  %5381 = vst.msk [vmem:[%s7579_s18 + $0x76] sm:$0x1] %vm1070_vm8, %v5234_v33  ;;  %v5301_v13 = vcombine.high %v5293_v7, %v5293_v7  ;;  %v5309_v15 = vrot.slane %v5293_v7, %v7567_v39  ;;  %v5244_v37 = vrot.slane %v5133_v19, %v7567_v39 }
 0x7e7   : > { %5370 = vst.msk [vmem:[%s7579_s18 + $0x1e] sm:$0x1] %vm1070_vm8, %v5186_v6  ;;  %5372 = vst.msk [vmem:[%s7579_s18 + $0x2e] sm:$0x1] %vm1070_vm8, %v5183_v3  ;;  %v5302_v14 = vcombine.high %v5300_v9, %v5300_v9  ;;  %v5316_v38 = vrot.slane %v5300_v9, %v7567_v39  ;;  %v5251_v45 = vrot.slane %v5237_v36, %v7567_v39 }
 0x7e8   : > { %5373 = vst.msk [vmem:[%s7579_s18 + $0x36] sm:$0x1] %vm1070_vm8, %v5185_v5  ;;  %5382 = vst.msk [vmem:[%s7579_s18 + $0x7e] sm:$0x1] %vm1070_vm8, %v5236_v8  ;;  %v5323_v20 = vrot.slane %v5301_v13, %v7567_v39  ;;  %v5331_v22 = vcombine.high %v5309_v15, %v5309_v15  ;;  %v5252_v46 = vcombine.high %v5244_v37, %v5244_v37 }
 0x7e9   : > { %5374 = vst.msk [vmem:[%s7579_s18 + $0x3e] sm:$0x1] %vm1070_vm8, %v5187_v11  ;;  %5391 = vst.msk [vmem:[%s7579_s18 + $0xc6] sm:$0x1] %vm1070_vm8, %v5309_v15  ;;  %v5330_v40 = vrot.slane %v5302_v14, %v7567_v39  ;;  %v5332_v43 = vcombine.high %v5316_v38, %v5316_v38  ;;  %v5260_v49 = vrot.slane %v5244_v37, %v7567_v39 }
 0x7ea   : > { %5395 = vst.msk [vmem:[%s7579_s18 + $0xe6] sm:$0x1] %vm1070_vm8, %v5316_v38  ;;  %v5333_v44 = vcombine.high %v5323_v20, %v5323_v20  ;;  %5392 = vst.msk [vmem:[%s7579_s18 + $0xce] sm:$0x1] %vm1070_vm8, %v5323_v20  ;;  %v5253_v51 = vcombine.high %v5251_v45, %v5251_v45  ;;  %v5267_v53 = vrot.slane %v5251_v45, %v7567_v39 }
 0x7eb   : > { %5393 = vst.msk [vmem:[%s7579_s18 + $0xd6] sm:$0x1] %vm1070_vm8, %v5331_v22  ;;  %v5334_v50 = vcombine.high %v5330_v40, %v5330_v40  ;;  %5396 = vst.msk [vmem:[%s7579_s18 + $0xee] sm:$0x1] %vm1070_vm8, %v5330_v40  ;;  %v5274_v52 = vrot.slane %v5252_v46, %v7567_v39  ;;  %v5282_v54 = vcombine.high %v5260_v49, %v5260_v49 }
 0x7ec   : > { %5397 = vst.msk [vmem:[%s7579_s18 + $0xf6] sm:$0x1] %vm1070_vm8, %v5332_v43  ;;  %5394 = vst.msk [vmem:[%s7579_s18 + $0xde] sm:$0x1] %vm1070_vm8, %v5333_v44  ;;  %v5281_v55 = vrot.slane %v5253_v51, %v7567_v39  ;;  %v5283_v56 = vcombine.high %v5267_v53, %v5267_v53 }
 0x7ed   : > { %5383 = vst.msk [vmem:[%s7579_s18 + $0x86] sm:$0x1] %vm1070_vm8, %v5260_v49  ;;  %5398 = vst.msk [vmem:[%s7579_s18 + $0xfe] sm:$0x1] %vm1070_vm8, %v5334_v50  ;;  %v5284_v57 = vcombine.high %v5274_v52, %v5274_v52 }
 0x7ee   : > { %5384 = vst.msk [vmem:[%s7579_s18 + $0x8e] sm:$0x1] %vm1070_vm8, %v5274_v52  ;;  %5385 = vst.msk [vmem:[%s7579_s18 + $0x96] sm:$0x1] %vm1070_vm8, %v5282_v54  ;;  %v7013_v58 = vpop.f32.mrb[40].mxu1  ;;  %v5285_v59 = vcombine.high %v5281_v55, %v5281_v55 }
 0x7ef   : > { %5387 = vst.msk [vmem:[%s7579_s18 + $0xa6] sm:$0x1] %vm1070_vm8, %v5267_v53  ;;  %5386 = vst.msk [vmem:[%s7579_s18 + $0x9e] sm:$0x1] %vm1070_vm8, %v5284_v57  ;;  %v5602_v60 = vpop.f32.mrb[41].mxu1 }
 0x7f0   : > { %5388 = vst.msk [vmem:[%s7579_s18 + $0xae] sm:$0x1] %vm1070_vm8, %v5281_v55  ;;  %5389 = vst.msk [vmem:[%s7579_s18 + $0xb6] sm:$0x1] %vm1070_vm8, %v5283_v56 }
 0x7f1   : > { %5390 = vst.msk [vmem:[%s7579_s18 + $0xbe] sm:$0x1] %vm1070_vm8, %v5285_v59 }
 0x7f2   : > { %v7016_v61 = vpop.f32.mrb[42].mxu1 }
 0x7f3   : > { %v5612_v62 = vpop.f32.mrb[43].mxu1 }
 0x7f6   : > { %v7019_v63 = vpop.f32.mrb[44].mxu1 }
 0x7f7   : > { %v5622_v1 = vpop.f32.mrb[45].mxu1 }
 0x7f8   : > { %7027 = vmatprep.mubr.msk.f32.mxu0 %vm607_vm5, %v5622_v1 }
 0x7f9   : > { %7028 = vmatmul.mubr.msk.f32.vlgmr.msra.gmra.mrb[44].mxu0 %vm607_vm5, %v7019_v63 }
 0x7fa   : > { %v7022_v47 = vpop.f32.mrb[46].mxu1  ;;  %7106 = vmatpush3.bf16.msra.mxu0 %v7482_v41 }
 0x7fb   : > { %v5632_v48 = vpop.f32.mrb[47].mxu1 }
 0x7fc   : > { %7030 = vmatprep.mubr.msk.f32.mxu0 %vm607_vm5, %v5632_v48 }
 0x7fd   : > { %7031 = vmatmul.mubr.msk.f32.gmra.mrb[46].mxu0 %vm607_vm5, %v7022_v47 }
 0x7fe   : > { %7037 = vmatprep.mubr.msk.f32.mxu0 %vm607_vm5, %v5602_v60 }
 0x801   : > { %7038 = vmatmul.mubr.msk.f32.vlgmr.msra.gmra.mrb[44].mxu0 %vm607_vm5, %v7013_v58 }
 0x802   : > { %7040 = vmatprep.mubr.msk.f32.mxu0 %vm607_vm5, %v5612_v62 }
 0x805   : > { %7041 = vmatmul.mubr.msk.f32.gmra.mrb[46].mxu0 %vm607_vm5, %v7016_v61 }
 0x8d4   : > { %v7039_v2 = vpop.f32.mrb[44].mxu0 }
 0x8d5   : > { %v5836_v4 = vadd.f32 %v7039_v2, %v7564_v17  ;;  %v5816_v0 = vpop.f32.mrb[45].mxu0 }
 0x8d6   : > { %v5835_v18 = vadd.f32 %v5816_v0, %v7560_v12 }
 0x8d7   : > { %vm5840_vm4 = vcmp.ge.f32.partialorder %v5836_v4, 0.0  ;;  %v5844_v41 = vmul.f32 0.01, %v5836_v4 }
 0x8d8   : > { %vm5839_vm13 = vcmp.ge.f32.partialorder %v5835_v18, 0.0  ;;  %v5843_v21 = vmul.f32 0.01, %v5835_v18  ;;  %v7042_v23 = vpop.f32.mrb[46].mxu0 }
 0x8d9   : > { %v5848_v24 = vsel %vm5840_vm4, %v5836_v4, %v5844_v41  ;;  %v5838_v25 = vadd.f32 %v7042_v23, %v7570_v42  ;;  %v5826_v26 = vpop.f32.mrb[47].mxu0 }
 0x8da   : > { %v5904_v27 = vcombine.high %v5848_v24, %v5848_v24  ;;  %v5911_v28 = vrot.slane %v5848_v24, %v7567_v39  ;;  %v5847_v29 = vsel %vm5839_vm13, %v5835_v18, %v5843_v21  ;;  %v5837_v30 = vadd.f32 %v5826_v26, %v7562_v16 }
 0x8db   : > { %v5855_v32 = vcombine.high %v5847_v29, %v5847_v29  ;;  %v5862_v17 = vrot.slane %v5847_v29, %v7567_v39  ;;  %vm5842_vm5 = vcmp.ge.f32.partialorder %v5838_v25, 0.0  ;;  %v5846_v12 = vmul.f32 0.01, %v5838_v25 }
 0x8dc   : > { %v5918_v31 = vrot.slane %v5904_v27, %v7567_v39  ;;  %v5919_v33 = vcombine.high %v5911_v28, %v5911_v28  ;;  %v5927_v34 = vrot.slane %v5911_v28, %v7567_v39  ;;  %vm5841_vm14 = vcmp.ge.f32.partialorder %v5837_v30, 0.0 }
 0x8dd   : > { %v5869_v42 = vrot.slane %v5855_v32, %v7567_v39  ;;  %v5870_v35 = vcombine.high %v5862_v17, %v5862_v17  ;;  %v5878_v3 = vrot.slane %v5862_v17, %v7567_v39  ;;  %v5850_v16 = vsel %vm5842_vm5, %v5838_v25, %v5846_v12 }
 0x8de   : > { %v5920_v5 = vcombine.high %v5918_v31, %v5918_v31  ;;  %v5934_v6 = vrot.slane %v5918_v31, %v7567_v39  ;;  %v5941_v7 = vrot.slane %v5919_v33, %v7567_v39  ;;  %v5949_v8 = vcombine.high %v5927_v34, %v5927_v34  ;;  %6091 = vst.msk [vmem:[%s7579_s18 + $0x47] sm:$0x1] %vm1070_vm8, %v5927_v34 }
 0x8df   : > { %v5871_v9 = vcombine.high %v5869_v42, %v5869_v42  ;;  %v5885_v10 = vrot.slane %v5869_v42, %v7567_v39  ;;  %v5892_v11 = vrot.slane %v5870_v35, %v7567_v39  ;;  %v5900_v13 = vcombine.high %v5878_v3, %v5878_v3  ;;  %6083 = vst.msk [vmem:[%s7579_s18 + $0x7] sm:$0x1] %vm1070_vm8, %v5878_v3 }
 0x8e0   : > { %v5948_v15 = vrot.slane %v5920_v5, %v7567_v39  ;;  %v5950_v14 = vcombine.high %v5934_v6, %v5934_v6  ;;  %v5951_v38 = vcombine.high %v5941_v7, %v5941_v7  ;;  %6092 = vst.msk [vmem:[%s7579_s18 + $0x4f] sm:$0x1] %vm1070_vm8, %v5941_v7  ;;  %6093 = vst.msk [vmem:[%s7579_s18 + $0x57] sm:$0x1] %vm1070_vm8, %v5949_v8  ;;  %v5845_v44 = vmul.f32 0.01, %v5837_v30 }
 0x8e1   : > { %6095 = vst.msk [vmem:[%s7579_s18 + $0x67] sm:$0x1] %vm1070_vm8, %v5934_v6  ;;  %v6002_v19 = vcombine.high %v5850_v16, %v5850_v16  ;;  %v5899_v20 = vrot.slane %v5871_v9, %v7567_v39  ;;  %v5901_v22 = vcombine.high %v5885_v10, %v5885_v10  ;;  %v5902_v36 = vcombine.high %v5892_v11, %v5892_v11 }
 0x8e2   : > { %6084 = vst.msk [vmem:[%s7579_s18 + $0xf] sm:$0x1] %vm1070_vm8, %v5892_v11  ;;  %6085 = vst.msk [vmem:[%s7579_s18 + $0x17] sm:$0x1] %vm1070_vm8, %v5900_v13  ;;  %v6009_v37 = vrot.slane %v5850_v16, %v7567_v39  ;;  %v5952_v40 = vcombine.high %v5948_v15, %v5948_v15  ;;  %v5849_v53 = vsel %vm5841_vm14, %v5837_v30, %v5845_v44 }
 0x8e3   : > { %6087 = vst.msk [vmem:[%s7579_s18 + $0x27] sm:$0x1] %vm1070_vm8, %v5885_v10  ;;  %6094 = vst.msk [vmem:[%s7579_s18 + $0x5f] sm:$0x1] %vm1070_vm8, %v5951_v38  ;;  %v6016_v43 = vrot.slane %v6002_v19, %v7567_v39  ;;  %v5903_v45 = vcombine.high %v5899_v20, %v5899_v20  ;;  %v5953_v55 = vcombine.high %v5849_v53, %v5849_v53 }
 0x8e4   : > { %6096 = vst.msk [vmem:[%s7579_s18 + $0x6f] sm:$0x1] %vm1070_vm8, %v5948_v15  ;;  %6097 = vst.msk [vmem:[%s7579_s18 + $0x77] sm:$0x1] %vm1070_vm8, %v5950_v14  ;;  %v6017_v46 = vcombine.high %v6009_v37, %v6009_v37  ;;  %v6025_v49 = vrot.slane %v6009_v37, %v7567_v39  ;;  %v5960_v56 = vrot.slane %v5849_v53, %v7567_v39 }
 0x8e5   : > { %6086 = vst.msk [vmem:[%s7579_s18 + $0x1f] sm:$0x1] %vm1070_vm8, %v5902_v36  ;;  %6088 = vst.msk [vmem:[%s7579_s18 + $0x2f] sm:$0x1] %vm1070_vm8, %v5899_v20  ;;  %v6018_v50 = vcombine.high %v6016_v43, %v6016_v43  ;;  %v6032_v51 = vrot.slane %v6016_v43, %v7567_v39  ;;  %v5967_v60 = vrot.slane %v5953_v55, %v7567_v39 }
 0x8e6   : > { %6089 = vst.msk [vmem:[%s7579_s18 + $0x37] sm:$0x1] %vm1070_vm8, %v5901_v22  ;;  %6098 = vst.msk [vmem:[%s7579_s18 + $0x7f] sm:$0x1] %vm1070_vm8, %v5952_v40  ;;  %v6039_v52 = vrot.slane %v6017_v46, %v7567_v39  ;;  %v6047_v54 = vcombine.high %v6025_v49, %v6025_v49  ;;  %v5968_v61 = vcombine.high %v5960_v56, %v5960_v56 }
 0x8e7   : > { %6090 = vst.msk [vmem:[%s7579_s18 + $0x3f] sm:$0x1] %vm1070_vm8, %v5903_v45  ;;  %6107 = vst.msk [vmem:[%s7579_s18 + $0xc7] sm:$0x1] %vm1070_vm8, %v6025_v49  ;;  %v6046_v57 = vrot.slane %v6018_v50, %v7567_v39  ;;  %v6048_v58 = vcombine.high %v6032_v51, %v6032_v51  ;;  %v5976_v62 = vrot.slane %v5960_v56, %v7567_v39 }
 0x8e8   : > { %6111 = vst.msk [vmem:[%s7579_s18 + $0xe7] sm:$0x1] %vm1070_vm8, %v6032_v51  ;;  %v6049_v59 = vcombine.high %v6039_v52, %v6039_v52  ;;  %6108 = vst.msk [vmem:[%s7579_s18 + $0xcf] sm:$0x1] %vm1070_vm8, %v6039_v52  ;;  %v5969_v1 = vcombine.high %v5967_v60, %v5967_v60  ;;  %v5983_v47 = vrot.slane %v5967_v60, %v7567_v39 }
 0x8e9   : > { %6109 = vst.msk [vmem:[%s7579_s18 + $0xd7] sm:$0x1] %vm1070_vm8, %v6047_v54  ;;  %v6050_v63 = vcombine.high %v6046_v57, %v6046_v57  ;;  %6112 = vst.msk [vmem:[%s7579_s18 + $0xef] sm:$0x1] %vm1070_vm8, %v6046_v57  ;;  %v5990_v48 = vrot.slane %v5968_v61, %v7567_v39  ;;  %v5998_v2 = vcombine.high %v5976_v62, %v5976_v62 }
 0x8ea   : > { %6113 = vst.msk [vmem:[%s7579_s18 + $0xf7] sm:$0x1] %vm1070_vm8, %v6048_v58  ;;  %6110 = vst.msk [vmem:[%s7579_s18 + $0xdf] sm:$0x1] %vm1070_vm8, %v6049_v59  ;;  %v5997_v4 = vrot.slane %v5969_v1, %v7567_v39  ;;  %v5999_v0 = vcombine.high %v5983_v47, %v5983_v47 }
 0x8eb   : > { %6099 = vst.msk [vmem:[%s7579_s18 + $0x87] sm:$0x1] %vm1070_vm8, %v5976_v62  ;;  %6114 = vst.msk [vmem:[%s7579_s18 + $0xff] sm:$0x1] %vm1070_vm8, %v6050_v63  ;;  %v6000_v18 = vcombine.high %v5990_v48, %v5990_v48 }
 0x8ec   : > { %6100 = vst.msk [vmem:[%s7579_s18 + $0x8f] sm:$0x1] %vm1070_vm8, %v5990_v48  ;;  %6101 = vst.msk [vmem:[%s7579_s18 + $0x97] sm:$0x1] %vm1070_vm8, %v5998_v2  ;;  %v6001_v41 = vcombine.high %v5997_v4, %v5997_v4 }
 0x8ed   : > { %6103 = vst.msk [vmem:[%s7579_s18 + $0xa7] sm:$0x1] %vm1070_vm8, %v5983_v47  ;;  %6102 = vst.msk [vmem:[%s7579_s18 + $0x9f] sm:$0x1] %vm1070_vm8, %v6000_v18 }
 0x8ee   : > { %6104 = vst.msk [vmem:[%s7579_s18 + $0xaf] sm:$0x1] %vm1070_vm8, %v5997_v4  ;;  %6105 = vst.msk [vmem:[%s7579_s18 + $0xb7] sm:$0x1] %vm1070_vm8, %v5999_v0 }
 0x8ef   : > { %6106 = vst.msk [vmem:[%s7579_s18 + $0xbf] sm:$0x1] %vm1070_vm8, %v6001_v41 }
 0x8f0 PF: > { %s16_s23 = sadd.s32 1, %s7269_s23   ;;  %s8794_s21 = smov %s7265_s22 }
 0x8f1   : > { %p13_p5 = scmp.ge.s32.totalorder %s16_s23, 4   ;;  %s8795_s22 = smov %s8797_s24 }
 0x8f3   :  { %15 = sbr.rel (!%p13_p5) target bundleno = 2 (0x2), region = 74 }

</bundles_post_ra>
